<compile_context>
chip_gen: v5e
topology: v5e:2x2
jax: 0.10.0
libtpu: 0.0.40
codegen_flags: <defaults>
</compile_context>

<pallas_src>
import math
from functools import partial

import jax
import jax.numpy as jnp
from jax import lax
from jax.experimental import pallas as pl
from jax.experimental.pallas import tpu as pltpu


# ----------------------------- small math helpers -----------------------------

def _layernorm(x, w, b, eps=1e-5):
    mu = jnp.mean(x, axis=-1, keepdims=True)
    var = jnp.mean((x - mu) ** 2, axis=-1, keepdims=True)
    return (x - mu) * lax.rsqrt(var + eps) * w + b


def _gelu_exact(x, recip=lambda v: 1.0 / v):
    # torch.nn.GELU() default = exact-erf formulation, via the A&S 7.1.26 polynomial
    # (|erf err| < 1.5e-7).  Rewritten with erf's oddness so there is no sign/abs/where
    # triple:  gelu(x) = relu(x) - 0.5*|x| * poly(t) * exp(-u^2),
    #          u = |x|/sqrt(2),  t = 1/(1 + p*u).
    a1, a2, a3, a4, a5 = 0.254829592, -0.284496736, 1.421413741, -1.453152027, 1.061405429
    p = 0.3275911
    u = jnp.abs(x) * (1.0 / math.sqrt(2.0))
    t = recip(1.0 + p * u)
    poly = ((((a5 * t + a4) * t + a3) * t + a2) * t + a1) * t
    return jnp.maximum(x, 0.0) - (0.5 * math.sqrt(2.0)) * u * (poly * jnp.exp(-u * u))


def _round_up(n, m):
    return ((n + m - 1) // m) * m


# ----------------------------------------------------------------- the kernel --

def gpt_block_kernel(x_ref,
                     ln1w, ln1b, wqkv, bqkv, wp, bp,
                     ln2w, ln2b, w1, b1, wb1, bb1, wb2, bb2, wt, bt,
                     o_ref, *, n_head, seq_len):
    f32, bf16 = jnp.float32, jnp.bfloat16
    M, C = x_ref.shape          # M = bb * T rows of the (B*T, C) slab
    T = seq_len
    bb = M // T                 # batch elements in this row slab
    hd = C // n_head

    x = x_ref[...].astype(f32)                                            # (M, C)

    # ---------------- attention branch:  x = x + proj(attn(ln1(x))) ----------
    h1 = _layernorm(x, ln1w[...], ln1b[...])
    qkv = jnp.dot(h1.astype(bf16), wqkv[...], preferred_element_type=f32) + bqkv[...]
    qkv = qkv.astype(bf16)      # matmul-operand precision; 1/sqrt(hd) already in wq/bq

    def heads_at(col0):
        # one hd-wide lane slice per head, leading-dim-only reshape, leading concat
        return jnp.concatenate(
            [qkv[:, col0 + h * hd: col0 + (h + 1) * hd].reshape(bb, T, hd)
             for h in range(n_head)], axis=0)            # (n_head*bb, T, hd)

    qh = heads_at(0)
    kh = heads_at(C)
    vh = heads_at(2 * C)

    # TODO(synk): for T beyond a few hundred, replace the (nbh, T, T) score/exp
    # temporaries below with a flash-style online-softmax loop over KV tiles.
    s = jnp.einsum('bqd,bkd->bqk', qh, kh, preferred_element_type=f32)    # (nbh,T,T)
    row = lax.broadcasted_iota(jnp.int32, (T, T), 0)
    col = lax.broadcasted_iota(jnp.int32, (T, T), 1)
    s = s + jnp.where(col <= row, 0.0, -1e30)            # additive causal bias (T,T)
    s = s - jnp.max(s, axis=-1, keepdims=True)
    e = jnp.exp(s)
    denom = jnp.sum(e, axis=-1, keepdims=True)           # (nbh, T, 1)
    yh = jnp.einsum('bqk,bkd->bqd', e.astype(bf16), vh, preferred_element_type=f32)
    yh = (yh * pl.reciprocal(denom, approx=True)).astype(bf16)            # (nbh,T,hd)

    # merge heads to a lane-dense (M, C) tile, then ONE full-K output projection
    y = jnp.concatenate(
        [yh[h * bb:(h + 1) * bb].reshape(M, hd) for h in range(n_head)], axis=1)
    x = x + jnp.dot(y, wp[...], preferred_element_type=f32) + bp[...]
    # attn_drop / resid_drop are identity (eval mode)

    # ---------------- MLP branch:  x = x + mlp(ln2(x)) ------------------------
    h2 = _layernorm(x, ln2w[...], ln2b[...])
    h2 = jnp.dot(h2.astype(bf16), w1[...], preferred_element_type=f32) + b1[...]
    h2 = _gelu_exact(h2, recip=lambda v: pl.reciprocal(v, approx=True))
    # deterministic stand-in for bayesian_model(4C, 5C, [200, 200]); hiddens are
    # zero-padded to a lane multiple (exact), wb3@w2 folded offline into wt
    h2 = jnp.dot(h2.astype(bf16), wb1[...], preferred_element_type=f32) + bb1[...]
    h2 = jnp.maximum(h2, 0.0)
    h2 = jnp.dot(h2.astype(bf16), wb2[...], preferred_element_type=f32) + bb2[...]
    h2 = jnp.maximum(h2, 0.0)
    h2 = jnp.dot(h2.astype(bf16), wt[...], preferred_element_type=f32) + bt[...]

    o_ref[...] = (x + h2).astype(o_ref.dtype)            # resid dropout = identity


# -------------------------------------------------------------- param packing --

def _prepare_params(p, n_head, compute_dtype=jnp.bfloat16):
    """Fuse qkv (1/sqrt(hd) folded into wq/bq), fold wb3@w2 into one tail matmul,
    pad the 200-wide hiddens to a 128 multiple, store matmul weights in bf16
    (biases / LN params stay f32)."""
    f32 = jnp.float32
    C = p["wq"].shape[0]
    scale = 1.0 / math.sqrt(C // n_head)

    w_qkv = jnp.concatenate([p["wq"] * scale, p["wk"], p["wv"]], axis=1)   # (C, 3C)
    b_qkv = jnp.concatenate([p["bq"] * scale, p["bk"], p["bv"]], axis=1)   # (1, 3C)

    # no nonlinearity between wb3 and w2 -> fold into a single tail matmul (f32 fold)
    w_tail = p["wb3"] @ p["w2"]                                            # (H2, C)
    b_tail = p["bb3"] @ p["w2"] + p["b2"]                                  # (1, C)

    H1, H2 = p["wb1"].shape[1], p["wb2"].shape[1]
    H1p, H2p = _round_up(H1, 128), _round_up(H2, 128)
    wb1 = jnp.pad(p["wb1"], ((0, 0), (0, H1p - H1)))
    bb1 = jnp.pad(p["bb1"], ((0, 0), (0, H1p - H1)))
    wb2 = jnp.pad(p["wb2"], ((0, H1p - H1), (0, H2p - H2)))
    bb2 = jnp.pad(p["bb2"], ((0, 0), (0, H2p - H2)))
    w_tail = jnp.pad(w_tail, ((0, H2p - H2), (0, 0)))

    cd = compute_dtype
    return [p["ln1_w"].astype(f32), p["ln1_b"].astype(f32),
            w_qkv.astype(cd), b_qkv.astype(f32),
            p["wp"].astype(cd), p["bp"].astype(f32),
            p["ln2_w"].astype(f32), p["ln2_b"].astype(f32),
            p["w1"].astype(cd), p["b1"].astype(f32),
            wb1.astype(cd), bb1.astype(f32), wb2.astype(cd), bb2.astype(f32),
            w_tail.astype(cd), b_tail.astype(f32)]


# ----------------------------------------------------------- budget selection --

def _default_vmem_limit():
    # ~3/4 of the chip's VMEM: ~96 MiB on 128-MiB parts (v5e/v6e), ~48 MiB on
    # 64-MiB/TC (v7x-class) parts.
    try:
        cap = int(pltpu.get_tpu_info().vmem_capacity_bytes)
    except Exception:
        cap = 64 * 1024 * 1024                   # conservative fallback
    return cap * 3 // 4


def _pick_bb(B, T, n_head, target_rows, vmem_limit_bytes):
    """Batch elements per row slab: large slabs (amortize per-step overhead, tall MXU
    M tiles), sublane-aligned blocks, bounded (nbh,T,T) f32 score residency, and --
    whenever B allows it -- at least two grid steps so the "parallel" axis can shard
    across v7x's two TensorCores."""
    divisors = [d for d in range(1, B + 1) if B % d == 0]
    score_budget = max(vmem_limit_bytes // 6, 1)

    def ok(d):
        rows = d * T
        if rows > max(target_rows, T):
            return False
        if d < B and rows % 8 != 0:              # keep row blocks sublane-aligned
            return False
        if d > 1 and d * n_head * T * T * 4 > score_budget:
            return False
        return True

    multi = [d for d in divisors if ok(d) and (B // d) >= 2]
    any_ok = [d for d in divisors if ok(d)]
    return max(multi or any_ok or [B])


# ------------------------------------------------------------------- wrapper --

def gpt_block(x, params, n_head, *, target_rows=None, vmem_limit_bytes=None):
    B, T, C = x.shape
    assert C % n_head == 0
    if vmem_limit_bytes is None:
        vmem_limit_bytes = _default_vmem_limit()
    if target_rows is None:                      # bigger slabs where VMEM allows it
        target_rows = 512 if vmem_limit_bytes >= 80 * 1024 * 1024 else 256

    plist = _prepare_params(params, n_head)
    bb = _pick_bb(B, T, n_head, target_rows, vmem_limit_bytes)
    m_blk = bb * T
    x2 = x.reshape(B * T, C)                     # lane/sublane-dense slab I/O

    def run(single_buffer_weights):
        wkw = dict(pipeline_mode=pl.Buffered(1)) if single_buffer_weights else {}
        in_specs = [pl.BlockSpec((m_blk, C), lambda i: (i, 0))]
        for w in plist:                          # grid-invariant weights / biases
            in_specs.append(pl.BlockSpec(w.shape, lambda i: (0, 0), **wkw))
        return pl.pallas_call(
            partial(gpt_block_kernel, n_head=n_head, seq_len=T),
            out_shape=jax.ShapeDtypeStruct((B * T, C), x.dtype),
            grid_spec=pltpu.PrefetchScalarGridSpec(
                num_scalar_prefetch=0,
                grid=(B // bb,),
                in_specs=in_specs,
                out_specs=pl.BlockSpec((m_blk, C), lambda i: (i, 0))),
            compiler_params=pltpu.CompilerParams(
                dimension_semantics=("parallel",),
                vmem_limit_bytes=int(vmem_limit_bytes)),
        )(x2, *plist)

    try:
        out = run(True)       # single-buffer the grid-invariant weight blocks
    except Exception:         # fallback if Buffered(1) is unsupported in this jax
        out = run(False)
    return out.reshape(B, T, C)


# -------------------------------------------------------- pure-JAX reference --

def ref_forward(x, p, n_head):
    B, T, C = x.shape
    hd = C // n_head
    h = _layernorm(x, p["ln1_w"], p["ln1_b"])
    q = (h @ p["wq"] + p["bq"]).reshape(B, T, n_head, hd).transpose(0, 2, 1, 3)
    k = (h @ p["wk"] + p["bk"]).reshape(B, T, n_head, hd).transpose(0, 2, 1, 3)
    v = (h @ p["wv"] + p["bv"]).reshape(B, T, n_head, hd).transpose(0, 2, 1, 3)
    att = (q @ jnp.swapaxes(k, -2, -1)) * (1.0 / math.sqrt(hd))
    mask = jnp.tril(jnp.ones((T, T), bool))
    att = jnp.where(mask, att, -jnp.inf)
    att = jax.nn.softmax(att, axis=-1)
    y = (att @ v).transpose(0, 2, 1, 3).reshape(B, T, C)
    y = y @ p["wp"] + p["bp"]
    x = x + y
    h = _layernorm(x, p["ln2_w"], p["ln2_b"])
    h = jax.nn.gelu(h @ p["w1"] + p["b1"], approximate=False)
    h = jax.nn.relu(h @ p["wb1"] + p["bb1"])
    h = jax.nn.relu(h @ p["wb2"] + p["bb2"])
    h = h @ p["wb3"] + p["bb3"]
    h = h @ p["w2"] + p["b2"]
    return x + h


# ------------------------------------------------------- deterministic params --

def init_params(key, n_embd):
    C = n_embd
    H1 = H2 = 200
    dims = {
        "wq": (C, C), "wk": (C, C), "wv": (C, C), "wp": (C, C),
        "w1": (C, 4 * C), "wb1": (4 * C, H1), "wb2": (H1, H2),
        "wb3": (H2, 5 * C), "w2": (5 * C, C),
    }
    params = {
        "ln1_w": jnp.ones((1, C), jnp.float32),
        "ln1_b": jnp.zeros((1, C), jnp.float32),
        "ln2_w": jnp.ones((1, C), jnp.float32),
        "ln2_b": jnp.zeros((1, C), jnp.float32),
    }
    keys = jax.random.split(key, 2 * len(dims))
    for i, (name, shp) in enumerate(dims.items()):
        params[name] = jax.random.normal(keys[2 * i], shp, jnp.float32) * 0.02
        params["b" + name[1:]] = (
            jax.random.normal(keys[2 * i + 1], (1, shp[1]), jnp.float32) * 0.02)
    return params


if __name__ == "__main__":
    B, T, C, N_HEAD = 2, 8, 32, 4          # block_size = T = 8, n_embd = 32
    key = jax.random.PRNGKey(0)
    kx, kp = jax.random.split(key)
    x = jax.random.normal(kx, (B, T, C), jnp.float32)
    params = init_params(kp, C)

    out = jax.block_until_ready(gpt_block(x, params, N_HEAD))
    ref = jax.block_until_ready(ref_forward(x, params, N_HEAD))

    assert out.shape == (B, T, C)
    # tolerance reflects bf16 matmul operands + approx-EUP reciprocals in the kernel
    if not jnp.allclose(out, ref, atol=3e-3, rtol=3e-3):
        err = float(jnp.max(jnp.abs(out - ref)))
        raise AssertionError(
            f"Pallas kernel does not match JAX reference (max abs err {err})")
    print("KERNEL_OK")
</pallas_src>

<mosaic_0001>
module attributes {stable_mosaic.version = 11 : i64} {
  func.func @gpt_block_kernel(%arg0: i32, %arg1: memref<8x32xf32, #tpu.memory_space<vmem>>, %arg2: memref<1x32xf32, #tpu.memory_space<vmem>>, %arg3: memref<1x32xf32, #tpu.memory_space<vmem>>, %arg4: memref<32x96xbf16, #tpu.memory_space<vmem>>, %arg5: memref<1x96xf32, #tpu.memory_space<vmem>>, %arg6: memref<32x32xbf16, #tpu.memory_space<vmem>>, %arg7: memref<1x32xf32, #tpu.memory_space<vmem>>, %arg8: memref<1x32xf32, #tpu.memory_space<vmem>>, %arg9: memref<1x32xf32, #tpu.memory_space<vmem>>, %arg10: memref<32x128xbf16, #tpu.memory_space<vmem>>, %arg11: memref<1x128xf32, #tpu.memory_space<vmem>>, %arg12: memref<128x256xbf16, #tpu.memory_space<vmem>>, %arg13: memref<1x256xf32, #tpu.memory_space<vmem>>, %arg14: memref<256x256xbf16, #tpu.memory_space<vmem>>, %arg15: memref<1x256xf32, #tpu.memory_space<vmem>>, %arg16: memref<256x32xbf16, #tpu.memory_space<vmem>>, %arg17: memref<1x32xf32, #tpu.memory_space<vmem>>, %arg18: memref<8x32xf32, #tpu.memory_space<vmem>>) attributes {dimension_semantics = [#tpu.dimension_semantics<parallel>], iteration_bounds = array<i64: 2>, scalar_prefetch = 0 : i64, scratch_operands = 0 : i64, tpu.core_type = #tpu.core_type<tc>, window_params = [{transform_indices = @transform_0, window_bounds = array<i64: 8, 32>}, {pipeline_mode = #tpu.pipeline_mode<synchronous>, transform_indices = @transform_1, window_bounds = array<i64: 1, 32>}, {pipeline_mode = #tpu.pipeline_mode<synchronous>, transform_indices = @transform_2, window_bounds = array<i64: 1, 32>}, {pipeline_mode = #tpu.pipeline_mode<synchronous>, transform_indices = @transform_3, window_bounds = array<i64: 32, 96>}, {pipeline_mode = #tpu.pipeline_mode<synchronous>, transform_indices = @transform_4, window_bounds = array<i64: 1, 96>}, {pipeline_mode = #tpu.pipeline_mode<synchronous>, transform_indices = @transform_5, window_bounds = array<i64: 32, 32>}, {pipeline_mode = #tpu.pipeline_mode<synchronous>, transform_indices = @transform_6, window_bounds = array<i64: 1, 32>}, {pipeline_mode = #tpu.pipeline_mode<synchronous>, transform_indices = @transform_7, window_bounds = array<i64: 1, 32>}, {pipeline_mode = #tpu.pipeline_mode<synchronous>, transform_indices = @transform_8, window_bounds = array<i64: 1, 32>}, {pipeline_mode = #tpu.pipeline_mode<synchronous>, transform_indices = @transform_9, window_bounds = array<i64: 32, 128>}, {pipeline_mode = #tpu.pipeline_mode<synchronous>, transform_indices = @transform_10, window_bounds = array<i64: 1, 128>}, {pipeline_mode = #tpu.pipeline_mode<synchronous>, transform_indices = @transform_11, window_bounds = array<i64: 128, 256>}, {pipeline_mode = #tpu.pipeline_mode<synchronous>, transform_indices = @transform_12, window_bounds = array<i64: 1, 256>}, {pipeline_mode = #tpu.pipeline_mode<synchronous>, transform_indices = @transform_13, window_bounds = array<i64: 256, 256>}, {pipeline_mode = #tpu.pipeline_mode<synchronous>, transform_indices = @transform_14, window_bounds = array<i64: 1, 256>}, {pipeline_mode = #tpu.pipeline_mode<synchronous>, transform_indices = @transform_15, window_bounds = array<i64: 256, 32>}, {pipeline_mode = #tpu.pipeline_mode<synchronous>, transform_indices = @transform_16, window_bounds = array<i64: 1, 32>}, {transform_indices = @transform_17, window_bounds = array<i64: 8, 32>}]} {
    %c0 = arith.constant 0 : index
    %c0_0 = arith.constant 0 : index
    %0 = vector.load %arg1[%c0, %c0_0] : memref<8x32xf32, #tpu.memory_space<vmem>>, vector<8x32xf32>
    %c0_1 = arith.constant 0 : index
    %c0_2 = arith.constant 0 : index
    %1 = vector.load %arg2[%c0_1, %c0_2] : memref<1x32xf32, #tpu.memory_space<vmem>>, vector<1x32xf32>
    %c0_3 = arith.constant 0 : index
    %c0_4 = arith.constant 0 : index
    %2 = vector.load %arg3[%c0_3, %c0_4] : memref<1x32xf32, #tpu.memory_space<vmem>>, vector<1x32xf32>
    %cst = arith.constant dense<0.000000e+00> : vector<8xf32>
    %3 = vector.multi_reduction <add>, %0, %cst [1] : vector<8x32xf32> to vector<8xf32>
    %4 = vector.shape_cast %3 : vector<8xf32> to vector<8x1xf32>
    %cst_5 = arith.constant 3.200000e+01 : f32
    %5 = vector.broadcast %cst_5 : f32 to vector<8x1xf32>
    %6 = arith.divf %4, %5 : vector<8x1xf32>
    %7 = vector.broadcast %6 : vector<8x1xf32> to vector<8x32xf32>
    %8 = arith.subf %0, %7 : vector<8x32xf32>
    %9 = arith.mulf %8, %8 : vector<8x32xf32>
    %cst_6 = arith.constant dense<0.000000e+00> : vector<8xf32>
    %10 = vector.multi_reduction <add>, %9, %cst_6 [1] : vector<8x32xf32> to vector<8xf32>
    %11 = vector.shape_cast %10 : vector<8xf32> to vector<8x1xf32>
    %cst_7 = arith.constant 3.200000e+01 : f32
    %12 = vector.broadcast %cst_7 : f32 to vector<8x1xf32>
    %13 = arith.divf %11, %12 : vector<8x1xf32>
    %14 = vector.broadcast %6 : vector<8x1xf32> to vector<8x32xf32>
    %15 = arith.subf %0, %14 : vector<8x32xf32>
    %cst_8 = arith.constant 9.99999974E-6 : f32
    %16 = vector.broadcast %cst_8 : f32 to vector<8x1xf32>
    %17 = arith.addf %13, %16 : vector<8x1xf32>
    %18 = math.rsqrt %17 : vector<8x1xf32>
    %19 = vector.broadcast %18 : vector<8x1xf32> to vector<8x32xf32>
    %20 = arith.mulf %15, %19 : vector<8x32xf32>
    %21 = vector.broadcast %1 : vector<1x32xf32> to vector<8x32xf32>
    %22 = arith.mulf %20, %21 : vector<8x32xf32>
    %23 = vector.broadcast %2 : vector<1x32xf32> to vector<8x32xf32>
    %24 = arith.addf %22, %23 : vector<8x32xf32>
    %25 = arith.truncf %24 : vector<8x32xf32> to vector<8x32xbf16>
    %c0_9 = arith.constant 0 : index
    %c0_10 = arith.constant 0 : index
    %26 = vector.load %arg4[%c0_9, %c0_10] : memref<32x96xbf16, #tpu.memory_space<vmem>>, vector<32x96xbf16>
    %cst_11 = arith.constant dense<0.000000e+00> : vector<8x96xf32>
    %27 = tpu.matmul %25, %26, %cst_11 {dimension_numbers = #tpu.dot_dimension_numbers<[1], [0], [0], [1], [0, 0, 1, 1], [], []>} : vector<8x32xbf16>, vector<32x96xbf16>, vector<8x96xf32> -> vector<8x96xf32>
    %c0_12 = arith.constant 0 : index
    %c0_13 = arith.constant 0 : index
    %28 = vector.load %arg5[%c0_12, %c0_13] : memref<1x96xf32, #tpu.memory_space<vmem>>, vector<1x96xf32>
    %29 = vector.broadcast %28 : vector<1x96xf32> to vector<8x96xf32>
    %30 = arith.addf %27, %29 : vector<8x96xf32>
    %31 = arith.truncf %30 : vector<8x96xf32> to vector<8x96xbf16>
    %32 = vector.extract_strided_slice %31 {offsets = [0, 0], sizes = [8, 8], strides = [1, 1]} : vector<8x96xbf16> to vector<8x8xbf16>
    %33 = vector.shape_cast %32 : vector<8x8xbf16> to vector<1x8x8xbf16>
    %34 = vector.extract_strided_slice %31 {offsets = [0, 8], sizes = [8, 8], strides = [1, 1]} : vector<8x96xbf16> to vector<8x8xbf16>
    %35 = vector.shape_cast %34 : vector<8x8xbf16> to vector<1x8x8xbf16>
    %36 = vector.extract_strided_slice %31 {offsets = [0, 16], sizes = [8, 8], strides = [1, 1]} : vector<8x96xbf16> to vector<8x8xbf16>
    %37 = vector.shape_cast %36 : vector<8x8xbf16> to vector<1x8x8xbf16>
    %38 = vector.extract_strided_slice %31 {offsets = [0, 24], sizes = [8, 8], strides = [1, 1]} : vector<8x96xbf16> to vector<8x8xbf16>
    %39 = vector.shape_cast %38 : vector<8x8xbf16> to vector<1x8x8xbf16>
    %40 = tpu.concatenate %33, %35, %37, %39 in 0 : vector<1x8x8xbf16>, vector<1x8x8xbf16>, vector<1x8x8xbf16>, vector<1x8x8xbf16> -> vector<4x8x8xbf16>
    %41 = vector.extract_strided_slice %31 {offsets = [0, 32], sizes = [8, 8], strides = [1, 1]} : vector<8x96xbf16> to vector<8x8xbf16>
    %42 = vector.shape_cast %41 : vector<8x8xbf16> to vector<1x8x8xbf16>
    %43 = vector.extract_strided_slice %31 {offsets = [0, 40], sizes = [8, 8], strides = [1, 1]} : vector<8x96xbf16> to vector<8x8xbf16>
    %44 = vector.shape_cast %43 : vector<8x8xbf16> to vector<1x8x8xbf16>
    %45 = vector.extract_strided_slice %31 {offsets = [0, 48], sizes = [8, 8], strides = [1, 1]} : vector<8x96xbf16> to vector<8x8xbf16>
    %46 = vector.shape_cast %45 : vector<8x8xbf16> to vector<1x8x8xbf16>
    %47 = vector.extract_strided_slice %31 {offsets = [0, 56], sizes = [8, 8], strides = [1, 1]} : vector<8x96xbf16> to vector<8x8xbf16>
    %48 = vector.shape_cast %47 : vector<8x8xbf16> to vector<1x8x8xbf16>
    %49 = tpu.concatenate %42, %44, %46, %48 in 0 : vector<1x8x8xbf16>, vector<1x8x8xbf16>, vector<1x8x8xbf16>, vector<1x8x8xbf16> -> vector<4x8x8xbf16>
    %50 = vector.extract_strided_slice %31 {offsets = [0, 64], sizes = [8, 8], strides = [1, 1]} : vector<8x96xbf16> to vector<8x8xbf16>
    %51 = vector.shape_cast %50 : vector<8x8xbf16> to vector<1x8x8xbf16>
    %52 = vector.extract_strided_slice %31 {offsets = [0, 72], sizes = [8, 8], strides = [1, 1]} : vector<8x96xbf16> to vector<8x8xbf16>
    %53 = vector.shape_cast %52 : vector<8x8xbf16> to vector<1x8x8xbf16>
    %54 = vector.extract_strided_slice %31 {offsets = [0, 80], sizes = [8, 8], strides = [1, 1]} : vector<8x96xbf16> to vector<8x8xbf16>
    %55 = vector.shape_cast %54 : vector<8x8xbf16> to vector<1x8x8xbf16>
    %56 = vector.extract_strided_slice %31 {offsets = [0, 88], sizes = [8, 8], strides = [1, 1]} : vector<8x96xbf16> to vector<8x8xbf16>
    %57 = vector.shape_cast %56 : vector<8x8xbf16> to vector<1x8x8xbf16>
    %58 = tpu.concatenate %51, %53, %55, %57 in 0 : vector<1x8x8xbf16>, vector<1x8x8xbf16>, vector<1x8x8xbf16>, vector<1x8x8xbf16> -> vector<4x8x8xbf16>
    "tpu.trace_start"() <{level = 10 : i32, message = "bqd,bkd->bqk"}> : () -> ()
    %cst_14 = arith.constant dense<0.000000e+00> : vector<4x8x8xf32>
    %59 = tpu.matmul %40, %49, %cst_14 {dimension_numbers = #tpu.dot_dimension_numbers<[2], [2], [1], [1], [0, 0, 0, 1, 1, 1], [0], [0]>} : vector<4x8x8xbf16>, vector<4x8x8xbf16>, vector<4x8x8xf32> -> vector<4x8x8xf32>
    "tpu.trace_stop"() : () -> ()
    %60 = tpu.iota {dimensions = array<i32: 0>} : vector<8x8xi32>
    %61 = tpu.iota {dimensions = array<i32: 1>} : vector<8x8xi32>
    %62 = arith.cmpi sle, %61, %60 : vector<8x8xi32>
    %cst_15 = arith.constant 0.000000e+00 : f32
    %cst_16 = arith.constant -1.000000e+30 : f32
    %63 = vector.broadcast %cst_15 : f32 to vector<8x8xf32>
    %64 = vector.broadcast %cst_16 : f32 to vector<8x8xf32>
    %65 = arith.select %62, %63, %64 : vector<8x8xi1>, vector<8x8xf32>
    %66 = vector.shape_cast %65 : vector<8x8xf32> to vector<1x8x8xf32>
    %67 = vector.broadcast %66 : vector<1x8x8xf32> to vector<4x8x8xf32>
    %68 = arith.addf %59, %67 : vector<4x8x8xf32>
    %cst_17 = arith.constant dense<0xFF800000> : vector<4x8xf32>
    %69 = vector.multi_reduction <maximumf>, %68, %cst_17 [2] : vector<4x8x8xf32> to vector<4x8xf32>
    %70 = vector.shape_cast %69 : vector<4x8xf32> to vector<4x8x1xf32>
    %71 = vector.broadcast %70 : vector<4x8x1xf32> to vector<4x8x8xf32>
    %72 = arith.subf %68, %71 : vector<4x8x8xf32>
    %73 = math.exp %72 : vector<4x8x8xf32>
    %cst_18 = arith.constant dense<0.000000e+00> : vector<4x8xf32>
    %74 = vector.multi_reduction <add>, %73, %cst_18 [2] : vector<4x8x8xf32> to vector<4x8xf32>
    %75 = vector.shape_cast %74 : vector<4x8xf32> to vector<4x8x1xf32>
    %76 = arith.truncf %73 : vector<4x8x8xf32> to vector<4x8x8xbf16>
    "tpu.trace_start"() <{level = 10 : i32, message = "bqk,bkd->bqd"}> : () -> ()
    %cst_19 = arith.constant dense<0.000000e+00> : vector<4x8x8xf32>
    %77 = tpu.matmul %76, %58, %cst_19 {dimension_numbers = #tpu.dot_dimension_numbers<[2], [1], [1], [2], [0, 0, 0, 1, 1, 2], [0], [0]>} : vector<4x8x8xbf16>, vector<4x8x8xbf16>, vector<4x8x8xf32> -> vector<4x8x8xf32>
    "tpu.trace_stop"() : () -> ()
    %78 = tpu.reciprocal %75 {approx = true} : vector<4x8x1xf32> -> vector<4x8x1xf32>
    %79 = vector.broadcast %78 : vector<4x8x1xf32> to vector<4x8x8xf32>
    %80 = arith.mulf %77, %79 : vector<4x8x8xf32>
    %81 = arith.truncf %80 : vector<4x8x8xf32> to vector<4x8x8xbf16>
    %82 = vector.extract_strided_slice %81 {offsets = [0, 0, 0], sizes = [1, 8, 8], strides = [1, 1, 1]} : vector<4x8x8xbf16> to vector<1x8x8xbf16>
    %83 = vector.shape_cast %82 : vector<1x8x8xbf16> to vector<8x8xbf16>
    %84 = vector.extract_strided_slice %81 {offsets = [1, 0, 0], sizes = [1, 8, 8], strides = [1, 1, 1]} : vector<4x8x8xbf16> to vector<1x8x8xbf16>
    %85 = vector.shape_cast %84 : vector<1x8x8xbf16> to vector<8x8xbf16>
    %86 = vector.extract_strided_slice %81 {offsets = [2, 0, 0], sizes = [1, 8, 8], strides = [1, 1, 1]} : vector<4x8x8xbf16> to vector<1x8x8xbf16>
    %87 = vector.shape_cast %86 : vector<1x8x8xbf16> to vector<8x8xbf16>
    %88 = vector.extract_strided_slice %81 {offsets = [3, 0, 0], sizes = [1, 8, 8], strides = [1, 1, 1]} : vector<4x8x8xbf16> to vector<1x8x8xbf16>
    %89 = vector.shape_cast %88 : vector<1x8x8xbf16> to vector<8x8xbf16>
    %90 = tpu.concatenate %83, %85, %87, %89 in 1 : vector<8x8xbf16>, vector<8x8xbf16>, vector<8x8xbf16>, vector<8x8xbf16> -> vector<8x32xbf16>
    %c0_20 = arith.constant 0 : index
    %c0_21 = arith.constant 0 : index
    %91 = vector.load %arg6[%c0_20, %c0_21] : memref<32x32xbf16, #tpu.memory_space<vmem>>, vector<32x32xbf16>
    %cst_22 = arith.constant dense<0.000000e+00> : vector<8x32xf32>
    %92 = tpu.matmul %90, %91, %cst_22 {dimension_numbers = #tpu.dot_dimension_numbers<[1], [0], [0], [1], [0, 0, 1, 1], [], []>} : vector<8x32xbf16>, vector<32x32xbf16>, vector<8x32xf32> -> vector<8x32xf32>
    %93 = arith.addf %0, %92 : vector<8x32xf32>
    %c0_23 = arith.constant 0 : index
    %c0_24 = arith.constant 0 : index
    %94 = vector.load %arg7[%c0_23, %c0_24] : memref<1x32xf32, #tpu.memory_space<vmem>>, vector<1x32xf32>
    %95 = vector.broadcast %94 : vector<1x32xf32> to vector<8x32xf32>
    %96 = arith.addf %93, %95 : vector<8x32xf32>
    %c0_25 = arith.constant 0 : index
    %c0_26 = arith.constant 0 : index
    %97 = vector.load %arg8[%c0_25, %c0_26] : memref<1x32xf32, #tpu.memory_space<vmem>>, vector<1x32xf32>
    %c0_27 = arith.constant 0 : index
    %c0_28 = arith.constant 0 : index
    %98 = vector.load %arg9[%c0_27, %c0_28] : memref<1x32xf32, #tpu.memory_space<vmem>>, vector<1x32xf32>
    %cst_29 = arith.constant dense<0.000000e+00> : vector<8xf32>
    %99 = vector.multi_reduction <add>, %96, %cst_29 [1] : vector<8x32xf32> to vector<8xf32>
    %100 = vector.shape_cast %99 : vector<8xf32> to vector<8x1xf32>
    %cst_30 = arith.constant 3.200000e+01 : f32
    %101 = vector.broadcast %cst_30 : f32 to vector<8x1xf32>
    %102 = arith.divf %100, %101 : vector<8x1xf32>
    %103 = vector.broadcast %102 : vector<8x1xf32> to vector<8x32xf32>
    %104 = arith.subf %96, %103 : vector<8x32xf32>
    %105 = arith.mulf %104, %104 : vector<8x32xf32>
    %cst_31 = arith.constant dense<0.000000e+00> : vector<8xf32>
    %106 = vector.multi_reduction <add>, %105, %cst_31 [1] : vector<8x32xf32> to vector<8xf32>
    %107 = vector.shape_cast %106 : vector<8xf32> to vector<8x1xf32>
    %cst_32 = arith.constant 3.200000e+01 : f32
    %108 = vector.broadcast %cst_32 : f32 to vector<8x1xf32>
    %109 = arith.divf %107, %108 : vector<8x1xf32>
    %110 = vector.broadcast %102 : vector<8x1xf32> to vector<8x32xf32>
    %111 = arith.subf %96, %110 : vector<8x32xf32>
    %cst_33 = arith.constant 9.99999974E-6 : f32
    %112 = vector.broadcast %cst_33 : f32 to vector<8x1xf32>
    %113 = arith.addf %109, %112 : vector<8x1xf32>
    %114 = math.rsqrt %113 : vector<8x1xf32>
    %115 = vector.broadcast %114 : vector<8x1xf32> to vector<8x32xf32>
    %116 = arith.mulf %111, %115 : vector<8x32xf32>
    %117 = vector.broadcast %97 : vector<1x32xf32> to vector<8x32xf32>
    %118 = arith.mulf %116, %117 : vector<8x32xf32>
    %119 = vector.broadcast %98 : vector<1x32xf32> to vector<8x32xf32>
    %120 = arith.addf %118, %119 : vector<8x32xf32>
    %121 = arith.truncf %120 : vector<8x32xf32> to vector<8x32xbf16>
    %c0_34 = arith.constant 0 : index
    %c0_35 = arith.constant 0 : index
    %122 = vector.load %arg10[%c0_34, %c0_35] : memref<32x128xbf16, #tpu.memory_space<vmem>>, vector<32x128xbf16>
    %cst_36 = arith.constant dense<0.000000e+00> : vector<8x128xf32>
    %123 = tpu.matmul %121, %122, %cst_36 {dimension_numbers = #tpu.dot_dimension_numbers<[1], [0], [0], [1], [0, 0, 1, 1], [], []>} : vector<8x32xbf16>, vector<32x128xbf16>, vector<8x128xf32> -> vector<8x128xf32>
    %c0_37 = arith.constant 0 : index
    %c0_38 = arith.constant 0 : index
    %124 = vector.load %arg11[%c0_37, %c0_38] : memref<1x128xf32, #tpu.memory_space<vmem>>, vector<1x128xf32>
    %125 = vector.broadcast %124 : vector<1x128xf32> to vector<8x128xf32>
    %126 = arith.addf %123, %125 : vector<8x128xf32>
    %127 = math.absf %126 : vector<8x128xf32>
    %cst_39 = arith.constant 0.707106769 : f32
    %128 = vector.broadcast %cst_39 : f32 to vector<8x128xf32>
    %129 = arith.mulf %127, %128 : vector<8x128xf32>
    %cst_40 = arith.constant 0.327591091 : f32
    %130 = vector.broadcast %cst_40 : f32 to vector<8x128xf32>
    %131 = arith.mulf %130, %129 : vector<8x128xf32>
    %cst_41 = arith.constant 1.000000e+00 : f32
    %132 = vector.broadcast %cst_41 : f32 to vector<8x128xf32>
    %133 = arith.addf %132, %131 : vector<8x128xf32>
    %134 = tpu.reciprocal %133 {approx = true} : vector<8x128xf32> -> vector<8x128xf32>
    %cst_42 = arith.constant 1.06140542 : f32
    %135 = vector.broadcast %cst_42 : f32 to vector<8x128xf32>
    %136 = arith.mulf %135, %134 : vector<8x128xf32>
    %cst_43 = arith.constant -1.45315206 : f32
    %137 = vector.broadcast %cst_43 : f32 to vector<8x128xf32>
    %138 = arith.addf %136, %137 : vector<8x128xf32>
    %139 = arith.mulf %138, %134 : vector<8x128xf32>
    %cst_44 = arith.constant 1.42141378 : f32
    %140 = vector.broadcast %cst_44 : f32 to vector<8x128xf32>
    %141 = arith.addf %139, %140 : vector<8x128xf32>
    %142 = arith.mulf %141, %134 : vector<8x128xf32>
    %cst_45 = arith.constant -0.284496725 : f32
    %143 = vector.broadcast %cst_45 : f32 to vector<8x128xf32>
    %144 = arith.addf %142, %143 : vector<8x128xf32>
    %145 = arith.mulf %144, %134 : vector<8x128xf32>
    %cst_46 = arith.constant 0.254829586 : f32
    %146 = vector.broadcast %cst_46 : f32 to vector<8x128xf32>
    %147 = arith.addf %145, %146 : vector<8x128xf32>
    %148 = arith.mulf %147, %134 : vector<8x128xf32>
    %cst_47 = arith.constant 0.000000e+00 : f32
    %149 = vector.broadcast %cst_47 : f32 to vector<8x128xf32>
    %150 = arith.maximumf %126, %149 : vector<8x128xf32>
    %cst_48 = arith.constant 0.707106769 : f32
    %151 = vector.broadcast %cst_48 : f32 to vector<8x128xf32>
    %152 = arith.mulf %151, %129 : vector<8x128xf32>
    %cst_49 = arith.constant 0.000000e+00 : f32
    %153 = vector.broadcast %cst_49 : f32 to vector<8x128xf32>
    %154 = arith.subf %153, %129 : vector<8x128xf32>
    %155 = arith.mulf %154, %129 : vector<8x128xf32>
    %156 = math.exp %155 : vector<8x128xf32>
    %157 = arith.mulf %148, %156 : vector<8x128xf32>
    %158 = arith.mulf %152, %157 : vector<8x128xf32>
    %159 = arith.subf %150, %158 : vector<8x128xf32>
    %160 = arith.truncf %159 : vector<8x128xf32> to vector<8x128xbf16>
    %c0_50 = arith.constant 0 : index
    %c0_51 = arith.constant 0 : index
    %161 = vector.load %arg12[%c0_50, %c0_51] : memref<128x256xbf16, #tpu.memory_space<vmem>>, vector<128x256xbf16>
    %cst_52 = arith.constant dense<0.000000e+00> : vector<8x256xf32>
    %162 = tpu.matmul %160, %161, %cst_52 {dimension_numbers = #tpu.dot_dimension_numbers<[1], [0], [0], [1], [0, 0, 1, 1], [], []>} : vector<8x128xbf16>, vector<128x256xbf16>, vector<8x256xf32> -> vector<8x256xf32>
    %c0_53 = arith.constant 0 : index
    %c0_54 = arith.constant 0 : index
    %163 = vector.load %arg13[%c0_53, %c0_54] : memref<1x256xf32, #tpu.memory_space<vmem>>, vector<1x256xf32>
    %164 = vector.broadcast %163 : vector<1x256xf32> to vector<8x256xf32>
    %165 = arith.addf %162, %164 : vector<8x256xf32>
    %cst_55 = arith.constant 0.000000e+00 : f32
    %166 = vector.broadcast %cst_55 : f32 to vector<8x256xf32>
    %167 = arith.maximumf %165, %166 : vector<8x256xf32>
    %168 = arith.truncf %167 : vector<8x256xf32> to vector<8x256xbf16>
    %c0_56 = arith.constant 0 : index
    %c0_57 = arith.constant 0 : index
    %169 = vector.load %arg14[%c0_56, %c0_57] : memref<256x256xbf16, #tpu.memory_space<vmem>>, vector<256x256xbf16>
    %cst_58 = arith.constant dense<0.000000e+00> : vector<8x256xf32>
    %170 = tpu.matmul %168, %169, %cst_58 {dimension_numbers = #tpu.dot_dimension_numbers<[1], [0], [0], [1], [0, 0, 1, 1], [], []>} : vector<8x256xbf16>, vector<256x256xbf16>, vector<8x256xf32> -> vector<8x256xf32>
    %c0_59 = arith.constant 0 : index
    %c0_60 = arith.constant 0 : index
    %171 = vector.load %arg15[%c0_59, %c0_60] : memref<1x256xf32, #tpu.memory_space<vmem>>, vector<1x256xf32>
    %172 = vector.broadcast %171 : vector<1x256xf32> to vector<8x256xf32>
    %173 = arith.addf %170, %172 : vector<8x256xf32>
    %cst_61 = arith.constant 0.000000e+00 : f32
    %174 = vector.broadcast %cst_61 : f32 to vector<8x256xf32>
    %175 = arith.maximumf %173, %174 : vector<8x256xf32>
    %176 = arith.truncf %175 : vector<8x256xf32> to vector<8x256xbf16>
    %c0_62 = arith.constant 0 : index
    %c0_63 = arith.constant 0 : index
    %177 = vector.load %arg16[%c0_62, %c0_63] : memref<256x32xbf16, #tpu.memory_space<vmem>>, vector<256x32xbf16>
    %cst_64 = arith.constant dense<0.000000e+00> : vector<8x32xf32>
    %178 = tpu.matmul %176, %177, %cst_64 {dimension_numbers = #tpu.dot_dimension_numbers<[1], [0], [0], [1], [0, 0, 1, 1], [], []>} : vector<8x256xbf16>, vector<256x32xbf16>, vector<8x32xf32> -> vector<8x32xf32>
    %c0_65 = arith.constant 0 : index
    %c0_66 = arith.constant 0 : index
    %179 = vector.load %arg17[%c0_65, %c0_66] : memref<1x32xf32, #tpu.memory_space<vmem>>, vector<1x32xf32>
    %180 = vector.broadcast %179 : vector<1x32xf32> to vector<8x32xf32>
    %181 = arith.addf %178, %180 : vector<8x32xf32>
    %182 = arith.addf %96, %181 : vector<8x32xf32>
    %c0_67 = arith.constant 0 : index
    %c0_68 = arith.constant 0 : index
    %183 = vector.load %arg18[%c0_67, %c0_68] : memref<8x32xf32, #tpu.memory_space<vmem>>, vector<8x32xf32>
    tpu.vector_store %arg18[%c0_67, %c0_68], %182 {strides = array<i32>} : memref<8x32xf32, #tpu.memory_space<vmem>>, vector<8x32xf32>,
    return
  }
  func.func @transform_0(%arg0: i32) -> (i32, i32) {
    %c0_i32 = arith.constant 0 : i32
    %c0_i32_0 = arith.constant 0 : i32
    return %arg0, %c0_i32 : i32, i32
  }
  func.func @transform_1(%arg0: i32) -> (i32, i32) {
    %c0_i32 = arith.constant 0 : i32
    %c0_i32_0 = arith.constant 0 : i32
    %c0_i32_1 = arith.constant 0 : i32
    return %c0_i32, %c0_i32_0 : i32, i32
  }
  func.func @transform_2(%arg0: i32) -> (i32, i32) {
    %c0_i32 = arith.constant 0 : i32
    %c0_i32_0 = arith.constant 0 : i32
    %c0_i32_1 = arith.constant 0 : i32
    return %c0_i32, %c0_i32_0 : i32, i32
  }
  func.func @transform_3(%arg0: i32) -> (i32, i32) {
    %c0_i32 = arith.constant 0 : i32
    %c0_i32_0 = arith.constant 0 : i32
    %c0_i32_1 = arith.constant 0 : i32
    return %c0_i32, %c0_i32_0 : i32, i32
  }
  func.func @transform_4(%arg0: i32) -> (i32, i32) {
    %c0_i32 = arith.constant 0 : i32
    %c0_i32_0 = arith.constant 0 : i32
    %c0_i32_1 = arith.constant 0 : i32
    return %c0_i32, %c0_i32_0 : i32, i32
  }
  func.func @transform_5(%arg0: i32) -> (i32, i32) {
    %c0_i32 = arith.constant 0 : i32
    %c0_i32_0 = arith.constant 0 : i32
    %c0_i32_1 = arith.constant 0 : i32
    return %c0_i32, %c0_i32_0 : i32, i32
  }
  func.func @transform_6(%arg0: i32) -> (i32, i32) {
    %c0_i32 = arith.constant 0 : i32
    %c0_i32_0 = arith.constant 0 : i32
    %c0_i32_1 = arith.constant 0 : i32
    return %c0_i32, %c0_i32_0 : i32, i32
  }
  func.func @transform_7(%arg0: i32) -> (i32, i32) {
    %c0_i32 = arith.constant 0 : i32
    %c0_i32_0 = arith.constant 0 : i32
    %c0_i32_1 = arith.constant 0 : i32
    return %c0_i32, %c0_i32_0 : i32, i32
  }
  func.func @transform_8(%arg0: i32) -> (i32, i32) {
    %c0_i32 = arith.constant 0 : i32
    %c0_i32_0 = arith.constant 0 : i32
    %c0_i32_1 = arith.constant 0 : i32
    return %c0_i32, %c0_i32_0 : i32, i32
  }
  func.func @transform_9(%arg0: i32) -> (i32, i32) {
    %c0_i32 = arith.constant 0 : i32
    %c0_i32_0 = arith.constant 0 : i32
    %c0_i32_1 = arith.constant 0 : i32
    return %c0_i32, %c0_i32_0 : i32, i32
  }
  func.func @transform_10(%arg0: i32) -> (i32, i32) {
    %c0_i32 = arith.constant 0 : i32
    %c0_i32_0 = arith.constant 0 : i32
    %c0_i32_1 = arith.constant 0 : i32
    return %c0_i32, %c0_i32_0 : i32, i32
  }
  func.func @transform_11(%arg0: i32) -> (i32, i32) {
    %c0_i32 = arith.constant 0 : i32
    %c0_i32_0 = arith.constant 0 : i32
    %c0_i32_1 = arith.constant 0 : i32
    return %c0_i32, %c0_i32_0 : i32, i32
  }
  func.func @transform_12(%arg0: i32) -> (i32, i32) {
    %c0_i32 = arith.constant 0 : i32
    %c0_i32_0 = arith.constant 0 : i32
    %c0_i32_1 = arith.constant 0 : i32
    return %c0_i32, %c0_i32_0 : i32, i32
  }
  func.func @transform_13(%arg0: i32) -> (i32, i32) {
    %c0_i32 = arith.constant 0 : i32
    %c0_i32_0 = arith.constant 0 : i32
    %c0_i32_1 = arith.constant 0 : i32
    return %c0_i32, %c0_i32_0 : i32, i32
  }
  func.func @transform_14(%arg0: i32) -> (i32, i32) {
    %c0_i32 = arith.constant 0 : i32
    %c0_i32_0 = arith.constant 0 : i32
    %c0_i32_1 = arith.constant 0 : i32
    return %c0_i32, %c0_i32_0 : i32, i32
  }
  func.func @transform_15(%arg0: i32) -> (i32, i32) {
    %c0_i32 = arith.constant 0 : i32
    %c0_i32_0 = arith.constant 0 : i32
    %c0_i32_1 = arith.constant 0 : i32
    return %c0_i32, %c0_i32_0 : i32, i32
  }
  func.func @transform_16(%arg0: i32) -> (i32, i32) {
    %c0_i32 = arith.constant 0 : i32
    %c0_i32_0 = arith.constant 0 : i32
    %c0_i32_1 = arith.constant 0 : i32
    return %c0_i32, %c0_i32_0 : i32, i32
  }
  func.func @transform_17(%arg0: i32) -> (i32, i32) {
    %c0_i32 = arith.constant 0 : i32
    %c0_i32_0 = arith.constant 0 : i32
    return %arg0, %c0_i32 : i32, i32
  }
}

module attributes {stable_mosaic.version = 11 : i64} {
  func.func @gpt_block_kernel(%arg0: i32, %arg1: memref<8x32xf32, #tpu.memory_space<vmem>>, %arg2: memref<1x32xf32, #tpu.memory_space<vmem>>, %arg3: memref<1x32xf32, #tpu.memory_space<vmem>>, %arg4: memref<32x96xbf16, #tpu.memory_space<vmem>>, %arg5: memref<1x96xf32, #tpu.memory_space<vmem>>, %arg6: memref<32x32xbf16, #tpu.memory_space<vmem>>, %arg7: memref<1x32xf32, #tpu.memory_space<vmem>>, %arg8: memref<1x32xf32, #tpu.memory_space<vmem>>, %arg9: memref<1x32xf32, #tpu.memory_space<vmem>>, %arg10: memref<32x128xbf16, #tpu.memory_space<vmem>>, %arg11: memref<1x128xf32, #tpu.memory_space<vmem>>, %arg12: memref<128x256xbf16, #tpu.memory_space<vmem>>, %arg13: memref<1x256xf32, #tpu.memory_space<vmem>>, %arg14: memref<256x256xbf16, #tpu.memory_space<vmem>>, %arg15: memref<1x256xf32, #tpu.memory_space<vmem>>, %arg16: memref<256x32xbf16, #tpu.memory_space<vmem>>, %arg17: memref<1x32xf32, #tpu.memory_space<vmem>>, %arg18: memref<8x32xf32, #tpu.memory_space<vmem>>) attributes {dimension_semantics = [#tpu.dimension_semantics<parallel>], iteration_bounds = array<i64: 2>, scalar_prefetch = 0 : i64, scratch_operands = 0 : i64, tpu.core_type = #tpu.core_type<tc>, window_params = [{transform_indices = @transform_0, window_bounds = array<i64: 8, 32>}, {pipeline_mode = #tpu.pipeline_mode<synchronous>, transform_indices = @transform_1, window_bounds = array<i64: 1, 32>}, {pipeline_mode = #tpu.pipeline_mode<synchronous>, transform_indices = @transform_2, window_bounds = array<i64: 1, 32>}, {pipeline_mode = #tpu.pipeline_mode<synchronous>, transform_indices = @transform_3, window_bounds = array<i64: 32, 96>}, {pipeline_mode = #tpu.pipeline_mode<synchronous>, transform_indices = @transform_4, window_bounds = array<i64: 1, 96>}, {pipeline_mode = #tpu.pipeline_mode<synchronous>, transform_indices = @transform_5, window_bounds = array<i64: 32, 32>}, {pipeline_mode = #tpu.pipeline_mode<synchronous>, transform_indices = @transform_6, window_bounds = array<i64: 1, 32>}, {pipeline_mode = #tpu.pipeline_mode<synchronous>, transform_indices = @transform_7, window_bounds = array<i64: 1, 32>}, {pipeline_mode = #tpu.pipeline_mode<synchronous>, transform_indices = @transform_8, window_bounds = array<i64: 1, 32>}, {pipeline_mode = #tpu.pipeline_mode<synchronous>, transform_indices = @transform_9, window_bounds = array<i64: 32, 128>}, {pipeline_mode = #tpu.pipeline_mode<synchronous>, transform_indices = @transform_10, window_bounds = array<i64: 1, 128>}, {pipeline_mode = #tpu.pipeline_mode<synchronous>, transform_indices = @transform_11, window_bounds = array<i64: 128, 256>}, {pipeline_mode = #tpu.pipeline_mode<synchronous>, transform_indices = @transform_12, window_bounds = array<i64: 1, 256>}, {pipeline_mode = #tpu.pipeline_mode<synchronous>, transform_indices = @transform_13, window_bounds = array<i64: 256, 256>}, {pipeline_mode = #tpu.pipeline_mode<synchronous>, transform_indices = @transform_14, window_bounds = array<i64: 1, 256>}, {pipeline_mode = #tpu.pipeline_mode<synchronous>, transform_indices = @transform_15, window_bounds = array<i64: 256, 32>}, {pipeline_mode = #tpu.pipeline_mode<synchronous>, transform_indices = @transform_16, window_bounds = array<i64: 1, 32>}, {transform_indices = @transform_17, window_bounds = array<i64: 8, 32>}]} {
    %c0 = arith.constant 0 : index
    %c0_0 = arith.constant 0 : index
    %0 = vector.load %arg1[%c0, %c0_0] : memref<8x32xf32, #tpu.memory_space<vmem>>, vector<8x32xf32>
    %c0_1 = arith.constant 0 : index
    %c0_2 = arith.constant 0 : index
    %1 = vector.load %arg2[%c0_1, %c0_2] : memref<1x32xf32, #tpu.memory_space<vmem>>, vector<1x32xf32>
    %c0_3 = arith.constant 0 : index
    %c0_4 = arith.constant 0 : index
    %2 = vector.load %arg3[%c0_3, %c0_4] : memref<1x32xf32, #tpu.memory_space<vmem>>, vector<1x32xf32>
    %cst = arith.constant dense<0.000000e+00> : vector<8xf32>
    %3 = vector.multi_reduction <add>, %0, %cst [1] : vector<8x32xf32> to vector<8xf32>
    %4 = vector.shape_cast %3 : vector<8xf32> to vector<8x1xf32>
    %cst_5 = arith.constant 3.200000e+01 : f32
    %5 = vector.broadcast %cst_5 : f32 to vector<8x1xf32>
    %6 = arith.divf %4, %5 : vector<8x1xf32>
    %7 = vector.broadcast %6 : vector<8x1xf32> to vector<8x32xf32>
    %8 = arith.subf %0, %7 : vector<8x32xf32>
    %9 = arith.mulf %8, %8 : vector<8x32xf32>
    %cst_6 = arith.constant dense<0.000000e+00> : vector<8xf32>
    %10 = vector.multi_reduction <add>, %9, %cst_6 [1] : vector<8x32xf32> to vector<8xf32>
    %11 = vector.shape_cast %10 : vector<8xf32> to vector<8x1xf32>
    %cst_7 = arith.constant 3.200000e+01 : f32
    %12 = vector.broadcast %cst_7 : f32 to vector<8x1xf32>
    %13 = arith.divf %11, %12 : vector<8x1xf32>
    %14 = vector.broadcast %6 : vector<8x1xf32> to vector<8x32xf32>
    %15 = arith.subf %0, %14 : vector<8x32xf32>
    %cst_8 = arith.constant 9.99999974E-6 : f32
    %16 = vector.broadcast %cst_8 : f32 to vector<8x1xf32>
    %17 = arith.addf %13, %16 : vector<8x1xf32>
    %18 = math.rsqrt %17 : vector<8x1xf32>
    %19 = vector.broadcast %18 : vector<8x1xf32> to vector<8x32xf32>
    %20 = arith.mulf %15, %19 : vector<8x32xf32>
    %21 = vector.broadcast %1 : vector<1x32xf32> to vector<8x32xf32>
    %22 = arith.mulf %20, %21 : vector<8x32xf32>
    %23 = vector.broadcast %2 : vector<1x32xf32> to vector<8x32xf32>
    %24 = arith.addf %22, %23 : vector<8x32xf32>
    %25 = arith.truncf %24 : vector<8x32xf32> to vector<8x32xbf16>
    %c0_9 = arith.constant 0 : index
    %c0_10 = arith.constant 0 : index
    %26 = vector.load %arg4[%c0_9, %c0_10] : memref<32x96xbf16, #tpu.memory_space<vmem>>, vector<32x96xbf16>
    %cst_11 = arith.constant dense<0.000000e+00> : vector<8x96xf32>
    %27 = tpu.matmul %25, %26, %cst_11 {dimension_numbers = #tpu.dot_dimension_numbers<[1], [0], [0], [1], [0, 0, 1, 1], [], []>} : vector<8x32xbf16>, vector<32x96xbf16>, vector<8x96xf32> -> vector<8x96xf32>
    %c0_12 = arith.constant 0 : index
    %c0_13 = arith.constant 0 : index
    %28 = vector.load %arg5[%c0_12, %c0_13] : memref<1x96xf32, #tpu.memory_space<vmem>>, vector<1x96xf32>
    %29 = vector.broadcast %28 : vector<1x96xf32> to vector<8x96xf32>
    %30 = arith.addf %27, %29 : vector<8x96xf32>
    %31 = arith.truncf %30 : vector<8x96xf32> to vector<8x96xbf16>
    %32 = vector.extract_strided_slice %31 {offsets = [0, 0], sizes = [8, 8], strides = [1, 1]} : vector<8x96xbf16> to vector<8x8xbf16>
    %33 = vector.shape_cast %32 : vector<8x8xbf16> to vector<1x8x8xbf16>
    %34 = vector.extract_strided_slice %31 {offsets = [0, 8], sizes = [8, 8], strides = [1, 1]} : vector<8x96xbf16> to vector<8x8xbf16>
    %35 = vector.shape_cast %34 : vector<8x8xbf16> to vector<1x8x8xbf16>
    %36 = vector.extract_strided_slice %31 {offsets = [0, 16], sizes = [8, 8], strides = [1, 1]} : vector<8x96xbf16> to vector<8x8xbf16>
    %37 = vector.shape_cast %36 : vector<8x8xbf16> to vector<1x8x8xbf16>
    %38 = vector.extract_strided_slice %31 {offsets = [0, 24], sizes = [8, 8], strides = [1, 1]} : vector<8x96xbf16> to vector<8x8xbf16>
    %39 = vector.shape_cast %38 : vector<8x8xbf16> to vector<1x8x8xbf16>
    %40 = tpu.concatenate %33, %35, %37, %39 in 0 : vector<1x8x8xbf16>, vector<1x8x8xbf16>, vector<1x8x8xbf16>, vector<1x8x8xbf16> -> vector<4x8x8xbf16>
    %41 = vector.extract_strided_slice %31 {offsets = [0, 32], sizes = [8, 8], strides = [1, 1]} : vector<8x96xbf16> to vector<8x8xbf16>
    %42 = vector.shape_cast %41 : vector<8x8xbf16> to vector<1x8x8xbf16>
    %43 = vector.extract_strided_slice %31 {offsets = [0, 40], sizes = [8, 8], strides = [1, 1]} : vector<8x96xbf16> to vector<8x8xbf16>
    %44 = vector.shape_cast %43 : vector<8x8xbf16> to vector<1x8x8xbf16>
    %45 = vector.extract_strided_slice %31 {offsets = [0, 48], sizes = [8, 8], strides = [1, 1]} : vector<8x96xbf16> to vector<8x8xbf16>
    %46 = vector.shape_cast %45 : vector<8x8xbf16> to vector<1x8x8xbf16>
    %47 = vector.extract_strided_slice %31 {offsets = [0, 56], sizes = [8, 8], strides = [1, 1]} : vector<8x96xbf16> to vector<8x8xbf16>
    %48 = vector.shape_cast %47 : vector<8x8xbf16> to vector<1x8x8xbf16>
    %49 = tpu.concatenate %42, %44, %46, %48 in 0 : vector<1x8x8xbf16>, vector<1x8x8xbf16>, vector<1x8x8xbf16>, vector<1x8x8xbf16> -> vector<4x8x8xbf16>
    %50 = vector.extract_strided_slice %31 {offsets = [0, 64], sizes = [8, 8], strides = [1, 1]} : vector<8x96xbf16> to vector<8x8xbf16>
    %51 = vector.shape_cast %50 : vector<8x8xbf16> to vector<1x8x8xbf16>
    %52 = vector.extract_strided_slice %31 {offsets = [0, 72], sizes = [8, 8], strides = [1, 1]} : vector<8x96xbf16> to vector<8x8xbf16>
    %53 = vector.shape_cast %52 : vector<8x8xbf16> to vector<1x8x8xbf16>
    %54 = vector.extract_strided_slice %31 {offsets = [0, 80], sizes = [8, 8], strides = [1, 1]} : vector<8x96xbf16> to vector<8x8xbf16>
    %55 = vector.shape_cast %54 : vector<8x8xbf16> to vector<1x8x8xbf16>
    %56 = vector.extract_strided_slice %31 {offsets = [0, 88], sizes = [8, 8], strides = [1, 1]} : vector<8x96xbf16> to vector<8x8xbf16>
    %57 = vector.shape_cast %56 : vector<8x8xbf16> to vector<1x8x8xbf16>
    %58 = tpu.concatenate %51, %53, %55, %57 in 0 : vector<1x8x8xbf16>, vector<1x8x8xbf16>, vector<1x8x8xbf16>, vector<1x8x8xbf16> -> vector<4x8x8xbf16>
    "tpu.trace_start"() <{level = 10 : i32, message = "bqd,bkd->bqk"}> : () -> ()
    %cst_14 = arith.constant dense<0.000000e+00> : vector<4x8x8xf32>
    %59 = tpu.matmul %40, %49, %cst_14 {dimension_numbers = #tpu.dot_dimension_numbers<[2], [2], [1], [1], [0, 0, 0, 1, 1, 1], [0], [0]>} : vector<4x8x8xbf16>, vector<4x8x8xbf16>, vector<4x8x8xf32> -> vector<4x8x8xf32>
    "tpu.trace_stop"() : () -> ()
    %60 = tpu.iota {dimensions = array<i32: 0>} : vector<8x8xi32>
    %61 = tpu.iota {dimensions = array<i32: 1>} : vector<8x8xi32>
    %62 = arith.cmpi sle, %61, %60 : vector<8x8xi32>
    %cst_15 = arith.constant 0.000000e+00 : f32
    %cst_16 = arith.constant -1.000000e+30 : f32
    %63 = vector.broadcast %cst_15 : f32 to vector<8x8xf32>
    %64 = vector.broadcast %cst_16 : f32 to vector<8x8xf32>
    %65 = arith.select %62, %63, %64 : vector<8x8xi1>, vector<8x8xf32>
    %66 = vector.shape_cast %65 : vector<8x8xf32> to vector<1x8x8xf32>
    %67 = vector.broadcast %66 : vector<1x8x8xf32> to vector<4x8x8xf32>
    %68 = arith.addf %59, %67 : vector<4x8x8xf32>
    %cst_17 = arith.constant dense<0xFF800000> : vector<4x8xf32>
    %69 = vector.multi_reduction <maximumf>, %68, %cst_17 [2] : vector<4x8x8xf32> to vector<4x8xf32>
    %70 = vector.shape_cast %69 : vector<4x8xf32> to vector<4x8x1xf32>
    %71 = vector.broadcast %70 : vector<4x8x1xf32> to vector<4x8x8xf32>
    %72 = arith.subf %68, %71 : vector<4x8x8xf32>
    %73 = math.exp %72 : vector<4x8x8xf32>
    %cst_18 = arith.constant dense<0.000000e+00> : vector<4x8xf32>
    %74 = vector.multi_reduction <add>, %73, %cst_18 [2] : vector<4x8x8xf32> to vector<4x8xf32>
    %75 = vector.shape_cast %74 : vector<4x8xf32> to vector<4x8x1xf32>
    %76 = arith.truncf %73 : vector<4x8x8xf32> to vector<4x8x8xbf16>
    "tpu.trace_start"() <{level = 10 : i32, message = "bqk,bkd->bqd"}> : () -> ()
    %cst_19 = arith.constant dense<0.000000e+00> : vector<4x8x8xf32>
    %77 = tpu.matmul %76, %58, %cst_19 {dimension_numbers = #tpu.dot_dimension_numbers<[2], [1], [1], [2], [0, 0, 0, 1, 1, 2], [0], [0]>} : vector<4x8x8xbf16>, vector<4x8x8xbf16>, vector<4x8x8xf32> -> vector<4x8x8xf32>
    "tpu.trace_stop"() : () -> ()
    %78 = tpu.reciprocal %75 {approx = true} : vector<4x8x1xf32> -> vector<4x8x1xf32>
    %79 = vector.broadcast %78 : vector<4x8x1xf32> to vector<4x8x8xf32>
    %80 = arith.mulf %77, %79 : vector<4x8x8xf32>
    %81 = arith.truncf %80 : vector<4x8x8xf32> to vector<4x8x8xbf16>
    %82 = vector.extract_strided_slice %81 {offsets = [0, 0, 0], sizes = [1, 8, 8], strides = [1, 1, 1]} : vector<4x8x8xbf16> to vector<1x8x8xbf16>
    %83 = vector.shape_cast %82 : vector<1x8x8xbf16> to vector<8x8xbf16>
    %84 = vector.extract_strided_slice %81 {offsets = [1, 0, 0], sizes = [1, 8, 8], strides = [1, 1, 1]} : vector<4x8x8xbf16> to vector<1x8x8xbf16>
    %85 = vector.shape_cast %84 : vector<1x8x8xbf16> to vector<8x8xbf16>
    %86 = vector.extract_strided_slice %81 {offsets = [2, 0, 0], sizes = [1, 8, 8], strides = [1, 1, 1]} : vector<4x8x8xbf16> to vector<1x8x8xbf16>
    %87 = vector.shape_cast %86 : vector<1x8x8xbf16> to vector<8x8xbf16>
    %88 = vector.extract_strided_slice %81 {offsets = [3, 0, 0], sizes = [1, 8, 8], strides = [1, 1, 1]} : vector<4x8x8xbf16> to vector<1x8x8xbf16>
    %89 = vector.shape_cast %88 : vector<1x8x8xbf16> to vector<8x8xbf16>
    %90 = tpu.concatenate %83, %85, %87, %89 in 1 : vector<8x8xbf16>, vector<8x8xbf16>, vector<8x8xbf16>, vector<8x8xbf16> -> vector<8x32xbf16>
    %c0_20 = arith.constant 0 : index
    %c0_21 = arith.constant 0 : index
    %91 = vector.load %arg6[%c0_20, %c0_21] : memref<32x32xbf16, #tpu.memory_space<vmem>>, vector<32x32xbf16>
    %cst_22 = arith.constant dense<0.000000e+00> : vector<8x32xf32>
    %92 = tpu.matmul %90, %91, %cst_22 {dimension_numbers = #tpu.dot_dimension_numbers<[1], [0], [0], [1], [0, 0, 1, 1], [], []>} : vector<8x32xbf16>, vector<32x32xbf16>, vector<8x32xf32> -> vector<8x32xf32>
    %93 = arith.addf %0, %92 : vector<8x32xf32>
    %c0_23 = arith.constant 0 : index
    %c0_24 = arith.constant 0 : index
    %94 = vector.load %arg7[%c0_23, %c0_24] : memref<1x32xf32, #tpu.memory_space<vmem>>, vector<1x32xf32>
    %95 = vector.broadcast %94 : vector<1x32xf32> to vector<8x32xf32>
    %96 = arith.addf %93, %95 : vector<8x32xf32>
    %c0_25 = arith.constant 0 : index
    %c0_26 = arith.constant 0 : index
    %97 = vector.load %arg8[%c0_25, %c0_26] : memref<1x32xf32, #tpu.memory_space<vmem>>, vector<1x32xf32>
    %c0_27 = arith.constant 0 : index
    %c0_28 = arith.constant 0 : index
    %98 = vector.load %arg9[%c0_27, %c0_28] : memref<1x32xf32, #tpu.memory_space<vmem>>, vector<1x32xf32>
    %cst_29 = arith.constant dense<0.000000e+00> : vector<8xf32>
    %99 = vector.multi_reduction <add>, %96, %cst_29 [1] : vector<8x32xf32> to vector<8xf32>
    %100 = vector.shape_cast %99 : vector<8xf32> to vector<8x1xf32>
    %cst_30 = arith.constant 3.200000e+01 : f32
    %101 = vector.broadcast %cst_30 : f32 to vector<8x1xf32>
    %102 = arith.divf %100, %101 : vector<8x1xf32>
    %103 = vector.broadcast %102 : vector<8x1xf32> to vector<8x32xf32>
    %104 = arith.subf %96, %103 : vector<8x32xf32>
    %105 = arith.mulf %104, %104 : vector<8x32xf32>
    %cst_31 = arith.constant dense<0.000000e+00> : vector<8xf32>
    %106 = vector.multi_reduction <add>, %105, %cst_31 [1] : vector<8x32xf32> to vector<8xf32>
    %107 = vector.shape_cast %106 : vector<8xf32> to vector<8x1xf32>
    %cst_32 = arith.constant 3.200000e+01 : f32
    %108 = vector.broadcast %cst_32 : f32 to vector<8x1xf32>
    %109 = arith.divf %107, %108 : vector<8x1xf32>
    %110 = vector.broadcast %102 : vector<8x1xf32> to vector<8x32xf32>
    %111 = arith.subf %96, %110 : vector<8x32xf32>
    %cst_33 = arith.constant 9.99999974E-6 : f32
    %112 = vector.broadcast %cst_33 : f32 to vector<8x1xf32>
    %113 = arith.addf %109, %112 : vector<8x1xf32>
    %114 = math.rsqrt %113 : vector<8x1xf32>
    %115 = vector.broadcast %114 : vector<8x1xf32> to vector<8x32xf32>
    %116 = arith.mulf %111, %115 : vector<8x32xf32>
    %117 = vector.broadcast %97 : vector<1x32xf32> to vector<8x32xf32>
    %118 = arith.mulf %116, %117 : vector<8x32xf32>
    %119 = vector.broadcast %98 : vector<1x32xf32> to vector<8x32xf32>
    %120 = arith.addf %118, %119 : vector<8x32xf32>
    %121 = arith.truncf %120 : vector<8x32xf32> to vector<8x32xbf16>
    %c0_34 = arith.constant 0 : index
    %c0_35 = arith.constant 0 : index
    %122 = vector.load %arg10[%c0_34, %c0_35] : memref<32x128xbf16, #tpu.memory_space<vmem>>, vector<32x128xbf16>
    %cst_36 = arith.constant dense<0.000000e+00> : vector<8x128xf32>
    %123 = tpu.matmul %121, %122, %cst_36 {dimension_numbers = #tpu.dot_dimension_numbers<[1], [0], [0], [1], [0, 0, 1, 1], [], []>} : vector<8x32xbf16>, vector<32x128xbf16>, vector<8x128xf32> -> vector<8x128xf32>
    %c0_37 = arith.constant 0 : index
    %c0_38 = arith.constant 0 : index
    %124 = vector.load %arg11[%c0_37, %c0_38] : memref<1x128xf32, #tpu.memory_space<vmem>>, vector<1x128xf32>
    %125 = vector.broadcast %124 : vector<1x128xf32> to vector<8x128xf32>
    %126 = arith.addf %123, %125 : vector<8x128xf32>
    %127 = math.absf %126 : vector<8x128xf32>
    %cst_39 = arith.constant 0.707106769 : f32
    %128 = vector.broadcast %cst_39 : f32 to vector<8x128xf32>
    %129 = arith.mulf %127, %128 : vector<8x128xf32>
    %cst_40 = arith.constant 0.327591091 : f32
    %130 = vector.broadcast %cst_40 : f32 to vector<8x128xf32>
    %131 = arith.mulf %130, %129 : vector<8x128xf32>
    %cst_41 = arith.constant 1.000000e+00 : f32
    %132 = vector.broadcast %cst_41 : f32 to vector<8x128xf32>
    %133 = arith.addf %132, %131 : vector<8x128xf32>
    %134 = tpu.reciprocal %133 {approx = true} : vector<8x128xf32> -> vector<8x128xf32>
    %cst_42 = arith.constant 1.06140542 : f32
    %135 = vector.broadcast %cst_42 : f32 to vector<8x128xf32>
    %136 = arith.mulf %135, %134 : vector<8x128xf32>
    %cst_43 = arith.constant -1.45315206 : f32
    %137 = vector.broadcast %cst_43 : f32 to vector<8x128xf32>
    %138 = arith.addf %136, %137 : vector<8x128xf32>
    %139 = arith.mulf %138, %134 : vector<8x128xf32>
    %cst_44 = arith.constant 1.42141378 : f32
    %140 = vector.broadcast %cst_44 : f32 to vector<8x128xf32>
    %141 = arith.addf %139, %140 : vector<8x128xf32>
    %142 = arith.mulf %141, %134 : vector<8x128xf32>
    %cst_45 = arith.constant -0.284496725 : f32
    %143 = vector.broadcast %cst_45 : f32 to vector<8x128xf32>
    %144 = arith.addf %142, %143 : vector<8x128xf32>
    %145 = arith.mulf %144, %134 : vector<8x128xf32>
    %cst_46 = arith.constant 0.254829586 : f32
    %146 = vector.broadcast %cst_46 : f32 to vector<8x128xf32>
    %147 = arith.addf %145, %146 : vector<8x128xf32>
    %148 = arith.mulf %147, %134 : vector<8x128xf32>
    %cst_47 = arith.constant 0.000000e+00 : f32
    %149 = vector.broadcast %cst_47 : f32 to vector<8x128xf32>
    %150 = arith.maximumf %126, %149 : vector<8x128xf32>
    %cst_48 = arith.constant 0.707106769 : f32
    %151 = vector.broadcast %cst_48 : f32 to vector<8x128xf32>
    %152 = arith.mulf %151, %129 : vector<8x128xf32>
    %cst_49 = arith.constant 0.000000e+00 : f32
    %153 = vector.broadcast %cst_49 : f32 to vector<8x128xf32>
    %154 = arith.subf %153, %129 : vector<8x128xf32>
    %155 = arith.mulf %154, %129 : vector<8x128xf32>
    %156 = math.exp %155 : vector<8x128xf32>
    %157 = arith.mulf %148, %156 : vector<8x128xf32>
    %158 = arith.mulf %152, %157 : vector<8x128xf32>
    %159 = arith.subf %150, %158 : vector<8x128xf32>
    %160 = arith.truncf %159 : vector<8x128xf32> to vector<8x128xbf16>
    %c0_50 = arith.constant 0 : index
    %c0_51 = arith.constant 0 : index
    %161 = vector.load %arg12[%c0_50, %c0_51] : memref<128x256xbf16, #tpu.memory_space<vmem>>, vector<128x256xbf16>
    %cst_52 = arith.constant dense<0.000000e+00> : vector<8x256xf32>
    %162 = tpu.matmul %160, %161, %cst_52 {dimension_numbers = #tpu.dot_dimension_numbers<[1], [0], [0], [1], [0, 0, 1, 1], [], []>} : vector<8x128xbf16>, vector<128x256xbf16>, vector<8x256xf32> -> vector<8x256xf32>
    %c0_53 = arith.constant 0 : index
    %c0_54 = arith.constant 0 : index
    %163 = vector.load %arg13[%c0_53, %c0_54] : memref<1x256xf32, #tpu.memory_space<vmem>>, vector<1x256xf32>
    %164 = vector.broadcast %163 : vector<1x256xf32> to vector<8x256xf32>
    %165 = arith.addf %162, %164 : vector<8x256xf32>
    %cst_55 = arith.constant 0.000000e+00 : f32
    %166 = vector.broadcast %cst_55 : f32 to vector<8x256xf32>
    %167 = arith.maximumf %165, %166 : vector<8x256xf32>
    %168 = arith.truncf %167 : vector<8x256xf32> to vector<8x256xbf16>
    %c0_56 = arith.constant 0 : index
    %c0_57 = arith.constant 0 : index
    %169 = vector.load %arg14[%c0_56, %c0_57] : memref<256x256xbf16, #tpu.memory_space<vmem>>, vector<256x256xbf16>
    %cst_58 = arith.constant dense<0.000000e+00> : vector<8x256xf32>
    %170 = tpu.matmul %168, %169, %cst_58 {dimension_numbers = #tpu.dot_dimension_numbers<[1], [0], [0], [1], [0, 0, 1, 1], [], []>} : vector<8x256xbf16>, vector<256x256xbf16>, vector<8x256xf32> -> vector<8x256xf32>
    %c0_59 = arith.constant 0 : index
    %c0_60 = arith.constant 0 : index
    %171 = vector.load %arg15[%c0_59, %c0_60] : memref<1x256xf32, #tpu.memory_space<vmem>>, vector<1x256xf32>
    %172 = vector.broadcast %171 : vector<1x256xf32> to vector<8x256xf32>
    %173 = arith.addf %170, %172 : vector<8x256xf32>
    %cst_61 = arith.constant 0.000000e+00 : f32
    %174 = vector.broadcast %cst_61 : f32 to vector<8x256xf32>
    %175 = arith.maximumf %173, %174 : vector<8x256xf32>
    %176 = arith.truncf %175 : vector<8x256xf32> to vector<8x256xbf16>
    %c0_62 = arith.constant 0 : index
    %c0_63 = arith.constant 0 : index
    %177 = vector.load %arg16[%c0_62, %c0_63] : memref<256x32xbf16, #tpu.memory_space<vmem>>, vector<256x32xbf16>
    %cst_64 = arith.constant dense<0.000000e+00> : vector<8x32xf32>
    %178 = tpu.matmul %176, %177, %cst_64 {dimension_numbers = #tpu.dot_dimension_numbers<[1], [0], [0], [1], [0, 0, 1, 1], [], []>} : vector<8x256xbf16>, vector<256x32xbf16>, vector<8x32xf32> -> vector<8x32xf32>
    %c0_65 = arith.constant 0 : index
    %c0_66 = arith.constant 0 : index
    %179 = vector.load %arg17[%c0_65, %c0_66] : memref<1x32xf32, #tpu.memory_space<vmem>>, vector<1x32xf32>
    %180 = vector.broadcast %179 : vector<1x32xf32> to vector<8x32xf32>
    %181 = arith.addf %178, %180 : vector<8x32xf32>
    %182 = arith.addf %96, %181 : vector<8x32xf32>
    %c0_67 = arith.constant 0 : index
    %c0_68 = arith.constant 0 : index
    %183 = vector.load %arg18[%c0_67, %c0_68] : memref<8x32xf32, #tpu.memory_space<vmem>>, vector<8x32xf32>
    tpu.vector_store %arg18[%c0_67, %c0_68], %182 {strides = array<i32>} : memref<8x32xf32, #tpu.memory_space<vmem>>, vector<8x32xf32>,
    return
  }
  func.func @transform_0(%arg0: i32) -> (i32, i32) {
    %c0_i32 = arith.constant 0 : i32
    %c0_i32_0 = arith.constant 0 : i32
    return %arg0, %c0_i32 : i32, i32
  }
  func.func @transform_1(%arg0: i32) -> (i32, i32) {
    %c0_i32 = arith.constant 0 : i32
    %c0_i32_0 = arith.constant 0 : i32
    %c0_i32_1 = arith.constant 0 : i32
    return %c0_i32, %c0_i32_0 : i32, i32
  }
  func.func @transform_2(%arg0: i32) -> (i32, i32) {
    %c0_i32 = arith.constant 0 : i32
    %c0_i32_0 = arith.constant 0 : i32
    %c0_i32_1 = arith.constant 0 : i32
    return %c0_i32, %c0_i32_0 : i32, i32
  }
  func.func @transform_3(%arg0: i32) -> (i32, i32) {
    %c0_i32 = arith.constant 0 : i32
    %c0_i32_0 = arith.constant 0 : i32
    %c0_i32_1 = arith.constant 0 : i32
    return %c0_i32, %c0_i32_0 : i32, i32
  }
  func.func @transform_4(%arg0: i32) -> (i32, i32) {
    %c0_i32 = arith.constant 0 : i32
    %c0_i32_0 = arith.constant 0 : i32
    %c0_i32_1 = arith.constant 0 : i32
    return %c0_i32, %c0_i32_0 : i32, i32
  }
  func.func @transform_5(%arg0: i32) -> (i32, i32) {
    %c0_i32 = arith.constant 0 : i32
    %c0_i32_0 = arith.constant 0 : i32
    %c0_i32_1 = arith.constant 0 : i32
    return %c0_i32, %c0_i32_0 : i32, i32
  }
  func.func @transform_6(%arg0: i32) -> (i32, i32) {
    %c0_i32 = arith.constant 0 : i32
    %c0_i32_0 = arith.constant 0 : i32
    %c0_i32_1 = arith.constant 0 : i32
    return %c0_i32, %c0_i32_0 : i32, i32
  }
  func.func @transform_7(%arg0: i32) -> (i32, i32) {
    %c0_i32 = arith.constant 0 : i32
    %c0_i32_0 = arith.constant 0 : i32
    %c0_i32_1 = arith.constant 0 : i32
    return %c0_i32, %c0_i32_0 : i32, i32
  }
  func.func @transform_8(%arg0: i32) -> (i32, i32) {
    %c0_i32 = arith.constant 0 : i32
    %c0_i32_0 = arith.constant 0 : i32
    %c0_i32_1 = arith.constant 0 : i32
    return %c0_i32, %c0_i32_0 : i32, i32
  }
  func.func @transform_9(%arg0: i32) -> (i32, i32) {
    %c0_i32 = arith.constant 0 : i32
    %c0_i32_0 = arith.constant 0 : i32
    %c0_i32_1 = arith.constant 0 : i32
    return %c0_i32, %c0_i32_0 : i32, i32
  }
  func.func @transform_10(%arg0: i32) -> (i32, i32) {
    %c0_i32 = arith.constant 0 : i32
    %c0_i32_0 = arith.constant 0 : i32
    %c0_i32_1 = arith.constant 0 : i32
    return %c0_i32, %c0_i32_0 : i32, i32
  }
  func.func @transform_11(%arg0: i32) -> (i32, i32) {
    %c0_i32 = arith.constant 0 : i32
    %c0_i32_0 = arith.constant 0 : i32
    %c0_i32_1 = arith.constant 0 : i32
    return %c0_i32, %c0_i32_0 : i32, i32
  }
  func.func @transform_12(%arg0: i32) -> (i32, i32) {
    %c0_i32 = arith.constant 0 : i32
    %c0_i32_0 = arith.constant 0 : i32
    %c0_i32_1 = arith.constant 0 : i32
    return %c0_i32, %c0_i32_0 : i32, i32
  }
  func.func @transform_13(%arg0: i32) -> (i32, i32) {
    %c0_i32 = arith.constant 0 : i32
    %c0_i32_0 = arith.constant 0 : i32
    %c0_i32_1 = arith.constant 0 : i32
    return %c0_i32, %c0_i32_0 : i32, i32
  }
  func.func @transform_14(%arg0: i32) -> (i32, i32) {
    %c0_i32 = arith.constant 0 : i32
    %c0_i32_0 = arith.constant 0 : i32
    %c0_i32_1 = arith.constant 0 : i32
    return %c0_i32, %c0_i32_0 : i32, i32
  }
  func.func @transform_15(%arg0: i32) -> (i32, i32) {
    %c0_i32 = arith.constant 0 : i32
    %c0_i32_0 = arith.constant 0 : i32
    %c0_i32_1 = arith.constant 0 : i32
    return %c0_i32, %c0_i32_0 : i32, i32
  }
  func.func @transform_16(%arg0: i32) -> (i32, i32) {
    %c0_i32 = arith.constant 0 : i32
    %c0_i32_0 = arith.constant 0 : i32
    %c0_i32_1 = arith.constant 0 : i32
    return %c0_i32, %c0_i32_0 : i32, i32
  }
  func.func @transform_17(%arg0: i32) -> (i32, i32) {
    %c0_i32 = arith.constant 0 : i32
    %c0_i32_0 = arith.constant 0 : i32
    return %arg0, %c0_i32 : i32, i32
  }
}

</mosaic_0001>

<bundles_post_ra>
// kernel: tpu_custom_call.1
= control target key start
LH: loop header
LB: loop body
LE: loop exit
PB: predicated region body
PF: predicated region fallthrough
CT: control target
= control target key end

     0   :  { %s2934_s0 = inlined_call_operand.vmem [shape: f32[16,32], index: 0, kind: input, shape index: {}]   ;;  %s2935_s1 = inlined_call_operand.vmem [shape: f32[1,32], index: 1, kind: input, shape index: {}]   ;;  %s2936_s2 = inlined_call_operand.vmem [shape: f32[1,32], index: 2, kind: input, shape index: {}]   ;;  %s2937_s3 = inlined_call_operand.vmem [shape: bf16[32,96], index: 3, kind: input, shape index: {}]   ;;  %s2938_s4 = inlined_call_operand.vmem [shape: f32[1,96], index: 4, kind: input, shape index: {}]   ;;  %s2939_s5 = inlined_call_operand.hbm [shape: bf16[32,32], index: 5, kind: input, shape index: {}]   ;;  %s2940_s6 = inlined_call_operand.vmem [shape: f32[1,32], index: 6, kind: input, shape index: {}]   ;;  %s2941_s7 = inlined_call_operand.vmem [shape: f32[1,32], index: 7, kind: input, shape index: {}]   ;;  %s2942_s8 = inlined_call_operand.vmem [shape: f32[1,32], index: 8, kind: input, shape index: {}]   ;;  %s2943_s9 = inlined_call_operand.hbm [shape: bf16[32,128], index: 9, kind: input, shape index: {}]   ;;  %s2944_s10 = inlined_call_operand.hbm [shape: f32[1,128], index: 10, kind: input, shape index: {}]   ;;  %s2945_s11 = inlined_call_operand.vmem [shape: bf16[128,256], index: 11, kind: input, shape index: {}]   ;;  %s2946_s12 = inlined_call_operand.vmem [shape: f32[1,256], index: 12, kind: input, shape index: {}]   ;;  %s2947_s13 = inlined_call_operand.hbm [shape: bf16[256,256], index: 13, kind: input, shape index: {}]   ;;  %s2948_s14 = inlined_call_operand.vmem [shape: f32[1,256], index: 14, kind: input, shape index: {}]   ;;  %s2949_s15 = inlined_call_operand.vmem [shape: bf16[256,32], index: 15, kind: input, shape index: {}]   ;;  %s2950_s16 = inlined_call_operand.vmem [shape: f32[1,32], index: 16, kind: input, shape index: {}]   ;;  %s2951_s17 = inlined_call_operand.hbm [shape: f32[16,32], index: 17, kind: output, shape index: {}]  }
   0x1   :  { %2961 = sst [smem:[#allocation22_spill]] %s2934_s0 }
   0x2   :  { %2962 = sst [smem:[#allocation23_spill]] %s2935_s1 }
   0x3   :  { %2963 = sst [smem:[#allocation24_spill]] %s2939_s5 }
   0x4   :  { %2964 = sst [smem:[#allocation25_spill]] %s2943_s9 }
   0x5   :  { %2965 = sst [smem:[#allocation26_spill]] %s2950_s16 }
   0x6   :  { %2966 = sst [smem:[#allocation27_spill]] %s2951_s17 }
   0x7   :  { %22 = vsyncpa [#allocation3], 0 }
   0x8   :  { %23 = vsyncpa [#allocation6], 0 }
   0x9   :  { %24 = vsyncpa [#allocation9], 0 }
   0xa   :  { %25 = vsyncpa [#allocation4], 0 }
   0xb   :  { %27 = vsyncpa [#allocation4 + $0x1], 0  ;;  %s2559_s24 = smov 0   ;;  %s2561_s25 = smov 0  }
   0xc   :  { %s2563_s26 = smov 0   ;;  %s2565_s27 = smov 0  }
   0xd LB: > { %2967 = sst [smem:[#allocation15_spill]] %s2437_s24  ;;  %s2580_s28 = sadd.s32 4294967295, %s2449_s27   ;;  %s2449_s27 = sphi %s2565_s27, %s2989_s27   ;;  %s2445_s26 = sphi %s2563_s26, %s2991_s26   ;;  %s2441_s25 = sphi %s2561_s25, %s2993_s25   ;;  %s2437_s24 = sphi %s2559_s24, %s2992_s24  }
   0xe   : > { %2968 = sst [smem:[#allocation16_spill]] %s2445_s26  ;;  %s1748_s29 = sadd.s32 4294967294, %s2449_s27  }
   0xf   : > { %2969 = sst [smem:[#allocation17_spill]] %s2449_s27  ;;  %s2584_s0 = sadd.s32 1, %s2449_s27  }
  0x10   : > { %2970 = sst [smem:[#allocation18_spill]] %s2584_s0  ;;  %s402_s30 = sadd.s32 1, %s2445_s26 }
  0x11   : > { %s399_s18 = ssub.s32 %s2449_s27, %s2584_s0  ;;  %p412_p0 = scmp.ne.s32.totalorder %s2445_s26, %s2441_s25 }
  0x12   : > { %p400_p1 = scmp.eq.s32.totalorder %s399_s18, 0  ;;  %p413_p2 = scmp.eq.s32.totalorder %s2580_s28, 1 }
  0x13   : > { %p418_p3 = scmp.ne.s32.totalorder %s2441_s25, %s2437_s24  ;;  %p419_p4 = scmp.eq.s32.totalorder %s1748_s29, 1 }
  0x14   : > { %s2595_s19 = scalar_select %p400_p1, %s2445_s26, %s402_s30  }
  0x15   : > { %p2597_p5 = por %p413_p2, %p412_p0  ;;  %p2601_p6 = por %p419_p4, %p418_p3 }
  0x16   : > { %2971 = sst [smem:[#allocation19_spill]] %s2595_s19  ;;  %p1749_p7 = scmp.ge.s32.totalorder %s2449_s27, 1 }
  0x17   : > { %s2972_s1 = scalar_select %p2597_p5, 1, 0 }
  0x18   : > { %s2974_s20 = scalar_select %p2601_p6, 1, 0 }
  0x19   : > { %2973 = sst [smem:[#allocation20_spill]] %s2972_s1  ;;  %p426_p8 = scmp.lt.s32.totalorder %s2449_s27, 3 }
  0x1a   : > { %2975 = sst [smem:[#allocation21_spill]] %s2974_s20  ;;  %p2162_p9 = scmp.eq.s32.totalorder %s2580_s28, 0 }
  0x1b   : > { %p2608_p10 = pnand %p1749_p7, %p426_p8  ;;  %s2977_s9 = sld [smem:[#allocation25_spill]] }
  0x1c   : > { %s2978_s5 = sld [smem:[#allocation24_spill]]  ;;  %s2451_s0 = smov [#allocation5]  }
  0x1d   : > { %p2145_p11 = pneg %p2608_p10  ;;  %s474_s20 = sshll.u32 %s2451_s0, 4  ;;  %s475_s20 = int_to_ptr.vmem [resolvable:$true] %s474_s20 }
  0x1e   : > { %s2452_s22 = smov 64   ;;  %s2453_s23 = smov 4  }
  0x1f   : > { %p2622_p12 = pnand %p2162_p9, %p2145_p11  ;;  %s504_s1 = sshll.u32 %s2947_s13, 4  ;;  %s505_s1 = int_to_ptr.hbm [resolvable:$true] %s504_s1 }
  0x20   : > { %s2455_s17 = smov [#allocation7]   ;;  %s2458_s30 = smov 8  }
  0x21   : > { %s472_s29 = sshll.u32 %s2977_s9, 4  ;;  %s2454_s9 = smov [#allocation2]   ;;  %s473_s29 = int_to_ptr.hbm [resolvable:$true] %s472_s29 }
  0x22   : > { %s449_s19 = sshll.u32 %s2978_s5, 4  ;;  %s451_s24 = sshll.u32 %s2454_s9, 4  ;;  %s450_s19 = int_to_ptr.hbm [resolvable:$true] %s449_s19  ;;  %s452_s24 = int_to_ptr.vmem [resolvable:$true] %s451_s24 }
  0x23   : > { %2151 = dma.hbm_to_vmem [thread:$0]  (!%p2622_p12), %s473_s29, 256, %s475_s20, [#allocation6], %s2452_s22, %s2452_s22, %s2453_s23  }
  0x24   : > { %s487_s5 = sshll.u32 %s2944_s10, 4  ;;  %s489_s16 = sshll.u32 %s2455_s17, 4  ;;  %s488_s5 = int_to_ptr.hbm [resolvable:$true] %s487_s5  ;;  %s490_s16 = int_to_ptr.vmem [resolvable:$true] %s489_s16 }
  0x25   : > { %2148 = dma.hbm_to_vmem [thread:$0]  (!%p2622_p12), %s450_s19, 256, %s452_s24, [#allocation3], %s2452_s22, %s2452_s22, %s2453_s23  }
  0x26   : > { %2154 = dma.hbm_to_vmem [thread:$0]  (!%p2622_p12), %s488_s5, 16, %s490_s16, [#allocation6]  }
  0x27   : > { %s2456_s9 = smov [#allocation8]   ;;  %s2457_s29 = smov 128  }
  0x28   : > { %s506_s20 = sshll.u32 %s2456_s9, 4  ;;  %538 = sbr.rel (%p2608_p10) target bundleno = 2222 (0x8ae), region = 88  ;;  %s507_s20 = int_to_ptr.vmem [resolvable:$true] %s506_s20 }
  0x29   : > { %2157 = dma.hbm_to_vmem [thread:$0]  (!%p2622_p12), %s505_s1, 4096, %s507_s20, [#allocation9], %s2457_s29, %s2457_s29, %s2458_s30  }
  0x2d   : > { %2420 = dma.done.wait (%p2162_p9), [#allocation3], 256  }
  0x2e   : > { %2422 = vsyncadd (%p2162_p9), [#allocation3], 4294967040 }
  0x2f   : > { %2424 = dma.done.wait (%p2162_p9), [#allocation6], 272  }
  0x30   : > { %2426 = vsyncadd (%p2162_p9), [#allocation6], 4294967024 }
  0x31   : > { %2428 = dma.done.wait (%p2162_p9), [#allocation9], 4096  }
  0x32   : > { %2430 = vsyncadd (%p2162_p9), [#allocation9], 4294963200  ;;  %p605_p13 = scmp.lt.s32.totalorder %s2580_s28, 1  ;;  %s2980_s26 = sld [smem:[#allocation22_spill]]  ;;  %vm613_vm0 = vcmask 261120   ;;  %v2459_v2 = vmov 32.0   ;;  %v696_v56 = vlaneseq }
  0x33   : > { %2229 = vrcp.f32 %v2459_v2  ;;  %v2058_v14 = vld [vmem:[%s2937_s3 + $0x8] sm:$0xff]  ;;  %v2057_v15 = vld [vmem:[%s2937_s3] sm:$0xff]  ;;  %s2981_s0 = sld [smem:[#allocation23_spill]]  ;;  %s2462_s17 = smov 112   ;;  %vm706_vm5 = vcmask 64512   ;;  %vm840_vm7 = vcmask 1043456  }
  0x34   : > { %s606_s5 = scalar_select %p605_p13, %s2580_s28, 1  ;;  %681 = vmatpush.bf16.msra.mxu0 %v2058_v14  ;;  %v2222_v28 = vld [vmem:[%s2936_s2] ss:$0 sm:$0xff]  ;;  %v697_v57 = vshrl.u32 %v696_v56, 7  ;;  %v699_v58 = vand.u32 127, %v696_v56  ;;  %vm950_vm8 = vcmask 130048  }
  0x35   : > { %v2223_v32 = vld [vmem:[%s2938_s4] ss:$0 sm:$0xff]  ;;  %s2463_s24 = smov 96   ;;  %v2464_v59 = vmov -1e+30   ;;  %s2467_s19 = smov 8  }
  0x36   : > { %s1761_s16 = sshll.u32 %s606_s5, 3  ;;  %s2460_s5 = smov 104   ;;  %vm700_vm6 = vcmp.le.s32.totalorder %v699_v58, %v697_v57  ;;  %vm953_vm9 = vcmask 195584  }
  0x37   : > { %v701_v60 = vsel %vm700_vm6, 0.0, %v2464_v59  ;;  %s2468_s1 = smov 16   ;;  %s2054_s20 = sshll.u32 %s2580_s28, 3 }
  0x38   : > { %s608_s27 = scalar_lea.vmem %s2980_s26, %s1761_s16  ;;  %682 = vmatpush.bf16.msra.mxu0 %v2057_v15  ;;  %s2461_s16 = smov 120  }
  0x39   : > { %v2659_v0 = vld [vmem:[%s608_s27] sm:$0xff]  ;;  %v2230_v3 = vpop.eup %2229  ;;  %s2465_s26 = smov 64   ;;  %s2466_s27 = smov 24  }
  0x3a   : > { %v614_v1 = vsel %vm613_vm0, %v2659_v0, 0.0  ;;  %v618_v4 = vmul.f32 32.0, %v2230_v3  ;;  %vm622_vm1 = vweird.f32 %v2230_v3  ;;  %v2221_v25 = vld [vmem:[%s2981_s0] ss:$0 sm:$0xff]  ;;  %s602_s0 = sand.u32 1, %s2441_s25  }
  0x3b   : > { %615 = vadd.xlane.f32.xlu0 %v614_v1  ;;  %s1760_s9 = sshll.u32 %s602_s0, 3  ;;  %s1633_s28 = scalar_lea.sflag [#allocation4], %s602_s0 }
  0x3c   : > { %v619_v5 = vsub.f32 1.0, %v618_v4 }
  0x3e   : > { %v620_v6 = vmul.f32 %v2230_v3, %v619_v5 }
  0x40   : > { %v621_v7 = vadd.f32 %v2230_v3, %v620_v6 }
  0x42   : > { %v2663_v8 = vsel %vm622_vm1, %v2230_v3, %v621_v7 }
  0xae   : > { %v616_v9 = vpop.xlane.xlu0 %615 }
  0xaf   : > { %v624_v10 = vmul.f32 %v2663_v8, %v616_v9 }
  0xb1   : > { %v625_v11 = vsub.f32 %v2659_v0, %v624_v10 }
  0xb3   : > { %v626_v12 = vmul.f32 %v625_v11, %v625_v11 }
  0xb5   : > { %v627_v13 = vsel %vm613_vm0, %v626_v12, 0.0 }
  0xb6   : > { %628 = vadd.xlane.f32.xlu0 %v627_v13 }
 0x129   : > { %v629_v16 = vpop.xlane.xlu0 %628 }
 0x12a   : > { %v630_v17 = vmul.f32 %v629_v16, %v2663_v8 }
 0x12c   : > { %v631_v18 = vadd.f32 1e-05, %v630_v17 }
 0x12e   : > { %2231 = vrsqrt.f32 %v631_v18  ;;  %vm638_vm3 = vweird.f32 %v631_v18 }
 0x134   : > { %v2232_v19 = vpop.eup %2231 }
 0x135   : > { %v633_v20 = vmul.f32 %v2232_v19, %v631_v18  ;;  %vm639_vm2 = vweird.f32 %v2232_v19 }
 0x136   : > { %vm640_vm4 = vmor %vm638_vm3, %vm639_vm2 }
 0x137   : > { %v634_v21 = vmul.f32 %v2232_v19, %v633_v20 }
 0x139   : > { %v635_v22 = vmul.f32 0.5, %v634_v21 }
 0x13b   : > { %v636_v23 = vsub.f32 1.5, %v635_v22 }
 0x13d   : > { %v637_v24 = vmul.f32 %v2232_v19, %v636_v23 }
 0x13f   : > { %v641_v26 = vsel %vm640_vm4, %v2232_v19, %v637_v24 }
 0x140   : > { %v642_v27 = vmul.f32 %v641_v26, %v625_v11 }
 0x142   : > { %v646_v29 = vmul.f32 %v2221_v25, %v642_v27 }
 0x144   : > { %v650_v30 = vadd.f32 %v2222_v28, %v646_v29 }
 0x146   : > { %v651_v31 = vpack.c.bf16 %v650_v30, %v650_v30 }
 0x148   : > { %1770 = vmatmul.msk.bf16.vlgmr.msra.gmra.mxu0 %vm613_vm0, %v651_v31 }
 0x1c5   : > { %v684_v33 = vpop.f32.mrf.mxu0 }
 0x1c6   : > { %v685_v34 = vadd.f32 %v2223_v32, %v684_v33 }
 0x1c8   : > { %v688_v35 = vpack.c.bf16 %v685_v34, %v685_v34 }
 0x1ca   : > { %694 = vrot.lane.b32.xlu2 %v688_v35, %s2460_s5  ;;  %690 = vrot.lane.b32.xlu1 %v688_v35, %s2461_s16  ;;  %v702_v43 = vunpack.c.l.b16 %v688_v35  ;;  %s2982_s5 = sld [smem:[#allocation26_spill]] }
 0x1cc   : > { %v703_v47 = vpack.c.b16 %v702_v43, %v702_v43 }
 0x1cd   : > { %v686_v36 = vpop.f32.mrf.mxu0 }
 0x1d2   : > { %692 = vrot.lane.b32.xlu1 %v688_v35, %s2462_s17 }
 0x224   : > { %v695_v37 = vpop.permute.xlu2 %694 }
 0x225   : > { %v772_v38 = vunpack.c.l.b16 %v695_v37 }
 0x227   : > { %v773_v39 = vpack.c.b16 %v772_v38, %v772_v38 }
 0x229   : > { %774 = vrot.lane.b32.xlu1 %v773_v39, %s2463_s24 }
 0x23c   : > { %v691_v40 = vpop.permute.xlu1 %690 }
 0x23d   : > { %v726_v41 = vunpack.c.l.b16 %v691_v40 }
 0x23f   : > { %v727_v42 = vpack.c.b16 %v726_v41, %v726_v41 }
 0x241   : > { %728 = vrot.lane.b32.xlu2 %v727_v42, %s2463_s24 }
 0x244   : > { %v693_v44 = vpop.permute.xlu1 %692 }
 0x245   : > { %v749_v45 = vunpack.c.l.b16 %v693_v44 }
 0x247   : > { %v750_v46 = vpack.c.b16 %v749_v45, %v749_v45 }
 0x249   : > { %751 = vrot.lane.b32.xlu0 %v750_v46, %s2463_s24  ;;  %704 = vrot.lane.b32.xlu2 %v703_v47, %s2463_s24  ;;  %s2983_s24 = sld [smem:[#allocation27_spill]] }
 0x29b   : > { %v729_v48 = vpop.permute.xlu2 %728  ;;  %v775_v49 = vpop.permute.xlu1 %774 }
 0x29c   : > { %v734_v50 = vsel %vm706_vm5, %v729_v48, 0  ;;  %v780_v51 = vsel %vm706_vm5, %v775_v49, 0 }
 0x29d   : > { %743 = vmatpush.bf16.xpose.msra.mxu2 %v734_v50  ;;  %789 = vmatpush.bf16.xpose.msrb.mxu0 %v780_v51 }
 0x2a3   : > { %v705_v52 = vpop.permute.xlu2 %704 }
 0x2a4   : > { %1772 = vmatmul.msk.bf16.vlgmr.msra.gmra.mxu2 %vm706_vm5, %v691_v40  ;;  %1774 = vmatmul.msk.bf16.vlgmr.msrb.gmra.mxu0 %vm706_vm5, %v695_v37  ;;  %v711_v53 = vsel %vm706_vm5, %v705_v52, 0 }
 0x2a5   : > { %720 = vmatpush.bf16.xpose.msra.mxu1 %v711_v53 }
 0x2ac   : > { %1771 = vmatmul.msk.bf16.vlgmr.msra.gmra.mxu1 %vm706_vm5, %v688_v35 }
 0x2bb   : > { %v752_v54 = vpop.permute.xlu0 %751 }
 0x2bc   : > { %v757_v55 = vsel %vm706_vm5, %v752_v54, 0 }
 0x2bd   : > { %766 = vmatpush.bf16.xpose.msra.mxu3 %v757_v55 }
 0x2c4   : > { %1773 = vmatmul.msk.bf16.vlgmr.msra.gmra.mxu3 %vm706_vm5, %v693_v44 }
 0x321   : > { %v791_v61 = vpop.f32.mrf.mxu0 }
 0x322   : > { %v792_v62 = vadd.f32 %v791_v61, %v701_v60 }
 0x324   : > { %v804_v63 = vsel %vm706_vm5, %v792_v62, -inf }
 0x325   : > { %805 = vmax.xlane.f32.xlu0 %v804_v63 }
 0x327   : > { %v745_v1 = vpop.f32.mrf.mxu2 }
 0x328   : > { %v746_v2 = vadd.f32 %v745_v1, %v701_v60 }
 0x329   : > { %v722_v3 = vpop.f32.mrf.mxu1  ;;  %v793_v4 = vpop.f32.mrf.mxu0 }
 0x32a   : > { %v723_v5 = vadd.f32 %v722_v3, %v701_v60  ;;  %v798_v6 = vsel %vm706_vm5, %v746_v2, -inf }
 0x32b   : > { %799 = vmax.xlane.f32.xlu1 %v798_v6 }
 0x32c   : > { %v795_v14 = vsel %vm706_vm5, %v723_v5, -inf }
 0x32f   : > { %v747_v7 = vpop.f32.mrf.mxu2 }
 0x331   : > { %v724_v9 = vpop.f32.mrf.mxu1 }
 0x332   : > { %v2060_v9 = vld [vmem:[#allocation2 + $0x8] sm:$0xff] }
 0x339   : > { %899 = vrot.lane.b32.xlu0 %v773_v39, %s2465_s26 }
 0x344   : > { %878 = vrot.lane.b32.xlu1 %v750_v46, %s2465_s26 }
 0x347   : > { %v768_v10 = vpop.f32.mrf.mxu3 }
 0x348   : > { %v769_v11 = vadd.f32 %v768_v10, %v701_v60 }
 0x34a   : > { %v801_v12 = vsel %vm706_vm5, %v769_v11, -inf }
 0x34b   : > { %802 = vmax.xlane.f32.xlu2 %v801_v12  ;;  %v2059_v12 = vld [vmem:[#allocation2] sm:$0xff] }
 0x34c   : > { %835 = vrot.lane.b32.xlu1 %v703_v47, %s2465_s26 }
 0x34f   : > { %v770_v13 = vpop.f32.mrf.mxu3 }
 0x363   : > { %857 = vrot.lane.b32.xlu2 %v727_v42, %s2465_s26  ;;  %s1643_s26 = scalar_lea.hbm %s2983_s24, %s2054_s20 }
 0x364   : > { %s1647_s22 = sshll.u32 %s1643_s26, 4  ;;  %s1648_s22 = int_to_ptr.hbm [resolvable:$true] %s1647_s22 }
 0x365   : > { %s2389_s23 = sshra.s32 %s1648_s22, 4  ;;  %s2390_s23 = int_to_ptr.hbm [resolvable:$true] %s2389_s23 }
 0x366   : > { %s2391_s18 = scalar_lea.hbm %s2390_s23, 8 }
 0x367   : > { %p2392_p0 = scmp.ne.s32.totalorder %s2390_s23, %s2391_s18 }
 0x369   : > { %p2393_p1 = pnand %p2392_p0, %p2597_p5 }
 0x36b   : > { %p2394_p2 = pneg %p2393_p1 }
 0x38c   : > { %796 = vmax.xlane.f32.xlu2 %v795_v14 }
 0x398   : > { %v806_v15 = vpop.xlane.xlu0 %805 }
 0x399   : > { %v810_v16 = vsub.f32 %v792_v62, %v806_v15 }
 0x39b   : > { %v817_v17 = vmul.f32 1.442695, %v810_v16 }
 0x39d   : > { %2233 = vpow2.f32 %v817_v17 }
 0x39e   : > { %v800_v18 = vpop.xlane.xlu1 %799 }
 0x39f   : > { %v808_v19 = vsub.f32 %v746_v2, %v800_v18 }
 0x3a1   : > { %v813_v20 = vmul.f32 1.442695, %v808_v19 }
 0x3a3   : > { %v2234_v21 = vpop.eup %2233  ;;  %2235 = vpow2.f32 %v813_v20 }
 0x3a4   : > { %v828_v22 = vsel %vm706_vm5, %v2234_v21, 0.0  ;;  %v834_v27 = vpack.c.bf16 %v2234_v21, %v2234_v21 }
 0x3a5   : > { %829 = vadd.xlane.f32.xlu2 %v828_v22 }
 0x3a9   : > { %v2236_v23 = vpop.eup %2235 }
 0x3aa   : > { %v822_v24 = vsel %vm706_vm5, %v2236_v23, 0.0  ;;  %v832_v38 = vpack.c.bf16 %v2236_v23, %v2236_v23  ;;  %v2224_v23 = vld [vmem:[%s2940_s6] ss:$0 sm:$0xff] }
 0x3ab   : > { %v900_v25 = vpop.permute.xlu0 %899  ;;  %823 = vadd.xlane.f32.xlu0 %v822_v24 }
 0x3ac   : > { %v905_v26 = vsel %vm840_vm7, %v900_v25, 0 }
 0x3ad   : > { %914 = vmatpush.bf16.msra.mxu0 %v905_v26 }
 0x3b0   : > { %1778 = vmatmul.msk.bf16.vlgmr.msra.gmra.mxu0 %vm706_vm5, %v834_v27 }
 0x3b6   : > { %v879_v28 = vpop.permute.xlu1 %878 }
 0x3b7   : > { %v884_v29 = vsel %vm840_vm7, %v879_v28, 0 }
 0x3b8   : > { %893 = vmatpush.bf16.msrb.mxu3 %v884_v29 }
 0x3be   : > { %v836_v30 = vpop.permute.xlu1 %835  ;;  %v803_v31 = vpop.xlane.xlu2 %802 }
 0x3bf   : > { %v809_v32 = vsub.f32 %v769_v11, %v803_v31  ;;  %v842_v33 = vsel %vm840_vm7, %v836_v30, 0 }
 0x3c0   : > { %851 = vmatpush.bf16.msrb.mxu1 %v842_v33 }
 0x3c1   : > { %v815_v34 = vmul.f32 1.442695, %v809_v32 }
 0x3c3   : > { %2237 = vpow2.f32 %v815_v34  ;;  %v2062_v34 = vld [vmem:[#allocation5 + $0x8] sm:$0xff] }
 0x3c4   : > { %980 = vmatpush.bf16.msra.mxu1 %v2060_v9 }
 0x3c6   : > { %v858_v35 = vpop.permute.xlu2 %857 }
 0x3c7   : > { %v863_v36 = vsel %vm840_vm7, %v858_v35, 0  ;;  %v2061_v35 = vld [vmem:[#allocation5] sm:$0xff] }
 0x3c8   : > { %872 = vmatpush.bf16.msrb.mxu2 %v863_v36  ;;  %981 = vmatpush.bf16.msra.mxu1 %v2059_v12  ;;  %v1823_v12 = vld [vmem:[%s2945_s11 + $0x30] sm:$0xf] }
 0x3c9   : > { %v2238_v37 = vpop.eup %2237 }
 0x3ca   : > { %v825_v39 = vsel %vm706_vm5, %v2238_v37, 0.0  ;;  %v833_v40 = vpack.c.bf16 %v2238_v37, %v2238_v37 }
 0x3cb   : > { %826 = vadd.xlane.f32.xlu1 %v825_v39  ;;  %1776 = vmatmul.msk.bf16.vlgmr.msrb.gmra.mxu2 %vm706_vm5, %v832_v38 }
 0x3cc   : > { %1777 = vmatmul.msk.bf16.vlgmr.msrb.gmra.mxu3 %vm706_vm5, %v833_v40  ;;  %1055 = vmatpush.bf16.msra.mxu2 %v2062_v34 }
 0x3d0   : > { %1056 = vmatpush.bf16.msra.mxu2 %v2061_v35 }
 0x3ff   : > { %v797_v41 = vpop.xlane.xlu2 %796 }
 0x400   : > { %v807_v42 = vsub.f32 %v723_v5, %v797_v41 }
 0x402   : > { %v811_v43 = vmul.f32 1.442695, %v807_v42 }
 0x404   : > { %2239 = vpow2.f32 %v811_v43 }
 0x40a   : > { %v2240_v44 = vpop.eup %2239 }
 0x40b   : > { %v819_v45 = vsel %vm706_vm5, %v2240_v44, 0.0  ;;  %v831_v46 = vpack.c.bf16 %v2240_v44, %v2240_v44  ;;  %v2225_v44 = vld [vmem:[%s2941_s7] ss:$0 sm:$0xff] }
 0x40c   : > { %820 = vadd.xlane.f32.xlu2 %v819_v45 }
 0x40d   : > { %1775 = vmatmul.msk.bf16.vlgmr.msrb.gmra.mxu1 %vm706_vm5, %v831_v46 }
 0x418   : > { %v830_v47 = vpop.xlane.xlu2 %829 }
 0x419   : > { %2241 = vrcp.f32 %v830_v47 }
 0x41e   : > { %v824_v55 = vpop.xlane.xlu0 %823 }
 0x41f   : > { %v2242_v48 = vpop.eup %2241  ;;  %2243 = vrcp.f32 %v824_v55 }
 0x425   : > { %v2244_v57 = vpop.eup %2243 }
 0x42d   : > { %v916_v49 = vpop.f32.mrf.mxu0 }
 0x42e   : > { %v927_v50 = vmul.f32 %v2242_v48, %v916_v49 }
 0x430   : > { %v931_v51 = vpack.c.bf16 %v927_v50, %v927_v50  ;;  %v1855_v50 = vld [vmem:[%s2945_s11 + $0x70] sm:$0xf] }
 0x432   : > { %v943_v52 = vunpack.c.l.b16 %v931_v51  ;;  %v2078_v51 = vld [vmem:[%s2945_s11 + $0x74] sm:$0xf0] }
 0x434   : > { %v944_v53 = vpack.c.b16 %v943_v52, %v943_v52  ;;  %v2077_v52 = vld [vmem:[%s2945_s11 + $0x74] sm:$0xf] }
 0x435   : > { %v918_v54 = vpop.f32.mrf.mxu0 }
 0x436   : > { %945 = vrot.lane.b32.xlu2 %v944_v53, %s2466_s27  ;;  %v1856_v53 = vor.u32 %v2078_v51, %v1855_v50  ;;  %v1857_v54 = vld [vmem:[%s2945_s11 + $0x78] sm:$0xf0]  ;;  %v2108_v50 = vld [vmem:[#allocation8 + $0xe4] sm:$0xf0] }
 0x437   : > { %v1860_v55 = vor.u32 %v2077_v52, %v1857_v54  ;;  %v2107_v52 = vld [vmem:[#allocation8 + $0xe4] sm:$0xf]  ;;  %v1919_v54 = vld [vmem:[#allocation8 + $0x70] sm:$0xf] }
 0x438   : > { %1188 = vmatpush.bf16.msra.mxu3 %v1856_v53  ;;  %v1977_v53 = vld [vmem:[#allocation8 + $0xe8] sm:$0xf0] }
 0x439   : > { %1201 = vmatpush.bf16.msrb.mxu0 %v1860_v55 }
 0x43e   : > { %v827_v56 = vpop.xlane.xlu1 %826 }
 0x43f   : > { %2245 = vrcp.f32 %v827_v56  ;;  %v1847_v56 = vld [vmem:[%s2945_s11 + $0x60] sm:$0xf] }
 0x445   : > { %v2246_v59 = vpop.eup %2245 }
 0x44e   : > { %v874_v58 = vpop.f32.mrf.mxu2 }
 0x44f   : > { %v925_v60 = vmul.f32 %v2244_v57, %v874_v58  ;;  %v895_v61 = vpop.f32.mrf.mxu3  ;;  %v2076_v57 = vld [vmem:[%s2945_s11 + $0x64] sm:$0xf0]  ;;  %v2075_v58 = vld [vmem:[%s2945_s11 + $0x64] sm:$0xf] }
 0x450   : > { %v926_v62 = vmul.f32 %v2246_v59, %v895_v61  ;;  %v1848_v59 = vor.u32 %v2076_v57, %v1847_v56  ;;  %v2094_v56 = vld [vmem:[#allocation8 + $0x74] sm:$0xf0]  ;;  %v2093_v57 = vld [vmem:[#allocation8 + $0x74] sm:$0xf] }
 0x451   : > { %v929_v63 = vpack.c.bf16 %v925_v60, %v925_v60  ;;  %v1849_v60 = vld [vmem:[%s2945_s11 + $0x68] sm:$0xf0] }
 0x452   : > { %v930_v1 = vpack.c.bf16 %v926_v62, %v926_v62  ;;  %v1852_v61 = vor.u32 %v2075_v58, %v1849_v60  ;;  %1189 = vmatpush.bf16.msra.mxu3 %v1848_v59  ;;  %v1839_v62 = vld [vmem:[%s2945_s11 + $0x50] sm:$0xf]  ;;  %v1921_v58 = vld [vmem:[#allocation8 + $0x78] sm:$0xf0]  ;;  %v1980_v59 = vor.u32 %v2107_v52, %v1977_v53  ;;  %v1920_v60 = vor.u32 %v2094_v56, %v1919_v54  ;;  %v2099_v52 = vld [vmem:[#allocation8 + $0xa4] sm:$0xf] }
 0x453   : > { %v933_v2 = vunpack.c.l.b16 %v929_v63  ;;  %v2074_v63 = vld [vmem:[%s2945_s11 + $0x54] sm:$0xf0]  ;;  %v1945_v53 = vld [vmem:[#allocation8 + $0xa8] sm:$0xf0] }
 0x454   : > { %v938_v3 = vunpack.c.l.b16 %v930_v1  ;;  %1202 = vmatpush.bf16.msrb.mxu0 %v1852_v61  ;;  %v2073_v1 = vld [vmem:[%s2945_s11 + $0x54] sm:$0xf]  ;;  %v1924_v61 = vor.u32 %v2093_v57, %v1921_v58  ;;  %1416 = vmatpush.bf16.msrb.mxu1 %v1920_v60 }
 0x455   : > { %v934_v4 = vpack.c.b16 %v933_v2, %v933_v2  ;;  %v1840_v2 = vor.u32 %v2074_v63, %v1839_v62  ;;  %v1967_v62 = vld [vmem:[#allocation8 + $0xd0] sm:$0xf]  ;;  %v2106_v63 = vld [vmem:[#allocation8 + $0xd4] sm:$0xf0] }
 0x456   : > { %v939_v5 = vpack.c.b16 %v938_v3, %v938_v3  ;;  %v876_v6 = vpop.f32.mrf.mxu2  ;;  %v1841_v3 = vld [vmem:[%s2945_s11 + $0x58] sm:$0xf0] }
 0x457   : > { %v897_v7 = vpop.f32.mrf.mxu3  ;;  %935 = vrot.lane.b32.xlu0 %v934_v4, %s2467_s19  ;;  %v1844_v4 = vor.u32 %v2073_v1, %v1841_v3  ;;  %1190 = vmatpush.bf16.msra.mxu3 %v1840_v2  ;;  %v2072_v6 = vld [vmem:[%s2945_s11 + $0x44] sm:$0xf0]  ;;  %v2105_v1 = vld [vmem:[#allocation8 + $0xd4] sm:$0xf]  ;;  %v1969_v3 = vld [vmem:[#allocation8 + $0xd8] sm:$0xf0]  ;;  %s2984_s19 = smov %s2983_s24 }
 0x458   : > { %940 = vrot.lane.b32.xlu1 %v939_v5, %s2468_s1  ;;  %v1831_v5 = vld [vmem:[%s2945_s11 + $0x40] sm:$0xf]  ;;  %v2071_v7 = vld [vmem:[%s2945_s11 + $0x44] sm:$0xf]  ;;  %s604_s1 = scalar_lea.vmem [#allocation10], %s1760_s9  ;;  %s2395_s9 = scalar_lea.hbm %s2984_s19, 16 }
 0x459   : > { %1203 = vmatpush.bf16.msrb.mxu0 %v1844_v4  ;;  %v1832_v9 = vor.u32 %v2072_v6, %v1831_v5  ;;  %v1911_v4 = vld [vmem:[#allocation8 + $0x60] sm:$0xf]  ;;  %v2092_v5 = vld [vmem:[#allocation8 + $0x64] sm:$0xf0]  ;;  %s1645_s21 = sshll.u32 %s604_s1, 4  ;;  %p2396_p3 = scmp.lt.s32.totalorder %s2390_s23, %s2984_s19  ;;  %s1646_s21 = int_to_ptr.vmem [resolvable:$true] %s1645_s21 }
 0x45a   : > { %p2397_p4 = scmp.lt.s32.totalorder %s2395_s9, %s2391_s18 }
 0x45b   : > { %1191 = vmatpush.bf16.msra.mxu3 %v1832_v9  ;;  %v2091_v9 = vld [vmem:[#allocation8 + $0x64] sm:$0xf] }
 0x45c   : > { %p2398_p7 = por %p2397_p4, %p2396_p3 }
 0x45e   : > { %p2399_p8 = pnand %p2398_p7, %p2394_p2 }
 0x47f   : > { %v821_v13 = vpop.xlane.xlu2 %820 }
 0x480   : > { %2247 = vrcp.f32 %v821_v13  ;;  %v2070_v13 = vld [vmem:[%s2945_s11 + $0x34] sm:$0xf0] }
 0x486   : > { %v2248_v14 = vpop.eup %2247 }
 0x48a   : > { %v853_v10 = vpop.f32.mrf.mxu1 }
 0x48b   : > { %v924_v15 = vmul.f32 %v2248_v14, %v853_v10  ;;  %v1833_v10 = vld [vmem:[%s2945_s11 + $0x48] sm:$0xf0]  ;;  %v2069_v14 = vld [vmem:[%s2945_s11 + $0x34] sm:$0xf] }
 0x48d   : > { %v928_v16 = vpack.c.bf16 %v924_v15, %v924_v15  ;;  %v1824_v15 = vor.u32 %v2070_v13, %v1823_v12  ;;  %v1959_v13 = vld [vmem:[#allocation8 + $0xc0] sm:$0xf] }
 0x48f   : > { %1192 = vmatpush.bf16.msra.mxu3 %v1824_v15  ;;  %v2103_v15 = vld [vmem:[#allocation8 + $0xc4] sm:$0xf] }
 0x490   : > { %v946_v20 = vpop.permute.xlu2 %945 }
 0x492   : > { %v855_v11 = vpop.f32.mrf.mxu1 }
 0x493   : > { %v1836_v11 = vor.u32 %v2071_v7, %v1833_v10  ;;  %v1912_v7 = vor.u32 %v2092_v5, %v1911_v4  ;;  %v1913_v10 = vld [vmem:[#allocation8 + $0x68] sm:$0xf0] }
 0x494   : > { %v1916_v12 = vor.u32 %v2091_v9, %v1913_v10  ;;  %v2097_v9 = vld [vmem:[#allocation8 + $0x94] sm:$0xf] }
 0x495   : > { %1204 = vmatpush.bf16.msrb.mxu0 %v1836_v11  ;;  %v1968_v11 = vor.u32 %v2106_v63, %v1967_v62  ;;  %1417 = vmatpush.bf16.msrb.mxu1 %v1912_v7  ;;  %v2098_v7 = vld [vmem:[#allocation8 + $0x94] sm:$0xf0] }
 0x4c9   : > { %v936_v17 = vpop.permute.xlu0 %935 }
 0x4ca   : > { %v949_v18 = vsel %vm706_vm5, %v928_v16, %v936_v17  ;;  %v941_v19 = vpop.permute.xlu1 %940  ;;  %v1825_v16 = vld [vmem:[%s2945_s11 + $0x38] sm:$0xf0] }
 0x4cb   : > { %v952_v21 = vsel %vm950_vm8, %v949_v18, %v941_v19  ;;  %v1828_v17 = vor.u32 %v2069_v14, %v1825_v16  ;;  %v2227_v18 = vld [vmem:[#allocation7] ss:$0 sm:$0xff]  ;;  %v2104_v14 = vld [vmem:[#allocation8 + $0xc4] sm:$0xf0] }
 0x4cc   : > { %v955_v22 = vsel %vm953_vm9, %v952_v21, %v946_v20  ;;  %v1815_v19 = vld [vmem:[%s2945_s11 + $0x20] sm:$0xf]  ;;  %v2068_v20 = vld [vmem:[%s2945_s11 + $0x24] sm:$0xf0]  ;;  %v2067_v21 = vld [vmem:[%s2945_s11 + $0x24] sm:$0xf] }
 0x4cd   : > { %1787 = vmatmul.msk.bf16.vlgmr.msra.gmra.mxu1 %vm613_vm0, %v955_v22  ;;  %1205 = vmatpush.bf16.msrb.mxu0 %v1828_v17  ;;  %v1816_v22 = vor.u32 %v2068_v20, %v1815_v19  ;;  %v1972_v17 = vor.u32 %v2105_v1, %v1969_v3  ;;  %v1903_v19 = vld [vmem:[#allocation8 + $0x50] sm:$0xf] }
 0x4cf   : > { %1193 = vmatpush.bf16.msra.mxu3 %v1816_v22  ;;  %v2089_v22 = vld [vmem:[#allocation8 + $0x54] sm:$0xf] }
 0x54a   : > { %v983_v24 = vpop.f32.mrf.mxu1 }
 0x54b   : > { %v987_v25 = vadd.f32 %v983_v24, %v2659_v0 }
 0x54d   : > { %v2715_v26 = vadd.f32 %v2224_v23, %v987_v25  ;;  %v1817_v23 = vld [vmem:[%s2945_s11 + $0x28] sm:$0xf0] }
 0x54e   : > { %v1820_v25 = vor.u32 %v2067_v21, %v1817_v23  ;;  %v2090_v21 = vld [vmem:[#allocation8 + $0x54] sm:$0xf0]  ;;  %v1905_v23 = vld [vmem:[#allocation8 + $0x58] sm:$0xf0] }
 0x54f   : > { %v995_v27 = vsel %vm613_vm0, %v2715_v26, 0.0 }
 0x550   : > { %996 = vadd.xlane.f32.xlu0 %v995_v27  ;;  %1206 = vmatpush.bf16.msrb.mxu0 %v1820_v25  ;;  %v1904_v25 = vor.u32 %v2090_v21, %v1903_v19 }
 0x552   : > { %v985_v28 = vpop.f32.mrf.mxu1  ;;  %1418 = vmatpush.bf16.msrb.mxu1 %v1904_v25 }
 0x553   : > { %v1807_v28 = vld [vmem:[%s2945_s11 + $0x10] sm:$0xf] }
 0x5c3   : > { %v997_v29 = vpop.xlane.xlu0 %996 }
 0x5c4   : > { %v998_v30 = vmul.f32 %v997_v29, %v2663_v8  ;;  %v2066_v29 = vld [vmem:[%s2945_s11 + $0x14] sm:$0xf0] }
 0x5c6   : > { %v999_v31 = vsub.f32 %v2715_v26, %v998_v30  ;;  %v2065_v30 = vld [vmem:[%s2945_s11 + $0x14] sm:$0xf] }
 0x5c8   : > { %v1000_v32 = vmul.f32 %v999_v31, %v999_v31 }
 0x5ca   : > { %v1001_v33 = vsel %vm613_vm0, %v1000_v32, 0.0  ;;  %v1808_v32 = vor.u32 %v2066_v29, %v1807_v28  ;;  %v1908_v28 = vor.u32 %v2089_v22, %v1905_v23  ;;  %v1951_v29 = vld [vmem:[#allocation8 + $0xb0] sm:$0xf]  ;;  %v2082_v23 = vld [vmem:[#allocation8 + $0x14] sm:$0xf0] }
 0x5cb   : > { %1002 = vadd.xlane.f32.xlu1 %v1001_v33  ;;  %v1809_v33 = vld [vmem:[%s2945_s11 + $0x18] sm:$0xf0]  ;;  %v1871_v22 = vld [vmem:[#allocation8 + $0x10] sm:$0xf] }
 0x5cc   : > { %v1812_v34 = vor.u32 %v2065_v30, %v1809_v33  ;;  %1194 = vmatpush.bf16.msra.mxu3 %v1808_v32  ;;  %v1960_v30 = vor.u32 %v2104_v14, %v1959_v13  ;;  %v1895_v32 = vld [vmem:[#allocation8 + $0x40] sm:$0xf]  ;;  %v2088_v33 = vld [vmem:[#allocation8 + $0x44] sm:$0xf0]  ;;  %v2083_v14 = vld [vmem:[#allocation8 + $0x24] sm:$0xf]  ;;  %v1872_v25 = vor.u32 %v2082_v23, %v1871_v22 }
 0x5cd   : > { %v2084_v13 = vld [vmem:[#allocation8 + $0x24] sm:$0xf0] }
 0x5ce   : > { %1207 = vmatpush.bf16.msrb.mxu0 %v1812_v34 }
 0x63e   : > { %v1003_v0 = vpop.xlane.xlu1 %1002 }
 0x63f   : > { %v1004_v36 = vmul.f32 %v1003_v0, %v2663_v8  ;;  %v2226_v8 = vld [vmem:[%s2942_s8] ss:$0 sm:$0xff] }
 0x640   : > { %v1799_v0 = vld [vmem:[%s2945_s11] sm:$0xf] }
 0x641   : > { %v1005_v37 = vadd.f32 1e-05, %v1004_v36  ;;  %v2064_v36 = vld [vmem:[%s2945_s11 + $0x4] sm:$0xf0] }
 0x643   : > { %2249 = vrsqrt.f32 %v1005_v37  ;;  %vm1012_vm11 = vweird.f32 %v1005_v37 }
 0x649   : > { %v2250_v38 = vpop.eup %2249 }
 0x64a   : > { %v1007_v39 = vmul.f32 %v2250_v38, %v1005_v37  ;;  %vm1013_vm10 = vweird.f32 %v2250_v38  ;;  %v2063_v37 = vld [vmem:[%s2945_s11 + $0x4] sm:$0xf] }
 0x64b   : > { %vm1014_vm12 = vmor %vm1012_vm11, %vm1013_vm10 }
 0x64c   : > { %v1008_v40 = vmul.f32 %v2250_v38, %v1007_v39  ;;  %v1800_v39 = vor.u32 %v2064_v36, %v1799_v0  ;;  %v2087_v36 = vld [vmem:[#allocation8 + $0x44] sm:$0xf] }
 0x64e   : > { %v1009_v41 = vmul.f32 0.5, %v1008_v40  ;;  %1195 = vmatpush.bf16.msra.mxu3 %v1800_v39  ;;  %v2101_v39 = vld [vmem:[#allocation8 + $0xb4] sm:$0xf] }
 0x650   : > { %v1010_v42 = vsub.f32 1.5, %v1009_v41  ;;  %v1801_v41 = vld [vmem:[%s2945_s11 + $0x8] sm:$0xf0] }
 0x652   : > { %v1011_v43 = vmul.f32 %v2250_v38, %v1010_v42  ;;  %1442 = vmatpush.bf16.msrb.mxu3 %v1924_v61 }
 0x654   : > { %v1015_v45 = vsel %vm1014_vm12, %v2250_v38, %v1011_v43  ;;  %v1804_v43 = vor.u32 %v2063_v37, %v1801_v41  ;;  %v1897_v37 = vld [vmem:[#allocation8 + $0x48] sm:$0xf0] }
 0x655   : > { %v1016_v46 = vmul.f32 %v1015_v45, %v999_v31  ;;  %v1983_v45 = vld [vmem:[#allocation8 + $0xf0] sm:$0xf] }
 0x656   : > { %1208 = vmatpush.bf16.msrb.mxu0 %v1804_v43  ;;  %1443 = vmatpush.bf16.msrb.mxu3 %v1916_v12  ;;  %v1900_v43 = vor.u32 %v2087_v36, %v1897_v37  ;;  %v1879_v12 = vld [vmem:[#allocation8 + $0x20] sm:$0xf]  ;;  %v2118_v36 = vld [vmem:[%s2949_s15 + $0x38] sm:$0xff] }
 0x657   : > { %v1020_v47 = vmul.f32 %v2225_v44, %v1016_v46  ;;  %v2110_v46 = vld [vmem:[#allocation8 + $0xf4] sm:$0xf0] }
 0x658   : > { %v2126_v37 = vld [vmem:[%s2949_s15 + $0x78] sm:$0xff] }
 0x659   : > { %v1024_v48 = vadd.f32 %v2226_v8, %v1020_v47  ;;  %v2109_v8 = vld [vmem:[#allocation8 + $0xf4] sm:$0xf]  ;;  %v1984_v47 = vor.u32 %v2110_v46, %v1983_v45  ;;  %v2086_v46 = vld [vmem:[#allocation8 + $0x34] sm:$0xf0] }
 0x65a   : > { %1444 = vmatpush.bf16.msrb.mxu3 %v1908_v28  ;;  %v1873_v28 = vld [vmem:[#allocation8 + $0x18] sm:$0xf0] }
 0x65b   : > { %v1025_v49 = vpack.c.bf16 %v1024_v48, %v1024_v48  ;;  %v1985_v48 = vld [vmem:[#allocation8 + $0xf8] sm:$0xf0]  ;;  %1429 = vmatpush.bf16.msrb.mxu2 %v1984_v47 }
 0x65c   : > { %v1988_v51 = vor.u32 %v2109_v8, %v1985_v48  ;;  %v2085_v8 = vld [vmem:[#allocation8 + $0x34] sm:$0xf]  ;;  %v1889_v47 = vld [vmem:[#allocation8 + $0x38] sm:$0xf0] }
 0x65d   : > { %1796 = vmatmul.msk.bf16.vlgmr.msra.gmra.mxu2 %vm613_vm0, %v1025_v49  ;;  %v1975_v49 = vld [vmem:[#allocation8 + $0xe0] sm:$0xf]  ;;  %v1892_v56 = vor.u32 %v2085_v8, %v1889_v47 }
 0x65e   : > { %v1976_v55 = vor.u32 %v2108_v50, %v1975_v49  ;;  %1455 = vmatpush.bf16.msra.mxu0 %v1988_v51  ;;  %v1943_v50 = vld [vmem:[#allocation8 + $0xa0] sm:$0xf]  ;;  %v2100_v51 = vld [vmem:[#allocation8 + $0xa4] sm:$0xf0]  ;;  %1445 = vmatpush.bf16.msrb.mxu3 %v1900_v43  ;;  %v1102_v43 = vld [vmem:[%s2946_s12] sm:$0x3] }
 0x65f   : > { %v1944_v57 = vor.u32 %v2100_v51, %v1943_v50  ;;  %v1104_v47 = vperm.slane %v1102_v43, 0 }
 0x660   : > { %1430 = vmatpush.bf16.msrb.mxu2 %v1976_v55 }
 0x662   : > { %1456 = vmatpush.bf16.msra.mxu0 %v1980_v59  ;;  %v1948_v59 = vor.u32 %v2099_v52, %v1945_v53  ;;  %1446 = vmatpush.bf16.msrb.mxu3 %v1892_v56  ;;  %v2123_v56 = vld [vmem:[%s2949_s15 + $0x60] sm:$0xff] }
 0x664   : > { %1431 = vmatpush.bf16.msrb.mxu2 %v1968_v11 }
 0x666   : > { %1457 = vmatpush.bf16.msra.mxu0 %v1972_v17  ;;  %v2096_v17 = vld [vmem:[#allocation8 + $0x84] sm:$0xf0] }
 0x668   : > { %1432 = vmatpush.bf16.msrb.mxu2 %v1960_v30  ;;  %v1863_v30 = vld [vmem:[#allocation8] sm:$0xf] }
 0x6e0   : > { %v1058_v24 = vpop.f32.mrf.mxu2 }
 0x6e1   : > { %v2802_v27 = vadd.f32 %v2227_v18, %v1058_v24  ;;  %v1961_v18 = vld [vmem:[#allocation8 + $0xc8] sm:$0xf0] }
 0x6e2   : > { %v1964_v0 = vor.u32 %v2103_v15, %v1961_v18  ;;  %v1881_v15 = vld [vmem:[#allocation8 + $0x28] sm:$0xf0]  ;;  %v2095_v18 = vld [vmem:[#allocation8 + $0x84] sm:$0xf] }
 0x6e3   : > { %v1062_v31 = vand.u32 2147483647, %v2802_v27  ;;  %v1076_v1 = vmax.f32 %v2802_v27, 0.0  ;;  %v1927_v27 = vld [vmem:[#allocation8 + $0x80] sm:$0xf] }
 0x6e4   : > { %1458 = vmatpush.bf16.msra.mxu0 %v1964_v0  ;;  %v1928_v19 = vor.u32 %v2096_v17, %v1927_v27 }
 0x6e5   : > { %v2817_v35 = vmul.f32 0.70710677, %v1062_v31  ;;  %v2102_v31 = vld [vmem:[#allocation8 + $0xb4] sm:$0xf0] }
 0x6e6   : > { %v1952_v45 = vor.u32 %v2102_v31, %v1951_v29  ;;  %v2080_v31 = vld [vmem:[#allocation8 + $0x4] sm:$0xf0] }
 0x6e7   : > { %v1064_v38 = vmul.f32 0.3275911, %v2817_v35  ;;  %v1078_v44 = vsub.f32 0.0, %v2817_v35  ;;  %v1077_v62 = vmul.f32 0.70710677, %v2817_v35 }
 0x6e8   : > { %v1060_v40 = vpop.f32.mrf.mxu2  ;;  %1433 = vmatpush.bf16.msrb.mxu2 %v1952_v45 }
 0x6e9   : > { %v1065_v42 = vadd.f32 1.0, %v1064_v38  ;;  %v1079_v20 = vmul.f32 %v1078_v44, %v2817_v35  ;;  %v1953_v40 = vld [vmem:[#allocation8 + $0xb8] sm:$0xf0]  ;;  %v1887_v44 = vld [vmem:[#allocation8 + $0x30] sm:$0xf]  ;;  %v1880_v35 = vor.u32 %v2084_v13, %v1879_v12 }
 0x6ea   : > { %v1956_v49 = vor.u32 %v2101_v39, %v1953_v40  ;;  %v1888_v55 = vor.u32 %v2086_v46, %v1887_v44  ;;  %v2125_v39 = vld [vmem:[%s2949_s15 + $0x70] sm:$0xff]  ;;  %v2116_v40 = vld [vmem:[%s2949_s15 + $0x28] sm:$0xff]  ;;  %v1105_v44 = vperm.slane %v1102_v43, 1 }
 0x6eb   : > { %2251 = vrcp.f32 %v1065_v42  ;;  %v1080_v38 = vmul.f32 1.442695, %v1079_v20  ;;  %v1896_v42 = vor.u32 %v2088_v33, %v1895_v32  ;;  %v1929_v20 = vld [vmem:[#allocation8 + $0x88] sm:$0xf0]  ;;  %v2079_v32 = vld [vmem:[#allocation8 + $0x4] sm:$0xf]  ;;  %v1864_v33 = vor.u32 %v2080_v31, %v1863_v30 }
 0x6ec   : > { %1459 = vmatpush.bf16.msra.mxu0 %v1956_v49  ;;  %1434 = vmatpush.bf16.msrb.mxu2 %v1944_v57  ;;  %v1932_v21 = vor.u32 %v2095_v18, %v1929_v20  ;;  %v2113_v57 = vld [vmem:[%s2949_s15 + $0x10] sm:$0xff]  ;;  %v2228_v20 = vld [vmem:[%s2982_s5] ss:$0 sm:$0xff] }
 0x6ed   : > { %2253 = vpow2.f32 %v1080_v38  ;;  %1419 = vmatpush.bf16.msrb.mxu1 %v1896_v42  ;;  %v2117_v38 = vld [vmem:[%s2949_s15 + $0x30] sm:$0xff]  ;;  %v2115_v42 = vld [vmem:[%s2949_s15 + $0x20] sm:$0xff] }
 0x6f0   : > { %1460 = vmatpush.bf16.msra.mxu0 %v1948_v59  ;;  %v2112_v59 = vld [vmem:[%s2949_s15 + $0x8] sm:$0xff] }
 0x6f1   : > { %v2833_v2 = vpop.eup %2251  ;;  %1420 = vmatpush.bf16.msrb.mxu1 %v1888_v55  ;;  %v2114_v55 = vld [vmem:[%s2949_s15 + $0x18] sm:$0xff] }
 0x6f2   : > { %v1067_v6 = vmul.f32 1.0614054, %v2833_v2 }
 0x6f3   : > { %v2254_v61 = vpop.eup %2253 }
 0x6f4   : > { %v1068_v16 = vadd.f32 -1.4531521, %v1067_v6  ;;  %v1935_v6 = vld [vmem:[#allocation8 + $0x90] sm:$0xf] }
 0x6f5   : > { %v1936_v10 = vor.u32 %v2098_v7, %v1935_v6  ;;  %1421 = vmatpush.bf16.msrb.mxu1 %v1880_v35 }
 0x6f6   : > { %v1069_v24 = vmul.f32 %v2833_v2, %v1068_v16  ;;  %v1884_v16 = vor.u32 %v2083_v14, %v1881_v15 }
 0x6f7   : > { %1435 = vmatpush.bf16.msrb.mxu2 %v1936_v10 }
 0x6f8   : > { %v1070_v34 = vadd.f32 1.4214138, %v1069_v24  ;;  %1447 = vmatpush.bf16.msrb.mxu3 %v1884_v16  ;;  %v2081_v24 = vld [vmem:[#allocation8 + $0x14] sm:$0xf] }
 0x6f9   : > { %v1876_v29 = vor.u32 %v2081_v24, %v1873_v28  ;;  %1422 = vmatpush.bf16.msrb.mxu1 %v1872_v25 }
 0x6fa   : > { %v1071_v41 = vmul.f32 %v2833_v2, %v1070_v34  ;;  %v1865_v34 = vld [vmem:[#allocation8 + $0x8] sm:$0xf0] }
 0x6fb   : > { %1436 = vmatpush.bf16.msrb.mxu2 %v1928_v19  ;;  %v1868_v0 = vor.u32 %v2079_v32, %v1865_v34 }
 0x6fc   : > { %v1072_v48 = vadd.f32 -0.28449672, %v1071_v41  ;;  %1448 = vmatpush.bf16.msrb.mxu3 %v1876_v29  ;;  %v2124_v41 = vld [vmem:[%s2949_s15 + $0x68] sm:$0xff] }
 0x6fd   : > { %1423 = vmatpush.bf16.msrb.mxu1 %v1864_v33 }
 0x6fe   : > { %v1073_v54 = vmul.f32 %v2833_v2, %v1072_v48 }
 0x6ff   : > { %1617 = vmatpush.bf16.msra.mxu2 %v2126_v37 }
 0x700   : > { %v1074_v58 = vadd.f32 0.2548296, %v1073_v54  ;;  %1449 = vmatpush.bf16.msrb.mxu3 %v1868_v0 }
 0x701   : > { %1604 = vmatpush.bf16.msra.mxu1 %v2118_v36 }
 0x702   : > { %v1075_v60 = vmul.f32 %v2833_v2, %v1074_v58  ;;  %v1937_v2 = vld [vmem:[#allocation8 + $0x98] sm:$0xf0] }
 0x703   : > { %v1940_v11 = vor.u32 %v2097_v9, %v1937_v2  ;;  %1618 = vmatpush.bf16.msra.mxu2 %v2125_v39  ;;  %v2122_v58 = vld [vmem:[%s2949_s15 + $0x58] sm:$0xff] }
 0x704   : > { %v1082_v63 = vmul.f32 %v2254_v61, %v1075_v60  ;;  %v2121_v60 = vld [vmem:[%s2949_s15 + $0x50] sm:$0xff]  ;;  %v2111_v61 = vld [vmem:[%s2949_s15] sm:$0xff] }
 0x705   : > { %1461 = vmatpush.bf16.msra.mxu0 %v1940_v11  ;;  %1605 = vmatpush.bf16.msra.mxu1 %v2117_v38 }
 0x706   : > { %v1083_v3 = vmul.f32 %v1082_v63, %v1077_v62  ;;  %v2120_v62 = vld [vmem:[%s2949_s15 + $0x48] sm:$0xff]  ;;  %v2119_v63 = vld [vmem:[%s2949_s15 + $0x40] sm:$0xff] }
 0x707   : > { %1619 = vmatpush.bf16.msra.mxu2 %v2124_v41 }
 0x708   : > { %v1084_v4 = vsub.f32 %v1076_v1, %v1083_v3  ;;  %v1250_v3 = vld [vmem:[%s2948_s14] sm:$0x3] }
 0x709   : > { %1462 = vmatpush.bf16.msra.mxu0 %v1932_v21  ;;  %1606 = vmatpush.bf16.msra.mxu1 %v2116_v40  ;;  %v1253_v2 = vperm.slane %v1250_v3, 1 }
 0x70a   : > { %v1085_v5 = vpack.c.bf16 %v1084_v4, %v1084_v4  ;;  %v1252_v4 = vperm.slane %v1250_v3, 0 }
 0x70b   : > { %1620 = vmatpush.bf16.msra.mxu2 %v2123_v56 }
 0x70c   : > { %1196 = vmatmul.bf16.vlgmr.msra.gmra.mxu3 %v1085_v5  ;;  %1209 = vmatmul.bf16.vlgmr.msrb.gmra.mxu0 %v1085_v5 }
 0x70d   : > { %1607 = vmatpush.bf16.msra.mxu1 %v2115_v42 }
 0x70f   : > { %1621 = vmatpush.bf16.msra.mxu2 %v2122_v58 }
 0x711   : > { %1608 = vmatpush.bf16.msra.mxu1 %v2114_v55 }
 0x713   : > { %1622 = vmatpush.bf16.msra.mxu2 %v2121_v60 }
 0x715   : > { %1609 = vmatpush.bf16.msra.mxu1 %v2113_v57 }
 0x717   : > { %1623 = vmatpush.bf16.msra.mxu2 %v2120_v62 }
 0x719   : > { %1610 = vmatpush.bf16.msra.mxu1 %v2112_v59 }
 0x71b   : > { %1624 = vmatpush.bf16.msra.mxu2 %v2119_v63 }
 0x71d   : > { %1611 = vmatpush.bf16.msra.mxu1 %v2111_v61 }
 0x789   : > { %v1210_v45 = vpop.f32.mrf.mxu0 }
 0x78a   : > { %v1211_v46 = vadd.f32 %v1210_v45, %v1105_v44 }
 0x78c   : > { %v1215_v8 = vmax.f32 %v1211_v46, 0.0 }
 0x78e   : > { %v1217_v48 = vpack.c.bf16 %v1215_v8, %v1215_v8 }
 0x78f   : > { %v1197_v49 = vpop.f32.mrf.mxu3 }
 0x790   : > { %v1198_v50 = vadd.f32 %v1197_v49, %v1104_v47  ;;  %1437 = vmatmul.bf16.vlgmr.msrb.gmra.mxu2 %v1217_v48  ;;  %1463 = vmatmul.bf16.vlgmr.msra.gmra.mxu0 %v1217_v48 }
 0x791   : > { %v1212_v51 = vpop.f32.mrf.mxu0 }
 0x792   : > { %v1214_v52 = vmax.f32 %v1198_v50, 0.0 }
 0x794   : > { %v1216_v53 = vpack.c.bf16 %v1214_v52, %v1214_v52 }
 0x796   : > { %1424 = vmatmul.bf16.vlgmr.msrb.gmra.mxu1 %v1216_v53  ;;  %1450 = vmatmul.bf16.vlgmr.msrb.gmra.mxu3 %v1216_v53 }
 0x797   : > { %v1199_v54 = vpop.f32.mrf.mxu3 }
 0x80d   : > { %v1464_v1 = vpop.f32.mrf.mxu0 }
 0x813   : > { %v1425_v5 = vpop.f32.mrf.mxu1  ;;  %v1438_v6 = vpop.f32.mrf.mxu2 }
 0x814   : > { %v1426_v7 = vadd.f32 %v1425_v5, %v1252_v4 }
 0x815   : > { %v1466_v9 = vpop.f32.mrf.mxu0 }
 0x816   : > { %v1439_v10 = vadd.f32 %v1438_v6, %v1426_v7 }
 0x818   : > { %v1468_v11 = vmax.f32 %v1439_v10, 0.0 }
 0x819   : > { %v1451_v12 = vpop.f32.mrf.mxu3 }
 0x81a   : > { %v1470_v13 = vpack.c.bf16 %v1468_v11, %v1468_v11  ;;  %v1452_v14 = vadd.f32 %v1451_v12, %v1253_v2 }
 0x81b   : > { %v1427_v35 = vpop.f32.mrf.mxu1  ;;  %v1440_v15 = vpop.f32.mrf.mxu2 }
 0x81c   : > { %v1465_v16 = vadd.f32 %v1464_v1, %v1452_v14  ;;  %1612 = vmatmul.bf16.vlgmr.msra.gmra.mxu1 %v1470_v13 }
 0x81e   : > { %v1469_v27 = vmax.f32 %v1465_v16, 0.0 }
 0x820   : > { %v1471_v17 = vpack.c.bf16 %v1469_v27, %v1469_v27 }
 0x821   : > { %v1453_v18 = vpop.f32.mrf.mxu3 }
 0x822   : > { %1625 = vmatmul.bf16.vlgmr.msra.gmra.mxu2 %v1471_v17 }
 0x899   : > { %v1613_v19 = vpop.f32.mrf.mxu1 }
 0x89a   : > { %v1614_v22 = vadd.f32 %v2228_v20, %v1613_v19 }
 0x8a1   : > { %v1615_v21 = vpop.f32.mrf.mxu1 }
 0x8a5   : > { %v1626_v23 = vpop.f32.mrf.mxu2 }
 0x8a6   : > { %v1627_v24 = vadd.f32 %v1626_v23, %v1614_v22 }
 0x8a8   : > { %v1630_v25 = vadd.f32 %v1627_v24, %v2715_v26 }
 0x8aa   : > { %1631 = vst.msk [vmem:[%s604_s1] sm:$0xff] %vm613_vm0, %v1630_v25 }
 0x8ab   : > { %2402 = shalt.err (!%p2399_p8)
}
 0x8ac   : > { %2143 = dma.vmem_to_hbm [thread:$0]  (%p2597_p5), %s1646_s21, 128, %s1648_s22, %s1633_s28  }
 0x8ad   : > { %v1628_v26 = vpop.f32.mrf.mxu2 }
 0x8ae PF: > { %s2986_s0 = sld [smem:[#allocation17_spill]] }
 0x8af   : > { %s2987_s16 = sld [smem:[#allocation15_spill]] }
 0x8b4   : > { %p2170_p9 = scmp.ge.s32.totalorder %s2986_s0, 2 }
 0x8b5   : > { %s1659_s24 = sand.u32 1, %s2987_s16  }
 0x8b6   : > { %p2159_p10 = pnand %p2170_p9, %p2601_p6  ;;  %s1660_s26 = scalar_lea.sflag [#allocation4], %s1659_s24 }
 0x8b8   : > { %p2160_p11 = pneg %p2159_p10 }
 0x8ba   : > { %2432 = dma.done.wait (%p2160_p11), %s1660_s26, 128  }
 0x8bb   : > { %2434 = vsyncadd (%p2160_p11), %s1660_s26, 4294967168  ;;  %s2989_s27 = sld [smem:[#allocation18_spill]]  ;;  %s2992_s24 = smov %s2441_s25 }
 0x8bc   : > { %s2990_s1 = sld [smem:[#allocation16_spill]] }
 0x8bd   : > { %s2991_s26 = sld [smem:[#allocation19_spill]] }
 0x8c1   : > { %p30_p12 = scmp.ge.s32.totalorder %s2989_s27, 4  }
 0x8c2   : > { %s2993_s25 = smov %s2990_s1 }
 0x8c3   :  { %32 = sbr.rel (!%p30_p12) target bundleno = 13 (0xd), region = 140 }
 0x8c8   :  { %1666 = vsyncpa [#allocation3], 1 }
 0x8c9   :  { %1668 = vsyncpa [#allocation3 + $0x1], 1 }
 0x8ca   :  { %1669 = vsyncpa [#allocation6], 1 }
 0x8cb   :  { %1670 = vsyncpa [#allocation9], 1 }
 0x8cc   :  { %1671 = vsyncpa [#allocation4], 1 }
 0x8cd   :  { %1673 = vsyncpa [#allocation4 + $0x1], 1 }

// kernel: tpu_custom_call.1
= control target key start
LH: loop header
LB: loop body
LE: loop exit
PB: predicated region body
PF: predicated region fallthrough
CT: control target
= control target key end

     0   :  { %s2934_s0 = inlined_call_operand.vmem [shape: f32[16,32], index: 0, kind: input, shape index: {}]   ;;  %s2935_s1 = inlined_call_operand.vmem [shape: f32[1,32], index: 1, kind: input, shape index: {}]   ;;  %s2936_s2 = inlined_call_operand.vmem [shape: f32[1,32], index: 2, kind: input, shape index: {}]   ;;  %s2937_s3 = inlined_call_operand.vmem [shape: bf16[32,96], index: 3, kind: input, shape index: {}]   ;;  %s2938_s4 = inlined_call_operand.vmem [shape: f32[1,96], index: 4, kind: input, shape index: {}]   ;;  %s2939_s5 = inlined_call_operand.hbm [shape: bf16[32,32], index: 5, kind: input, shape index: {}]   ;;  %s2940_s6 = inlined_call_operand.vmem [shape: f32[1,32], index: 6, kind: input, shape index: {}]   ;;  %s2941_s7 = inlined_call_operand.vmem [shape: f32[1,32], index: 7, kind: input, shape index: {}]   ;;  %s2942_s8 = inlined_call_operand.vmem [shape: f32[1,32], index: 8, kind: input, shape index: {}]   ;;  %s2943_s9 = inlined_call_operand.hbm [shape: bf16[32,128], index: 9, kind: input, shape index: {}]   ;;  %s2944_s10 = inlined_call_operand.hbm [shape: f32[1,128], index: 10, kind: input, shape index: {}]   ;;  %s2945_s11 = inlined_call_operand.vmem [shape: bf16[128,256], index: 11, kind: input, shape index: {}]   ;;  %s2946_s12 = inlined_call_operand.vmem [shape: f32[1,256], index: 12, kind: input, shape index: {}]   ;;  %s2947_s13 = inlined_call_operand.hbm [shape: bf16[256,256], index: 13, kind: input, shape index: {}]   ;;  %s2948_s14 = inlined_call_operand.vmem [shape: f32[1,256], index: 14, kind: input, shape index: {}]   ;;  %s2949_s15 = inlined_call_operand.vmem [shape: bf16[256,32], index: 15, kind: input, shape index: {}]   ;;  %s2950_s16 = inlined_call_operand.vmem [shape: f32[1,32], index: 16, kind: input, shape index: {}]   ;;  %s2951_s17 = inlined_call_operand.hbm [shape: f32[16,32], index: 17, kind: output, shape index: {}]  }
   0x1   :  { %2961 = sst [smem:[#allocation22_spill]] %s2934_s0 }
   0x2   :  { %2962 = sst [smem:[#allocation23_spill]] %s2935_s1 }
   0x3   :  { %2963 = sst [smem:[#allocation24_spill]] %s2939_s5 }
   0x4   :  { %2964 = sst [smem:[#allocation25_spill]] %s2943_s9 }
   0x5   :  { %2965 = sst [smem:[#allocation26_spill]] %s2950_s16 }
   0x6   :  { %2966 = sst [smem:[#allocation27_spill]] %s2951_s17 }
   0x7   :  { %22 = vsyncpa [#allocation3], 0 }
   0x8   :  { %23 = vsyncpa [#allocation6], 0 }
   0x9   :  { %24 = vsyncpa [#allocation9], 0 }
   0xa   :  { %25 = vsyncpa [#allocation4], 0 }
   0xb   :  { %27 = vsyncpa [#allocation4 + $0x1], 0  ;;  %s2559_s24 = smov 0   ;;  %s2561_s25 = smov 0  }
   0xc   :  { %s2563_s26 = smov 0   ;;  %s2565_s27 = smov 0  }
   0xd LB: > { %2967 = sst [smem:[#allocation15_spill]] %s2437_s24  ;;  %s2580_s28 = sadd.s32 4294967295, %s2449_s27   ;;  %s2449_s27 = sphi %s2565_s27, %s2989_s27   ;;  %s2445_s26 = sphi %s2563_s26, %s2991_s26   ;;  %s2441_s25 = sphi %s2561_s25, %s2993_s25   ;;  %s2437_s24 = sphi %s2559_s24, %s2992_s24  }
   0xe   : > { %2968 = sst [smem:[#allocation16_spill]] %s2445_s26  ;;  %s1748_s29 = sadd.s32 4294967294, %s2449_s27  }
   0xf   : > { %2969 = sst [smem:[#allocation17_spill]] %s2449_s27  ;;  %s2584_s0 = sadd.s32 1, %s2449_s27  }
  0x10   : > { %2970 = sst [smem:[#allocation18_spill]] %s2584_s0  ;;  %s402_s30 = sadd.s32 1, %s2445_s26 }
  0x11   : > { %s399_s18 = ssub.s32 %s2449_s27, %s2584_s0  ;;  %p412_p0 = scmp.ne.s32.totalorder %s2445_s26, %s2441_s25 }
  0x12   : > { %p400_p1 = scmp.eq.s32.totalorder %s399_s18, 0  ;;  %p413_p2 = scmp.eq.s32.totalorder %s2580_s28, 1 }
  0x13   : > { %p418_p3 = scmp.ne.s32.totalorder %s2441_s25, %s2437_s24  ;;  %p419_p4 = scmp.eq.s32.totalorder %s1748_s29, 1 }
  0x14   : > { %s2595_s19 = scalar_select %p400_p1, %s2445_s26, %s402_s30  }
  0x15   : > { %p2597_p5 = por %p413_p2, %p412_p0  ;;  %p2601_p6 = por %p419_p4, %p418_p3 }
  0x16   : > { %2971 = sst [smem:[#allocation19_spill]] %s2595_s19  ;;  %p1749_p7 = scmp.ge.s32.totalorder %s2449_s27, 1 }
  0x17   : > { %s2972_s1 = scalar_select %p2597_p5, 1, 0 }
  0x18   : > { %s2974_s20 = scalar_select %p2601_p6, 1, 0 }
  0x19   : > { %2973 = sst [smem:[#allocation20_spill]] %s2972_s1  ;;  %p426_p8 = scmp.lt.s32.totalorder %s2449_s27, 3 }
  0x1a   : > { %2975 = sst [smem:[#allocation21_spill]] %s2974_s20  ;;  %p2162_p9 = scmp.eq.s32.totalorder %s2580_s28, 0 }
  0x1b   : > { %p2608_p10 = pnand %p1749_p7, %p426_p8  ;;  %s2977_s9 = sld [smem:[#allocation25_spill]] }
  0x1c   : > { %s2978_s5 = sld [smem:[#allocation24_spill]]  ;;  %s2451_s0 = smov [#allocation5]  }
  0x1d   : > { %p2145_p11 = pneg %p2608_p10  ;;  %s474_s20 = sshll.u32 %s2451_s0, 4  ;;  %s475_s20 = int_to_ptr.vmem [resolvable:$true] %s474_s20 }
  0x1e   : > { %s2452_s22 = smov 64   ;;  %s2453_s23 = smov 4  }
  0x1f   : > { %p2622_p12 = pnand %p2162_p9, %p2145_p11  ;;  %s504_s1 = sshll.u32 %s2947_s13, 4  ;;  %s505_s1 = int_to_ptr.hbm [resolvable:$true] %s504_s1 }
  0x20   : > { %s2455_s17 = smov [#allocation7]   ;;  %s2458_s30 = smov 8  }
  0x21   : > { %s472_s29 = sshll.u32 %s2977_s9, 4  ;;  %s2454_s9 = smov [#allocation2]   ;;  %s473_s29 = int_to_ptr.hbm [resolvable:$true] %s472_s29 }
  0x22   : > { %s449_s19 = sshll.u32 %s2978_s5, 4  ;;  %s451_s24 = sshll.u32 %s2454_s9, 4  ;;  %s450_s19 = int_to_ptr.hbm [resolvable:$true] %s449_s19  ;;  %s452_s24 = int_to_ptr.vmem [resolvable:$true] %s451_s24 }
  0x23   : > { %2151 = dma.hbm_to_vmem [thread:$0]  (!%p2622_p12), %s473_s29, 256, %s475_s20, [#allocation6], %s2452_s22, %s2452_s22, %s2453_s23  }
  0x24   : > { %s487_s5 = sshll.u32 %s2944_s10, 4  ;;  %s489_s16 = sshll.u32 %s2455_s17, 4  ;;  %s488_s5 = int_to_ptr.hbm [resolvable:$true] %s487_s5  ;;  %s490_s16 = int_to_ptr.vmem [resolvable:$true] %s489_s16 }
  0x25   : > { %2148 = dma.hbm_to_vmem [thread:$0]  (!%p2622_p12), %s450_s19, 256, %s452_s24, [#allocation3], %s2452_s22, %s2452_s22, %s2453_s23  }
  0x26   : > { %2154 = dma.hbm_to_vmem [thread:$0]  (!%p2622_p12), %s488_s5, 16, %s490_s16, [#allocation6]  }
  0x27   : > { %s2456_s9 = smov [#allocation8]   ;;  %s2457_s29 = smov 128  }
  0x28   : > { %s506_s20 = sshll.u32 %s2456_s9, 4  ;;  %538 = sbr.rel (%p2608_p10) target bundleno = 2222 (0x8ae), region = 88  ;;  %s507_s20 = int_to_ptr.vmem [resolvable:$true] %s506_s20 }
  0x29   : > { %2157 = dma.hbm_to_vmem [thread:$0]  (!%p2622_p12), %s505_s1, 4096, %s507_s20, [#allocation9], %s2457_s29, %s2457_s29, %s2458_s30  }
  0x2d   : > { %2420 = dma.done.wait (%p2162_p9), [#allocation3], 256  }
  0x2e   : > { %2422 = vsyncadd (%p2162_p9), [#allocation3], 4294967040 }
  0x2f   : > { %2424 = dma.done.wait (%p2162_p9), [#allocation6], 272  }
  0x30   : > { %2426 = vsyncadd (%p2162_p9), [#allocation6], 4294967024 }
  0x31   : > { %2428 = dma.done.wait (%p2162_p9), [#allocation9], 4096  }
  0x32   : > { %2430 = vsyncadd (%p2162_p9), [#allocation9], 4294963200  ;;  %p605_p13 = scmp.lt.s32.totalorder %s2580_s28, 1  ;;  %s2980_s26 = sld [smem:[#allocation22_spill]]  ;;  %vm613_vm0 = vcmask 261120   ;;  %v2459_v2 = vmov 32.0   ;;  %v696_v56 = vlaneseq }
  0x33   : > { %2229 = vrcp.f32 %v2459_v2  ;;  %v2058_v14 = vld [vmem:[%s2937_s3 + $0x8] sm:$0xff]  ;;  %v2057_v15 = vld [vmem:[%s2937_s3] sm:$0xff]  ;;  %s2981_s0 = sld [smem:[#allocation23_spill]]  ;;  %s2462_s17 = smov 112   ;;  %vm706_vm5 = vcmask 64512   ;;  %vm840_vm7 = vcmask 1043456  }
  0x34   : > { %s606_s5 = scalar_select %p605_p13, %s2580_s28, 1  ;;  %681 = vmatpush.bf16.msra.mxu0 %v2058_v14  ;;  %v2222_v28 = vld [vmem:[%s2936_s2] ss:$0 sm:$0xff]  ;;  %v697_v57 = vshrl.u32 %v696_v56, 7  ;;  %v699_v58 = vand.u32 127, %v696_v56  ;;  %vm950_vm8 = vcmask 130048  }
  0x35   : > { %v2223_v32 = vld [vmem:[%s2938_s4] ss:$0 sm:$0xff]  ;;  %s2463_s24 = smov 96   ;;  %v2464_v59 = vmov -1e+30   ;;  %s2467_s19 = smov 8  }
  0x36   : > { %s1761_s16 = sshll.u32 %s606_s5, 3  ;;  %s2460_s5 = smov 104   ;;  %vm700_vm6 = vcmp.le.s32.totalorder %v699_v58, %v697_v57  ;;  %vm953_vm9 = vcmask 195584  }
  0x37   : > { %v701_v60 = vsel %vm700_vm6, 0.0, %v2464_v59  ;;  %s2468_s1 = smov 16   ;;  %s2054_s20 = sshll.u32 %s2580_s28, 3 }
  0x38   : > { %s608_s27 = scalar_lea.vmem %s2980_s26, %s1761_s16  ;;  %682 = vmatpush.bf16.msra.mxu0 %v2057_v15  ;;  %s2461_s16 = smov 120  }
  0x39   : > { %v2659_v0 = vld [vmem:[%s608_s27] sm:$0xff]  ;;  %v2230_v3 = vpop.eup %2229  ;;  %s2465_s26 = smov 64   ;;  %s2466_s27 = smov 24  }
  0x3a   : > { %v614_v1 = vsel %vm613_vm0, %v2659_v0, 0.0  ;;  %v618_v4 = vmul.f32 32.0, %v2230_v3  ;;  %vm622_vm1 = vweird.f32 %v2230_v3  ;;  %v2221_v25 = vld [vmem:[%s2981_s0] ss:$0 sm:$0xff]  ;;  %s602_s0 = sand.u32 1, %s2441_s25  }
  0x3b   : > { %615 = vadd.xlane.f32.xlu0 %v614_v1  ;;  %s1760_s9 = sshll.u32 %s602_s0, 3  ;;  %s1633_s28 = scalar_lea.sflag [#allocation4], %s602_s0 }
  0x3c   : > { %v619_v5 = vsub.f32 1.0, %v618_v4 }
  0x3e   : > { %v620_v6 = vmul.f32 %v2230_v3, %v619_v5 }
  0x40   : > { %v621_v7 = vadd.f32 %v2230_v3, %v620_v6 }
  0x42   : > { %v2663_v8 = vsel %vm622_vm1, %v2230_v3, %v621_v7 }
  0xae   : > { %v616_v9 = vpop.xlane.xlu0 %615 }
  0xaf   : > { %v624_v10 = vmul.f32 %v2663_v8, %v616_v9 }
  0xb1   : > { %v625_v11 = vsub.f32 %v2659_v0, %v624_v10 }
  0xb3   : > { %v626_v12 = vmul.f32 %v625_v11, %v625_v11 }
  0xb5   : > { %v627_v13 = vsel %vm613_vm0, %v626_v12, 0.0 }
  0xb6   : > { %628 = vadd.xlane.f32.xlu0 %v627_v13 }
 0x129   : > { %v629_v16 = vpop.xlane.xlu0 %628 }
 0x12a   : > { %v630_v17 = vmul.f32 %v629_v16, %v2663_v8 }
 0x12c   : > { %v631_v18 = vadd.f32 1e-05, %v630_v17 }
 0x12e   : > { %2231 = vrsqrt.f32 %v631_v18  ;;  %vm638_vm3 = vweird.f32 %v631_v18 }
 0x134   : > { %v2232_v19 = vpop.eup %2231 }
 0x135   : > { %v633_v20 = vmul.f32 %v2232_v19, %v631_v18  ;;  %vm639_vm2 = vweird.f32 %v2232_v19 }
 0x136   : > { %vm640_vm4 = vmor %vm638_vm3, %vm639_vm2 }
 0x137   : > { %v634_v21 = vmul.f32 %v2232_v19, %v633_v20 }
 0x139   : > { %v635_v22 = vmul.f32 0.5, %v634_v21 }
 0x13b   : > { %v636_v23 = vsub.f32 1.5, %v635_v22 }
 0x13d   : > { %v637_v24 = vmul.f32 %v2232_v19, %v636_v23 }
 0x13f   : > { %v641_v26 = vsel %vm640_vm4, %v2232_v19, %v637_v24 }
 0x140   : > { %v642_v27 = vmul.f32 %v641_v26, %v625_v11 }
 0x142   : > { %v646_v29 = vmul.f32 %v2221_v25, %v642_v27 }
 0x144   : > { %v650_v30 = vadd.f32 %v2222_v28, %v646_v29 }
 0x146   : > { %v651_v31 = vpack.c.bf16 %v650_v30, %v650_v30 }
 0x148   : > { %1770 = vmatmul.msk.bf16.vlgmr.msra.gmra.mxu0 %vm613_vm0, %v651_v31 }
 0x1c5   : > { %v684_v33 = vpop.f32.mrf.mxu0 }
 0x1c6   : > { %v685_v34 = vadd.f32 %v2223_v32, %v684_v33 }
 0x1c8   : > { %v688_v35 = vpack.c.bf16 %v685_v34, %v685_v34 }
 0x1ca   : > { %694 = vrot.lane.b32.xlu2 %v688_v35, %s2460_s5  ;;  %690 = vrot.lane.b32.xlu1 %v688_v35, %s2461_s16  ;;  %v702_v43 = vunpack.c.l.b16 %v688_v35  ;;  %s2982_s5 = sld [smem:[#allocation26_spill]] }
 0x1cc   : > { %v703_v47 = vpack.c.b16 %v702_v43, %v702_v43 }
 0x1cd   : > { %v686_v36 = vpop.f32.mrf.mxu0 }
 0x1d2   : > { %692 = vrot.lane.b32.xlu1 %v688_v35, %s2462_s17 }
 0x224   : > { %v695_v37 = vpop.permute.xlu2 %694 }
 0x225   : > { %v772_v38 = vunpack.c.l.b16 %v695_v37 }
 0x227   : > { %v773_v39 = vpack.c.b16 %v772_v38, %v772_v38 }
 0x229   : > { %774 = vrot.lane.b32.xlu1 %v773_v39, %s2463_s24 }
 0x23c   : > { %v691_v40 = vpop.permute.xlu1 %690 }
 0x23d   : > { %v726_v41 = vunpack.c.l.b16 %v691_v40 }
 0x23f   : > { %v727_v42 = vpack.c.b16 %v726_v41, %v726_v41 }
 0x241   : > { %728 = vrot.lane.b32.xlu2 %v727_v42, %s2463_s24 }
 0x244   : > { %v693_v44 = vpop.permute.xlu1 %692 }
 0x245   : > { %v749_v45 = vunpack.c.l.b16 %v693_v44 }
 0x247   : > { %v750_v46 = vpack.c.b16 %v749_v45, %v749_v45 }
 0x249   : > { %751 = vrot.lane.b32.xlu0 %v750_v46, %s2463_s24  ;;  %704 = vrot.lane.b32.xlu2 %v703_v47, %s2463_s24  ;;  %s2983_s24 = sld [smem:[#allocation27_spill]] }
 0x29b   : > { %v729_v48 = vpop.permute.xlu2 %728  ;;  %v775_v49 = vpop.permute.xlu1 %774 }
 0x29c   : > { %v734_v50 = vsel %vm706_vm5, %v729_v48, 0  ;;  %v780_v51 = vsel %vm706_vm5, %v775_v49, 0 }
 0x29d   : > { %743 = vmatpush.bf16.xpose.msra.mxu2 %v734_v50  ;;  %789 = vmatpush.bf16.xpose.msrb.mxu0 %v780_v51 }
 0x2a3   : > { %v705_v52 = vpop.permute.xlu2 %704 }
 0x2a4   : > { %1772 = vmatmul.msk.bf16.vlgmr.msra.gmra.mxu2 %vm706_vm5, %v691_v40  ;;  %1774 = vmatmul.msk.bf16.vlgmr.msrb.gmra.mxu0 %vm706_vm5, %v695_v37  ;;  %v711_v53 = vsel %vm706_vm5, %v705_v52, 0 }
 0x2a5   : > { %720 = vmatpush.bf16.xpose.msra.mxu1 %v711_v53 }
 0x2ac   : > { %1771 = vmatmul.msk.bf16.vlgmr.msra.gmra.mxu1 %vm706_vm5, %v688_v35 }
 0x2bb   : > { %v752_v54 = vpop.permute.xlu0 %751 }
 0x2bc   : > { %v757_v55 = vsel %vm706_vm5, %v752_v54, 0 }
 0x2bd   : > { %766 = vmatpush.bf16.xpose.msra.mxu3 %v757_v55 }
 0x2c4   : > { %1773 = vmatmul.msk.bf16.vlgmr.msra.gmra.mxu3 %vm706_vm5, %v693_v44 }
 0x321   : > { %v791_v61 = vpop.f32.mrf.mxu0 }
 0x322   : > { %v792_v62 = vadd.f32 %v791_v61, %v701_v60 }
 0x324   : > { %v804_v63 = vsel %vm706_vm5, %v792_v62, -inf }
 0x325   : > { %805 = vmax.xlane.f32.xlu0 %v804_v63 }
 0x327   : > { %v745_v1 = vpop.f32.mrf.mxu2 }
 0x328   : > { %v746_v2 = vadd.f32 %v745_v1, %v701_v60 }
 0x329   : > { %v722_v3 = vpop.f32.mrf.mxu1  ;;  %v793_v4 = vpop.f32.mrf.mxu0 }
 0x32a   : > { %v723_v5 = vadd.f32 %v722_v3, %v701_v60  ;;  %v798_v6 = vsel %vm706_vm5, %v746_v2, -inf }
 0x32b   : > { %799 = vmax.xlane.f32.xlu1 %v798_v6 }
 0x32c   : > { %v795_v14 = vsel %vm706_vm5, %v723_v5, -inf }
 0x32f   : > { %v747_v7 = vpop.f32.mrf.mxu2 }
 0x331   : > { %v724_v9 = vpop.f32.mrf.mxu1 }
 0x332   : > { %v2060_v9 = vld [vmem:[#allocation2 + $0x8] sm:$0xff] }
 0x339   : > { %899 = vrot.lane.b32.xlu0 %v773_v39, %s2465_s26 }
 0x344   : > { %878 = vrot.lane.b32.xlu1 %v750_v46, %s2465_s26 }
 0x347   : > { %v768_v10 = vpop.f32.mrf.mxu3 }
 0x348   : > { %v769_v11 = vadd.f32 %v768_v10, %v701_v60 }
 0x34a   : > { %v801_v12 = vsel %vm706_vm5, %v769_v11, -inf }
 0x34b   : > { %802 = vmax.xlane.f32.xlu2 %v801_v12  ;;  %v2059_v12 = vld [vmem:[#allocation2] sm:$0xff] }
 0x34c   : > { %835 = vrot.lane.b32.xlu1 %v703_v47, %s2465_s26 }
 0x34f   : > { %v770_v13 = vpop.f32.mrf.mxu3 }
 0x363   : > { %857 = vrot.lane.b32.xlu2 %v727_v42, %s2465_s26  ;;  %s1643_s26 = scalar_lea.hbm %s2983_s24, %s2054_s20 }
 0x364   : > { %s1647_s22 = sshll.u32 %s1643_s26, 4  ;;  %s1648_s22 = int_to_ptr.hbm [resolvable:$true] %s1647_s22 }
 0x365   : > { %s2389_s23 = sshra.s32 %s1648_s22, 4  ;;  %s2390_s23 = int_to_ptr.hbm [resolvable:$true] %s2389_s23 }
 0x366   : > { %s2391_s18 = scalar_lea.hbm %s2390_s23, 8 }
 0x367   : > { %p2392_p0 = scmp.ne.s32.totalorder %s2390_s23, %s2391_s18 }
 0x369   : > { %p2393_p1 = pnand %p2392_p0, %p2597_p5 }
 0x36b   : > { %p2394_p2 = pneg %p2393_p1 }
 0x38c   : > { %796 = vmax.xlane.f32.xlu2 %v795_v14 }
 0x398   : > { %v806_v15 = vpop.xlane.xlu0 %805 }
 0x399   : > { %v810_v16 = vsub.f32 %v792_v62, %v806_v15 }
 0x39b   : > { %v817_v17 = vmul.f32 1.442695, %v810_v16 }
 0x39d   : > { %2233 = vpow2.f32 %v817_v17 }
 0x39e   : > { %v800_v18 = vpop.xlane.xlu1 %799 }
 0x39f   : > { %v808_v19 = vsub.f32 %v746_v2, %v800_v18 }
 0x3a1   : > { %v813_v20 = vmul.f32 1.442695, %v808_v19 }
 0x3a3   : > { %v2234_v21 = vpop.eup %2233  ;;  %2235 = vpow2.f32 %v813_v20 }
 0x3a4   : > { %v828_v22 = vsel %vm706_vm5, %v2234_v21, 0.0  ;;  %v834_v27 = vpack.c.bf16 %v2234_v21, %v2234_v21 }
 0x3a5   : > { %829 = vadd.xlane.f32.xlu2 %v828_v22 }
 0x3a9   : > { %v2236_v23 = vpop.eup %2235 }
 0x3aa   : > { %v822_v24 = vsel %vm706_vm5, %v2236_v23, 0.0  ;;  %v832_v38 = vpack.c.bf16 %v2236_v23, %v2236_v23  ;;  %v2224_v23 = vld [vmem:[%s2940_s6] ss:$0 sm:$0xff] }
 0x3ab   : > { %v900_v25 = vpop.permute.xlu0 %899  ;;  %823 = vadd.xlane.f32.xlu0 %v822_v24 }
 0x3ac   : > { %v905_v26 = vsel %vm840_vm7, %v900_v25, 0 }
 0x3ad   : > { %914 = vmatpush.bf16.msra.mxu0 %v905_v26 }
 0x3b0   : > { %1778 = vmatmul.msk.bf16.vlgmr.msra.gmra.mxu0 %vm706_vm5, %v834_v27 }
 0x3b6   : > { %v879_v28 = vpop.permute.xlu1 %878 }
 0x3b7   : > { %v884_v29 = vsel %vm840_vm7, %v879_v28, 0 }
 0x3b8   : > { %893 = vmatpush.bf16.msrb.mxu3 %v884_v29 }
 0x3be   : > { %v836_v30 = vpop.permute.xlu1 %835  ;;  %v803_v31 = vpop.xlane.xlu2 %802 }
 0x3bf   : > { %v809_v32 = vsub.f32 %v769_v11, %v803_v31  ;;  %v842_v33 = vsel %vm840_vm7, %v836_v30, 0 }
 0x3c0   : > { %851 = vmatpush.bf16.msrb.mxu1 %v842_v33 }
 0x3c1   : > { %v815_v34 = vmul.f32 1.442695, %v809_v32 }
 0x3c3   : > { %2237 = vpow2.f32 %v815_v34  ;;  %v2062_v34 = vld [vmem:[#allocation5 + $0x8] sm:$0xff] }
 0x3c4   : > { %980 = vmatpush.bf16.msra.mxu1 %v2060_v9 }
 0x3c6   : > { %v858_v35 = vpop.permute.xlu2 %857 }
 0x3c7   : > { %v863_v36 = vsel %vm840_vm7, %v858_v35, 0  ;;  %v2061_v35 = vld [vmem:[#allocation5] sm:$0xff] }
 0x3c8   : > { %872 = vmatpush.bf16.msrb.mxu2 %v863_v36  ;;  %981 = vmatpush.bf16.msra.mxu1 %v2059_v12  ;;  %v1823_v12 = vld [vmem:[%s2945_s11 + $0x30] sm:$0xf] }
 0x3c9   : > { %v2238_v37 = vpop.eup %2237 }
 0x3ca   : > { %v825_v39 = vsel %vm706_vm5, %v2238_v37, 0.0  ;;  %v833_v40 = vpack.c.bf16 %v2238_v37, %v2238_v37 }
 0x3cb   : > { %826 = vadd.xlane.f32.xlu1 %v825_v39  ;;  %1776 = vmatmul.msk.bf16.vlgmr.msrb.gmra.mxu2 %vm706_vm5, %v832_v38 }
 0x3cc   : > { %1777 = vmatmul.msk.bf16.vlgmr.msrb.gmra.mxu3 %vm706_vm5, %v833_v40  ;;  %1055 = vmatpush.bf16.msra.mxu2 %v2062_v34 }
 0x3d0   : > { %1056 = vmatpush.bf16.msra.mxu2 %v2061_v35 }
 0x3ff   : > { %v797_v41 = vpop.xlane.xlu2 %796 }
 0x400   : > { %v807_v42 = vsub.f32 %v723_v5, %v797_v41 }
 0x402   : > { %v811_v43 = vmul.f32 1.442695, %v807_v42 }
 0x404   : > { %2239 = vpow2.f32 %v811_v43 }
 0x40a   : > { %v2240_v44 = vpop.eup %2239 }
 0x40b   : > { %v819_v45 = vsel %vm706_vm5, %v2240_v44, 0.0  ;;  %v831_v46 = vpack.c.bf16 %v2240_v44, %v2240_v44  ;;  %v2225_v44 = vld [vmem:[%s2941_s7] ss:$0 sm:$0xff] }
 0x40c   : > { %820 = vadd.xlane.f32.xlu2 %v819_v45 }
 0x40d   : > { %1775 = vmatmul.msk.bf16.vlgmr.msrb.gmra.mxu1 %vm706_vm5, %v831_v46 }
 0x418   : > { %v830_v47 = vpop.xlane.xlu2 %829 }
 0x419   : > { %2241 = vrcp.f32 %v830_v47 }
 0x41e   : > { %v824_v55 = vpop.xlane.xlu0 %823 }
 0x41f   : > { %v2242_v48 = vpop.eup %2241  ;;  %2243 = vrcp.f32 %v824_v55 }
 0x425   : > { %v2244_v57 = vpop.eup %2243 }
 0x42d   : > { %v916_v49 = vpop.f32.mrf.mxu0 }
 0x42e   : > { %v927_v50 = vmul.f32 %v2242_v48, %v916_v49 }
 0x430   : > { %v931_v51 = vpack.c.bf16 %v927_v50, %v927_v50  ;;  %v1855_v50 = vld [vmem:[%s2945_s11 + $0x70] sm:$0xf] }
 0x432   : > { %v943_v52 = vunpack.c.l.b16 %v931_v51  ;;  %v2078_v51 = vld [vmem:[%s2945_s11 + $0x74] sm:$0xf0] }
 0x434   : > { %v944_v53 = vpack.c.b16 %v943_v52, %v943_v52  ;;  %v2077_v52 = vld [vmem:[%s2945_s11 + $0x74] sm:$0xf] }
 0x435   : > { %v918_v54 = vpop.f32.mrf.mxu0 }
 0x436   : > { %945 = vrot.lane.b32.xlu2 %v944_v53, %s2466_s27  ;;  %v1856_v53 = vor.u32 %v2078_v51, %v1855_v50  ;;  %v1857_v54 = vld [vmem:[%s2945_s11 + $0x78] sm:$0xf0]  ;;  %v2108_v50 = vld [vmem:[#allocation8 + $0xe4] sm:$0xf0] }
 0x437   : > { %v1860_v55 = vor.u32 %v2077_v52, %v1857_v54  ;;  %v2107_v52 = vld [vmem:[#allocation8 + $0xe4] sm:$0xf]  ;;  %v1919_v54 = vld [vmem:[#allocation8 + $0x70] sm:$0xf] }
 0x438   : > { %1188 = vmatpush.bf16.msra.mxu3 %v1856_v53  ;;  %v1977_v53 = vld [vmem:[#allocation8 + $0xe8] sm:$0xf0] }
 0x439   : > { %1201 = vmatpush.bf16.msrb.mxu0 %v1860_v55 }
 0x43e   : > { %v827_v56 = vpop.xlane.xlu1 %826 }
 0x43f   : > { %2245 = vrcp.f32 %v827_v56  ;;  %v1847_v56 = vld [vmem:[%s2945_s11 + $0x60] sm:$0xf] }
 0x445   : > { %v2246_v59 = vpop.eup %2245 }
 0x44e   : > { %v874_v58 = vpop.f32.mrf.mxu2 }
 0x44f   : > { %v925_v60 = vmul.f32 %v2244_v57, %v874_v58  ;;  %v895_v61 = vpop.f32.mrf.mxu3  ;;  %v2076_v57 = vld [vmem:[%s2945_s11 + $0x64] sm:$0xf0]  ;;  %v2075_v58 = vld [vmem:[%s2945_s11 + $0x64] sm:$0xf] }
 0x450   : > { %v926_v62 = vmul.f32 %v2246_v59, %v895_v61  ;;  %v1848_v59 = vor.u32 %v2076_v57, %v1847_v56  ;;  %v2094_v56 = vld [vmem:[#allocation8 + $0x74] sm:$0xf0]  ;;  %v2093_v57 = vld [vmem:[#allocation8 + $0x74] sm:$0xf] }
 0x451   : > { %v929_v63 = vpack.c.bf16 %v925_v60, %v925_v60  ;;  %v1849_v60 = vld [vmem:[%s2945_s11 + $0x68] sm:$0xf0] }
 0x452   : > { %v930_v1 = vpack.c.bf16 %v926_v62, %v926_v62  ;;  %v1852_v61 = vor.u32 %v2075_v58, %v1849_v60  ;;  %1189 = vmatpush.bf16.msra.mxu3 %v1848_v59  ;;  %v1839_v62 = vld [vmem:[%s2945_s11 + $0x50] sm:$0xf]  ;;  %v1921_v58 = vld [vmem:[#allocation8 + $0x78] sm:$0xf0]  ;;  %v1980_v59 = vor.u32 %v2107_v52, %v1977_v53  ;;  %v1920_v60 = vor.u32 %v2094_v56, %v1919_v54  ;;  %v2099_v52 = vld [vmem:[#allocation8 + $0xa4] sm:$0xf] }
 0x453   : > { %v933_v2 = vunpack.c.l.b16 %v929_v63  ;;  %v2074_v63 = vld [vmem:[%s2945_s11 + $0x54] sm:$0xf0]  ;;  %v1945_v53 = vld [vmem:[#allocation8 + $0xa8] sm:$0xf0] }
 0x454   : > { %v938_v3 = vunpack.c.l.b16 %v930_v1  ;;  %1202 = vmatpush.bf16.msrb.mxu0 %v1852_v61  ;;  %v2073_v1 = vld [vmem:[%s2945_s11 + $0x54] sm:$0xf]  ;;  %v1924_v61 = vor.u32 %v2093_v57, %v1921_v58  ;;  %1416 = vmatpush.bf16.msrb.mxu1 %v1920_v60 }
 0x455   : > { %v934_v4 = vpack.c.b16 %v933_v2, %v933_v2  ;;  %v1840_v2 = vor.u32 %v2074_v63, %v1839_v62  ;;  %v1967_v62 = vld [vmem:[#allocation8 + $0xd0] sm:$0xf]  ;;  %v2106_v63 = vld [vmem:[#allocation8 + $0xd4] sm:$0xf0] }
 0x456   : > { %v939_v5 = vpack.c.b16 %v938_v3, %v938_v3  ;;  %v876_v6 = vpop.f32.mrf.mxu2  ;;  %v1841_v3 = vld [vmem:[%s2945_s11 + $0x58] sm:$0xf0] }
 0x457   : > { %v897_v7 = vpop.f32.mrf.mxu3  ;;  %935 = vrot.lane.b32.xlu0 %v934_v4, %s2467_s19  ;;  %v1844_v4 = vor.u32 %v2073_v1, %v1841_v3  ;;  %1190 = vmatpush.bf16.msra.mxu3 %v1840_v2  ;;  %v2072_v6 = vld [vmem:[%s2945_s11 + $0x44] sm:$0xf0]  ;;  %v2105_v1 = vld [vmem:[#allocation8 + $0xd4] sm:$0xf]  ;;  %v1969_v3 = vld [vmem:[#allocation8 + $0xd8] sm:$0xf0]  ;;  %s2984_s19 = smov %s2983_s24 }
 0x458   : > { %940 = vrot.lane.b32.xlu1 %v939_v5, %s2468_s1  ;;  %v1831_v5 = vld [vmem:[%s2945_s11 + $0x40] sm:$0xf]  ;;  %v2071_v7 = vld [vmem:[%s2945_s11 + $0x44] sm:$0xf]  ;;  %s604_s1 = scalar_lea.vmem [#allocation10], %s1760_s9  ;;  %s2395_s9 = scalar_lea.hbm %s2984_s19, 16 }
 0x459   : > { %1203 = vmatpush.bf16.msrb.mxu0 %v1844_v4  ;;  %v1832_v9 = vor.u32 %v2072_v6, %v1831_v5  ;;  %v1911_v4 = vld [vmem:[#allocation8 + $0x60] sm:$0xf]  ;;  %v2092_v5 = vld [vmem:[#allocation8 + $0x64] sm:$0xf0]  ;;  %s1645_s21 = sshll.u32 %s604_s1, 4  ;;  %p2396_p3 = scmp.lt.s32.totalorder %s2390_s23, %s2984_s19  ;;  %s1646_s21 = int_to_ptr.vmem [resolvable:$true] %s1645_s21 }
 0x45a   : > { %p2397_p4 = scmp.lt.s32.totalorder %s2395_s9, %s2391_s18 }
 0x45b   : > { %1191 = vmatpush.bf16.msra.mxu3 %v1832_v9  ;;  %v2091_v9 = vld [vmem:[#allocation8 + $0x64] sm:$0xf] }
 0x45c   : > { %p2398_p7 = por %p2397_p4, %p2396_p3 }
 0x45e   : > { %p2399_p8 = pnand %p2398_p7, %p2394_p2 }
 0x47f   : > { %v821_v13 = vpop.xlane.xlu2 %820 }
 0x480   : > { %2247 = vrcp.f32 %v821_v13  ;;  %v2070_v13 = vld [vmem:[%s2945_s11 + $0x34] sm:$0xf0] }
 0x486   : > { %v2248_v14 = vpop.eup %2247 }
 0x48a   : > { %v853_v10 = vpop.f32.mrf.mxu1 }
 0x48b   : > { %v924_v15 = vmul.f32 %v2248_v14, %v853_v10  ;;  %v1833_v10 = vld [vmem:[%s2945_s11 + $0x48] sm:$0xf0]  ;;  %v2069_v14 = vld [vmem:[%s2945_s11 + $0x34] sm:$0xf] }
 0x48d   : > { %v928_v16 = vpack.c.bf16 %v924_v15, %v924_v15  ;;  %v1824_v15 = vor.u32 %v2070_v13, %v1823_v12  ;;  %v1959_v13 = vld [vmem:[#allocation8 + $0xc0] sm:$0xf] }
 0x48f   : > { %1192 = vmatpush.bf16.msra.mxu3 %v1824_v15  ;;  %v2103_v15 = vld [vmem:[#allocation8 + $0xc4] sm:$0xf] }
 0x490   : > { %v946_v20 = vpop.permute.xlu2 %945 }
 0x492   : > { %v855_v11 = vpop.f32.mrf.mxu1 }
 0x493   : > { %v1836_v11 = vor.u32 %v2071_v7, %v1833_v10  ;;  %v1912_v7 = vor.u32 %v2092_v5, %v1911_v4  ;;  %v1913_v10 = vld [vmem:[#allocation8 + $0x68] sm:$0xf0] }
 0x494   : > { %v1916_v12 = vor.u32 %v2091_v9, %v1913_v10  ;;  %v2097_v9 = vld [vmem:[#allocation8 + $0x94] sm:$0xf] }
 0x495   : > { %1204 = vmatpush.bf16.msrb.mxu0 %v1836_v11  ;;  %v1968_v11 = vor.u32 %v2106_v63, %v1967_v62  ;;  %1417 = vmatpush.bf16.msrb.mxu1 %v1912_v7  ;;  %v2098_v7 = vld [vmem:[#allocation8 + $0x94] sm:$0xf0] }
 0x4c9   : > { %v936_v17 = vpop.permute.xlu0 %935 }
 0x4ca   : > { %v949_v18 = vsel %vm706_vm5, %v928_v16, %v936_v17  ;;  %v941_v19 = vpop.permute.xlu1 %940  ;;  %v1825_v16 = vld [vmem:[%s2945_s11 + $0x38] sm:$0xf0] }
 0x4cb   : > { %v952_v21 = vsel %vm950_vm8, %v949_v18, %v941_v19  ;;  %v1828_v17 = vor.u32 %v2069_v14, %v1825_v16  ;;  %v2227_v18 = vld [vmem:[#allocation7] ss:$0 sm:$0xff]  ;;  %v2104_v14 = vld [vmem:[#allocation8 + $0xc4] sm:$0xf0] }
 0x4cc   : > { %v955_v22 = vsel %vm953_vm9, %v952_v21, %v946_v20  ;;  %v1815_v19 = vld [vmem:[%s2945_s11 + $0x20] sm:$0xf]  ;;  %v2068_v20 = vld [vmem:[%s2945_s11 + $0x24] sm:$0xf0]  ;;  %v2067_v21 = vld [vmem:[%s2945_s11 + $0x24] sm:$0xf] }
 0x4cd   : > { %1787 = vmatmul.msk.bf16.vlgmr.msra.gmra.mxu1 %vm613_vm0, %v955_v22  ;;  %1205 = vmatpush.bf16.msrb.mxu0 %v1828_v17  ;;  %v1816_v22 = vor.u32 %v2068_v20, %v1815_v19  ;;  %v1972_v17 = vor.u32 %v2105_v1, %v1969_v3  ;;  %v1903_v19 = vld [vmem:[#allocation8 + $0x50] sm:$0xf] }
 0x4cf   : > { %1193 = vmatpush.bf16.msra.mxu3 %v1816_v22  ;;  %v2089_v22 = vld [vmem:[#allocation8 + $0x54] sm:$0xf] }
 0x54a   : > { %v983_v24 = vpop.f32.mrf.mxu1 }
 0x54b   : > { %v987_v25 = vadd.f32 %v983_v24, %v2659_v0 }
 0x54d   : > { %v2715_v26 = vadd.f32 %v2224_v23, %v987_v25  ;;  %v1817_v23 = vld [vmem:[%s2945_s11 + $0x28] sm:$0xf0] }
 0x54e   : > { %v1820_v25 = vor.u32 %v2067_v21, %v1817_v23  ;;  %v2090_v21 = vld [vmem:[#allocation8 + $0x54] sm:$0xf0]  ;;  %v1905_v23 = vld [vmem:[#allocation8 + $0x58] sm:$0xf0] }
 0x54f   : > { %v995_v27 = vsel %vm613_vm0, %v2715_v26, 0.0 }
 0x550   : > { %996 = vadd.xlane.f32.xlu0 %v995_v27  ;;  %1206 = vmatpush.bf16.msrb.mxu0 %v1820_v25  ;;  %v1904_v25 = vor.u32 %v2090_v21, %v1903_v19 }
 0x552   : > { %v985_v28 = vpop.f32.mrf.mxu1  ;;  %1418 = vmatpush.bf16.msrb.mxu1 %v1904_v25 }
 0x553   : > { %v1807_v28 = vld [vmem:[%s2945_s11 + $0x10] sm:$0xf] }
 0x5c3   : > { %v997_v29 = vpop.xlane.xlu0 %996 }
 0x5c4   : > { %v998_v30 = vmul.f32 %v997_v29, %v2663_v8  ;;  %v2066_v29 = vld [vmem:[%s2945_s11 + $0x14] sm:$0xf0] }
 0x5c6   : > { %v999_v31 = vsub.f32 %v2715_v26, %v998_v30  ;;  %v2065_v30 = vld [vmem:[%s2945_s11 + $0x14] sm:$0xf] }
 0x5c8   : > { %v1000_v32 = vmul.f32 %v999_v31, %v999_v31 }
 0x5ca   : > { %v1001_v33 = vsel %vm613_vm0, %v1000_v32, 0.0  ;;  %v1808_v32 = vor.u32 %v2066_v29, %v1807_v28  ;;  %v1908_v28 = vor.u32 %v2089_v22, %v1905_v23  ;;  %v1951_v29 = vld [vmem:[#allocation8 + $0xb0] sm:$0xf]  ;;  %v2082_v23 = vld [vmem:[#allocation8 + $0x14] sm:$0xf0] }
 0x5cb   : > { %1002 = vadd.xlane.f32.xlu1 %v1001_v33  ;;  %v1809_v33 = vld [vmem:[%s2945_s11 + $0x18] sm:$0xf0]  ;;  %v1871_v22 = vld [vmem:[#allocation8 + $0x10] sm:$0xf] }
 0x5cc   : > { %v1812_v34 = vor.u32 %v2065_v30, %v1809_v33  ;;  %1194 = vmatpush.bf16.msra.mxu3 %v1808_v32  ;;  %v1960_v30 = vor.u32 %v2104_v14, %v1959_v13  ;;  %v1895_v32 = vld [vmem:[#allocation8 + $0x40] sm:$0xf]  ;;  %v2088_v33 = vld [vmem:[#allocation8 + $0x44] sm:$0xf0]  ;;  %v2083_v14 = vld [vmem:[#allocation8 + $0x24] sm:$0xf]  ;;  %v1872_v25 = vor.u32 %v2082_v23, %v1871_v22 }
 0x5cd   : > { %v2084_v13 = vld [vmem:[#allocation8 + $0x24] sm:$0xf0] }
 0x5ce   : > { %1207 = vmatpush.bf16.msrb.mxu0 %v1812_v34 }
 0x63e   : > { %v1003_v0 = vpop.xlane.xlu1 %1002 }
 0x63f   : > { %v1004_v36 = vmul.f32 %v1003_v0, %v2663_v8  ;;  %v2226_v8 = vld [vmem:[%s2942_s8] ss:$0 sm:$0xff] }
 0x640   : > { %v1799_v0 = vld [vmem:[%s2945_s11] sm:$0xf] }
 0x641   : > { %v1005_v37 = vadd.f32 1e-05, %v1004_v36  ;;  %v2064_v36 = vld [vmem:[%s2945_s11 + $0x4] sm:$0xf0] }
 0x643   : > { %2249 = vrsqrt.f32 %v1005_v37  ;;  %vm1012_vm11 = vweird.f32 %v1005_v37 }
 0x649   : > { %v2250_v38 = vpop.eup %2249 }
 0x64a   : > { %v1007_v39 = vmul.f32 %v2250_v38, %v1005_v37  ;;  %vm1013_vm10 = vweird.f32 %v2250_v38  ;;  %v2063_v37 = vld [vmem:[%s2945_s11 + $0x4] sm:$0xf] }
 0x64b   : > { %vm1014_vm12 = vmor %vm1012_vm11, %vm1013_vm10 }
 0x64c   : > { %v1008_v40 = vmul.f32 %v2250_v38, %v1007_v39  ;;  %v1800_v39 = vor.u32 %v2064_v36, %v1799_v0  ;;  %v2087_v36 = vld [vmem:[#allocation8 + $0x44] sm:$0xf] }
 0x64e   : > { %v1009_v41 = vmul.f32 0.5, %v1008_v40  ;;  %1195 = vmatpush.bf16.msra.mxu3 %v1800_v39  ;;  %v2101_v39 = vld [vmem:[#allocation8 + $0xb4] sm:$0xf] }
 0x650   : > { %v1010_v42 = vsub.f32 1.5, %v1009_v41  ;;  %v1801_v41 = vld [vmem:[%s2945_s11 + $0x8] sm:$0xf0] }
 0x652   : > { %v1011_v43 = vmul.f32 %v2250_v38, %v1010_v42  ;;  %1442 = vmatpush.bf16.msrb.mxu3 %v1924_v61 }
 0x654   : > { %v1015_v45 = vsel %vm1014_vm12, %v2250_v38, %v1011_v43  ;;  %v1804_v43 = vor.u32 %v2063_v37, %v1801_v41  ;;  %v1897_v37 = vld [vmem:[#allocation8 + $0x48] sm:$0xf0] }
 0x655   : > { %v1016_v46 = vmul.f32 %v1015_v45, %v999_v31  ;;  %v1983_v45 = vld [vmem:[#allocation8 + $0xf0] sm:$0xf] }
 0x656   : > { %1208 = vmatpush.bf16.msrb.mxu0 %v1804_v43  ;;  %1443 = vmatpush.bf16.msrb.mxu3 %v1916_v12  ;;  %v1900_v43 = vor.u32 %v2087_v36, %v1897_v37  ;;  %v1879_v12 = vld [vmem:[#allocation8 + $0x20] sm:$0xf]  ;;  %v2118_v36 = vld [vmem:[%s2949_s15 + $0x38] sm:$0xff] }
 0x657   : > { %v1020_v47 = vmul.f32 %v2225_v44, %v1016_v46  ;;  %v2110_v46 = vld [vmem:[#allocation8 + $0xf4] sm:$0xf0] }
 0x658   : > { %v2126_v37 = vld [vmem:[%s2949_s15 + $0x78] sm:$0xff] }
 0x659   : > { %v1024_v48 = vadd.f32 %v2226_v8, %v1020_v47  ;;  %v2109_v8 = vld [vmem:[#allocation8 + $0xf4] sm:$0xf]  ;;  %v1984_v47 = vor.u32 %v2110_v46, %v1983_v45  ;;  %v2086_v46 = vld [vmem:[#allocation8 + $0x34] sm:$0xf0] }
 0x65a   : > { %1444 = vmatpush.bf16.msrb.mxu3 %v1908_v28  ;;  %v1873_v28 = vld [vmem:[#allocation8 + $0x18] sm:$0xf0] }
 0x65b   : > { %v1025_v49 = vpack.c.bf16 %v1024_v48, %v1024_v48  ;;  %v1985_v48 = vld [vmem:[#allocation8 + $0xf8] sm:$0xf0]  ;;  %1429 = vmatpush.bf16.msrb.mxu2 %v1984_v47 }
 0x65c   : > { %v1988_v51 = vor.u32 %v2109_v8, %v1985_v48  ;;  %v2085_v8 = vld [vmem:[#allocation8 + $0x34] sm:$0xf]  ;;  %v1889_v47 = vld [vmem:[#allocation8 + $0x38] sm:$0xf0] }
 0x65d   : > { %1796 = vmatmul.msk.bf16.vlgmr.msra.gmra.mxu2 %vm613_vm0, %v1025_v49  ;;  %v1975_v49 = vld [vmem:[#allocation8 + $0xe0] sm:$0xf]  ;;  %v1892_v56 = vor.u32 %v2085_v8, %v1889_v47 }
 0x65e   : > { %v1976_v55 = vor.u32 %v2108_v50, %v1975_v49  ;;  %1455 = vmatpush.bf16.msra.mxu0 %v1988_v51  ;;  %v1943_v50 = vld [vmem:[#allocation8 + $0xa0] sm:$0xf]  ;;  %v2100_v51 = vld [vmem:[#allocation8 + $0xa4] sm:$0xf0]  ;;  %1445 = vmatpush.bf16.msrb.mxu3 %v1900_v43  ;;  %v1102_v43 = vld [vmem:[%s2946_s12] sm:$0x3] }
 0x65f   : > { %v1944_v57 = vor.u32 %v2100_v51, %v1943_v50  ;;  %v1104_v47 = vperm.slane %v1102_v43, 0 }
 0x660   : > { %1430 = vmatpush.bf16.msrb.mxu2 %v1976_v55 }
 0x662   : > { %1456 = vmatpush.bf16.msra.mxu0 %v1980_v59  ;;  %v1948_v59 = vor.u32 %v2099_v52, %v1945_v53  ;;  %1446 = vmatpush.bf16.msrb.mxu3 %v1892_v56  ;;  %v2123_v56 = vld [vmem:[%s2949_s15 + $0x60] sm:$0xff] }
 0x664   : > { %1431 = vmatpush.bf16.msrb.mxu2 %v1968_v11 }
 0x666   : > { %1457 = vmatpush.bf16.msra.mxu0 %v1972_v17  ;;  %v2096_v17 = vld [vmem:[#allocation8 + $0x84] sm:$0xf0] }
 0x668   : > { %1432 = vmatpush.bf16.msrb.mxu2 %v1960_v30  ;;  %v1863_v30 = vld [vmem:[#allocation8] sm:$0xf] }
 0x6e0   : > { %v1058_v24 = vpop.f32.mrf.mxu2 }
 0x6e1   : > { %v2802_v27 = vadd.f32 %v2227_v18, %v1058_v24  ;;  %v1961_v18 = vld [vmem:[#allocation8 + $0xc8] sm:$0xf0] }
 0x6e2   : > { %v1964_v0 = vor.u32 %v2103_v15, %v1961_v18  ;;  %v1881_v15 = vld [vmem:[#allocation8 + $0x28] sm:$0xf0]  ;;  %v2095_v18 = vld [vmem:[#allocation8 + $0x84] sm:$0xf] }
 0x6e3   : > { %v1062_v31 = vand.u32 2147483647, %v2802_v27  ;;  %v1076_v1 = vmax.f32 %v2802_v27, 0.0  ;;  %v1927_v27 = vld [vmem:[#allocation8 + $0x80] sm:$0xf] }
 0x6e4   : > { %1458 = vmatpush.bf16.msra.mxu0 %v1964_v0  ;;  %v1928_v19 = vor.u32 %v2096_v17, %v1927_v27 }
 0x6e5   : > { %v2817_v35 = vmul.f32 0.70710677, %v1062_v31  ;;  %v2102_v31 = vld [vmem:[#allocation8 + $0xb4] sm:$0xf0] }
 0x6e6   : > { %v1952_v45 = vor.u32 %v2102_v31, %v1951_v29  ;;  %v2080_v31 = vld [vmem:[#allocation8 + $0x4] sm:$0xf0] }
 0x6e7   : > { %v1064_v38 = vmul.f32 0.3275911, %v2817_v35  ;;  %v1078_v44 = vsub.f32 0.0, %v2817_v35  ;;  %v1077_v62 = vmul.f32 0.70710677, %v2817_v35 }
 0x6e8   : > { %v1060_v40 = vpop.f32.mrf.mxu2  ;;  %1433 = vmatpush.bf16.msrb.mxu2 %v1952_v45 }
 0x6e9   : > { %v1065_v42 = vadd.f32 1.0, %v1064_v38  ;;  %v1079_v20 = vmul.f32 %v1078_v44, %v2817_v35  ;;  %v1953_v40 = vld [vmem:[#allocation8 + $0xb8] sm:$0xf0]  ;;  %v1887_v44 = vld [vmem:[#allocation8 + $0x30] sm:$0xf]  ;;  %v1880_v35 = vor.u32 %v2084_v13, %v1879_v12 }
 0x6ea   : > { %v1956_v49 = vor.u32 %v2101_v39, %v1953_v40  ;;  %v1888_v55 = vor.u32 %v2086_v46, %v1887_v44  ;;  %v2125_v39 = vld [vmem:[%s2949_s15 + $0x70] sm:$0xff]  ;;  %v2116_v40 = vld [vmem:[%s2949_s15 + $0x28] sm:$0xff]  ;;  %v1105_v44 = vperm.slane %v1102_v43, 1 }
 0x6eb   : > { %2251 = vrcp.f32 %v1065_v42  ;;  %v1080_v38 = vmul.f32 1.442695, %v1079_v20  ;;  %v1896_v42 = vor.u32 %v2088_v33, %v1895_v32  ;;  %v1929_v20 = vld [vmem:[#allocation8 + $0x88] sm:$0xf0]  ;;  %v2079_v32 = vld [vmem:[#allocation8 + $0x4] sm:$0xf]  ;;  %v1864_v33 = vor.u32 %v2080_v31, %v1863_v30 }
 0x6ec   : > { %1459 = vmatpush.bf16.msra.mxu0 %v1956_v49  ;;  %1434 = vmatpush.bf16.msrb.mxu2 %v1944_v57  ;;  %v1932_v21 = vor.u32 %v2095_v18, %v1929_v20  ;;  %v2113_v57 = vld [vmem:[%s2949_s15 + $0x10] sm:$0xff]  ;;  %v2228_v20 = vld [vmem:[%s2982_s5] ss:$0 sm:$0xff] }
 0x6ed   : > { %2253 = vpow2.f32 %v1080_v38  ;;  %1419 = vmatpush.bf16.msrb.mxu1 %v1896_v42  ;;  %v2117_v38 = vld [vmem:[%s2949_s15 + $0x30] sm:$0xff]  ;;  %v2115_v42 = vld [vmem:[%s2949_s15 + $0x20] sm:$0xff] }
 0x6f0   : > { %1460 = vmatpush.bf16.msra.mxu0 %v1948_v59  ;;  %v2112_v59 = vld [vmem:[%s2949_s15 + $0x8] sm:$0xff] }
 0x6f1   : > { %v2833_v2 = vpop.eup %2251  ;;  %1420 = vmatpush.bf16.msrb.mxu1 %v1888_v55  ;;  %v2114_v55 = vld [vmem:[%s2949_s15 + $0x18] sm:$0xff] }
 0x6f2   : > { %v1067_v6 = vmul.f32 1.0614054, %v2833_v2 }
 0x6f3   : > { %v2254_v61 = vpop.eup %2253 }
 0x6f4   : > { %v1068_v16 = vadd.f32 -1.4531521, %v1067_v6  ;;  %v1935_v6 = vld [vmem:[#allocation8 + $0x90] sm:$0xf] }
 0x6f5   : > { %v1936_v10 = vor.u32 %v2098_v7, %v1935_v6  ;;  %1421 = vmatpush.bf16.msrb.mxu1 %v1880_v35 }
 0x6f6   : > { %v1069_v24 = vmul.f32 %v2833_v2, %v1068_v16  ;;  %v1884_v16 = vor.u32 %v2083_v14, %v1881_v15 }
 0x6f7   : > { %1435 = vmatpush.bf16.msrb.mxu2 %v1936_v10 }
 0x6f8   : > { %v1070_v34 = vadd.f32 1.4214138, %v1069_v24  ;;  %1447 = vmatpush.bf16.msrb.mxu3 %v1884_v16  ;;  %v2081_v24 = vld [vmem:[#allocation8 + $0x14] sm:$0xf] }
 0x6f9   : > { %v1876_v29 = vor.u32 %v2081_v24, %v1873_v28  ;;  %1422 = vmatpush.bf16.msrb.mxu1 %v1872_v25 }
 0x6fa   : > { %v1071_v41 = vmul.f32 %v2833_v2, %v1070_v34  ;;  %v1865_v34 = vld [vmem:[#allocation8 + $0x8] sm:$0xf0] }
 0x6fb   : > { %1436 = vmatpush.bf16.msrb.mxu2 %v1928_v19  ;;  %v1868_v0 = vor.u32 %v2079_v32, %v1865_v34 }
 0x6fc   : > { %v1072_v48 = vadd.f32 -0.28449672, %v1071_v41  ;;  %1448 = vmatpush.bf16.msrb.mxu3 %v1876_v29  ;;  %v2124_v41 = vld [vmem:[%s2949_s15 + $0x68] sm:$0xff] }
 0x6fd   : > { %1423 = vmatpush.bf16.msrb.mxu1 %v1864_v33 }
 0x6fe   : > { %v1073_v54 = vmul.f32 %v2833_v2, %v1072_v48 }
 0x6ff   : > { %1617 = vmatpush.bf16.msra.mxu2 %v2126_v37 }
 0x700   : > { %v1074_v58 = vadd.f32 0.2548296, %v1073_v54  ;;  %1449 = vmatpush.bf16.msrb.mxu3 %v1868_v0 }
 0x701   : > { %1604 = vmatpush.bf16.msra.mxu1 %v2118_v36 }
 0x702   : > { %v1075_v60 = vmul.f32 %v2833_v2, %v1074_v58  ;;  %v1937_v2 = vld [vmem:[#allocation8 + $0x98] sm:$0xf0] }
 0x703   : > { %v1940_v11 = vor.u32 %v2097_v9, %v1937_v2  ;;  %1618 = vmatpush.bf16.msra.mxu2 %v2125_v39  ;;  %v2122_v58 = vld [vmem:[%s2949_s15 + $0x58] sm:$0xff] }
 0x704   : > { %v1082_v63 = vmul.f32 %v2254_v61, %v1075_v60  ;;  %v2121_v60 = vld [vmem:[%s2949_s15 + $0x50] sm:$0xff]  ;;  %v2111_v61 = vld [vmem:[%s2949_s15] sm:$0xff] }
 0x705   : > { %1461 = vmatpush.bf16.msra.mxu0 %v1940_v11  ;;  %1605 = vmatpush.bf16.msra.mxu1 %v2117_v38 }
 0x706   : > { %v1083_v3 = vmul.f32 %v1082_v63, %v1077_v62  ;;  %v2120_v62 = vld [vmem:[%s2949_s15 + $0x48] sm:$0xff]  ;;  %v2119_v63 = vld [vmem:[%s2949_s15 + $0x40] sm:$0xff] }
 0x707   : > { %1619 = vmatpush.bf16.msra.mxu2 %v2124_v41 }
 0x708   : > { %v1084_v4 = vsub.f32 %v1076_v1, %v1083_v3  ;;  %v1250_v3 = vld [vmem:[%s2948_s14] sm:$0x3] }
 0x709   : > { %1462 = vmatpush.bf16.msra.mxu0 %v1932_v21  ;;  %1606 = vmatpush.bf16.msra.mxu1 %v2116_v40  ;;  %v1253_v2 = vperm.slane %v1250_v3, 1 }
 0x70a   : > { %v1085_v5 = vpack.c.bf16 %v1084_v4, %v1084_v4  ;;  %v1252_v4 = vperm.slane %v1250_v3, 0 }
 0x70b   : > { %1620 = vmatpush.bf16.msra.mxu2 %v2123_v56 }
 0x70c   : > { %1196 = vmatmul.bf16.vlgmr.msra.gmra.mxu3 %v1085_v5  ;;  %1209 = vmatmul.bf16.vlgmr.msrb.gmra.mxu0 %v1085_v5 }
 0x70d   : > { %1607 = vmatpush.bf16.msra.mxu1 %v2115_v42 }
 0x70f   : > { %1621 = vmatpush.bf16.msra.mxu2 %v2122_v58 }
 0x711   : > { %1608 = vmatpush.bf16.msra.mxu1 %v2114_v55 }
 0x713   : > { %1622 = vmatpush.bf16.msra.mxu2 %v2121_v60 }
 0x715   : > { %1609 = vmatpush.bf16.msra.mxu1 %v2113_v57 }
 0x717   : > { %1623 = vmatpush.bf16.msra.mxu2 %v2120_v62 }
 0x719   : > { %1610 = vmatpush.bf16.msra.mxu1 %v2112_v59 }
 0x71b   : > { %1624 = vmatpush.bf16.msra.mxu2 %v2119_v63 }
 0x71d   : > { %1611 = vmatpush.bf16.msra.mxu1 %v2111_v61 }
 0x789   : > { %v1210_v45 = vpop.f32.mrf.mxu0 }
 0x78a   : > { %v1211_v46 = vadd.f32 %v1210_v45, %v1105_v44 }
 0x78c   : > { %v1215_v8 = vmax.f32 %v1211_v46, 0.0 }
 0x78e   : > { %v1217_v48 = vpack.c.bf16 %v1215_v8, %v1215_v8 }
 0x78f   : > { %v1197_v49 = vpop.f32.mrf.mxu3 }
 0x790   : > { %v1198_v50 = vadd.f32 %v1197_v49, %v1104_v47  ;;  %1437 = vmatmul.bf16.vlgmr.msrb.gmra.mxu2 %v1217_v48  ;;  %1463 = vmatmul.bf16.vlgmr.msra.gmra.mxu0 %v1217_v48 }
 0x791   : > { %v1212_v51 = vpop.f32.mrf.mxu0 }
 0x792   : > { %v1214_v52 = vmax.f32 %v1198_v50, 0.0 }
 0x794   : > { %v1216_v53 = vpack.c.bf16 %v1214_v52, %v1214_v52 }
 0x796   : > { %1424 = vmatmul.bf16.vlgmr.msrb.gmra.mxu1 %v1216_v53  ;;  %1450 = vmatmul.bf16.vlgmr.msrb.gmra.mxu3 %v1216_v53 }
 0x797   : > { %v1199_v54 = vpop.f32.mrf.mxu3 }
 0x80d   : > { %v1464_v1 = vpop.f32.mrf.mxu0 }
 0x813   : > { %v1425_v5 = vpop.f32.mrf.mxu1  ;;  %v1438_v6 = vpop.f32.mrf.mxu2 }
 0x814   : > { %v1426_v7 = vadd.f32 %v1425_v5, %v1252_v4 }
 0x815   : > { %v1466_v9 = vpop.f32.mrf.mxu0 }
 0x816   : > { %v1439_v10 = vadd.f32 %v1438_v6, %v1426_v7 }
 0x818   : > { %v1468_v11 = vmax.f32 %v1439_v10, 0.0 }
 0x819   : > { %v1451_v12 = vpop.f32.mrf.mxu3 }
 0x81a   : > { %v1470_v13 = vpack.c.bf16 %v1468_v11, %v1468_v11  ;;  %v1452_v14 = vadd.f32 %v1451_v12, %v1253_v2 }
 0x81b   : > { %v1427_v35 = vpop.f32.mrf.mxu1  ;;  %v1440_v15 = vpop.f32.mrf.mxu2 }
 0x81c   : > { %v1465_v16 = vadd.f32 %v1464_v1, %v1452_v14  ;;  %1612 = vmatmul.bf16.vlgmr.msra.gmra.mxu1 %v1470_v13 }
 0x81e   : > { %v1469_v27 = vmax.f32 %v1465_v16, 0.0 }
 0x820   : > { %v1471_v17 = vpack.c.bf16 %v1469_v27, %v1469_v27 }
 0x821   : > { %v1453_v18 = vpop.f32.mrf.mxu3 }
 0x822   : > { %1625 = vmatmul.bf16.vlgmr.msra.gmra.mxu2 %v1471_v17 }
 0x899   : > { %v1613_v19 = vpop.f32.mrf.mxu1 }
 0x89a   : > { %v1614_v22 = vadd.f32 %v2228_v20, %v1613_v19 }
 0x8a1   : > { %v1615_v21 = vpop.f32.mrf.mxu1 }
 0x8a5   : > { %v1626_v23 = vpop.f32.mrf.mxu2 }
 0x8a6   : > { %v1627_v24 = vadd.f32 %v1626_v23, %v1614_v22 }
 0x8a8   : > { %v1630_v25 = vadd.f32 %v1627_v24, %v2715_v26 }
 0x8aa   : > { %1631 = vst.msk [vmem:[%s604_s1] sm:$0xff] %vm613_vm0, %v1630_v25 }
 0x8ab   : > { %2402 = shalt.err (!%p2399_p8)
}
 0x8ac   : > { %2143 = dma.vmem_to_hbm [thread:$0]  (%p2597_p5), %s1646_s21, 128, %s1648_s22, %s1633_s28  }
 0x8ad   : > { %v1628_v26 = vpop.f32.mrf.mxu2 }
 0x8ae PF: > { %s2986_s0 = sld [smem:[#allocation17_spill]] }
 0x8af   : > { %s2987_s16 = sld [smem:[#allocation15_spill]] }
 0x8b4   : > { %p2170_p9 = scmp.ge.s32.totalorder %s2986_s0, 2 }
 0x8b5   : > { %s1659_s24 = sand.u32 1, %s2987_s16  }
 0x8b6   : > { %p2159_p10 = pnand %p2170_p9, %p2601_p6  ;;  %s1660_s26 = scalar_lea.sflag [#allocation4], %s1659_s24 }
 0x8b8   : > { %p2160_p11 = pneg %p2159_p10 }
 0x8ba   : > { %2432 = dma.done.wait (%p2160_p11), %s1660_s26, 128  }
 0x8bb   : > { %2434 = vsyncadd (%p2160_p11), %s1660_s26, 4294967168  ;;  %s2989_s27 = sld [smem:[#allocation18_spill]]  ;;  %s2992_s24 = smov %s2441_s25 }
 0x8bc   : > { %s2990_s1 = sld [smem:[#allocation16_spill]] }
 0x8bd   : > { %s2991_s26 = sld [smem:[#allocation19_spill]] }
 0x8c1   : > { %p30_p12 = scmp.ge.s32.totalorder %s2989_s27, 4  }
 0x8c2   : > { %s2993_s25 = smov %s2990_s1 }
 0x8c3   :  { %32 = sbr.rel (!%p30_p12) target bundleno = 13 (0xd), region = 140 }
 0x8c8   :  { %1666 = vsyncpa [#allocation3], 1 }
 0x8c9   :  { %1668 = vsyncpa [#allocation3 + $0x1], 1 }
 0x8ca   :  { %1669 = vsyncpa [#allocation6], 1 }
 0x8cb   :  { %1670 = vsyncpa [#allocation9], 1 }
 0x8cc   :  { %1671 = vsyncpa [#allocation4], 1 }
 0x8cd   :  { %1673 = vsyncpa [#allocation4 + $0x1], 1 }

</bundles_post_ra>
